<compile_context>
chip_gen: v6e
topology: v6e:2x2x1
jax: 0.10.0
libtpu: 0.0.40
codegen_flags: <defaults>
</compile_context>

<pallas_src>
import jax
import jax.numpy as jnp
import numpy as np
from jax.experimental import pallas as pl
from jax.experimental.pallas import tpu as pltpu

_LANE = 128

# One-hot values are exactly 0/1, so on v6e/v7x this can be flipped to jnp.bfloat16 for
# ~2x MXU throughput on the gather/scatter matmuls (the gathered/scattered features get
# bf16-quantized). Kept f32 by default for bit-level parity with the PyTorch scatter.
_GATHER_SCATTER_DTYPE = jnp.float32


def _round_up(v, m):
    return ((v + m - 1) // m) * m


# ----------------------------------------------------------------------------
# Kernel A: per-edge gather + directional flow MLPs (grid over E tiles)
# ----------------------------------------------------------------------------
def _edge_mlp_kernel(row_ref, col_ref, x_ref, e_ref,
                     w1x_ref, w1e_ref, b1_ref, w2_ref, b2_ref,
                     msg_ref):
    """row_ref/col_ref: (TE, 1) int32; x_ref: (N_pad, Dn_pad) resident;
    e_ref: (TE, De_pad); weights stacked on a leading axis (0 = flow_in, 1 = flow_out);
    msg_ref: (TE, 2*Df_pad) -> [masked flow_in msg | masked flow_out msg]."""
    te = e_ref.shape[0]
    n_pad = x_ref.shape[0]

    row = row_ref[...]                                       # (TE, 1) int32
    col = col_ref[...]                                       # (TE, 1) int32

    # Gather x[col] on the MXU: one-hot(TE, N_pad) @ x.
    # Sentinel (-1) indices of padded edges never match -> gathered row is zero.
    nid = jax.lax.broadcasted_iota(jnp.int32, (te, n_pad), 1)
    gat = (nid == col).astype(_GATHER_SCATTER_DTYPE)         # (TE, N_pad)
    xg = jnp.dot(gat, x_ref[...].astype(_GATHER_SCATTER_DTYPE),
                 preferred_element_type=jnp.float32)         # (TE, Dn_pad)

    e = e_ref[...]                                           # (TE, De_pad)

    def flow_mlp(d):
        # cat([x[col], edge_attr], 1) @ W1 == x[col] @ W1[:Dn] + edge_attr @ W1[Dn:]
        h = (jnp.dot(xg, w1x_ref[d], preferred_element_type=jnp.float32)
             + jnp.dot(e, w1e_ref[d], preferred_element_type=jnp.float32)
             + b1_ref[d])
        h = jnp.maximum(h, 0.0)
        m = jnp.dot(h, w2_ref[d], preferred_element_type=jnp.float32) + b2_ref[d]
        return jnp.maximum(m, 0.0)                           # (TE, Df_pad)

    # Time-aware directional split (edges with row == col contribute to neither flow;
    # padded edges carry row = col = -1 so both masks are zero).
    m_in = flow_mlp(0) * (row > col).astype(jnp.float32)
    m_out = flow_mlp(1) * (row < col).astype(jnp.float32)

    half = msg_ref.shape[1] // 2                             # == Df_pad (multiple of 128)
    msg_ref[:, :half] = m_in
    msg_ref[:, half:] = m_out


# ----------------------------------------------------------------------------
# Kernel B: scatter-sum accumulation over E tiles + node MLP (grid = N x E tiles)
# ----------------------------------------------------------------------------
def _scatter_node_mlp_kernel(row_ref, msg_ref, w3_ref, b3_ref, w4_ref, b4_ref,
                             out_ref, acc_ref):
    """row_ref: (1, TE) int32; msg_ref: (TE, 2*Df_pad); acc_ref: (TN, 2*Df_pad) f32 scratch
    resident across the E (reduction) axis; out_ref: (TN, Do_pad)."""
    i = pl.program_id(0)                 # node-tile index ("parallel")
    k = pl.program_id(1)                 # edge-tile index (reduction, "arbitrary")
    tn = acc_ref.shape[0]
    te = msg_ref.shape[0]

    @pl.when(k == 0)
    def _():
        acc_ref[...] = jnp.zeros_like(acc_ref)

    # Scatter-sum: acc[n - i*TN] += sum_{e in tile : row[e] == n} msg[e]
    # (offset applied to the (1, TE) row vector, not the (TN, TE) iota; sentinel -1 and
    #  rows belonging to other node tiles simply never match).
    nid = jax.lax.broadcasted_iota(jnp.int32, (tn, te), 0)
    onehot = (nid == (row_ref[...] - i * tn)).astype(_GATHER_SCATTER_DTYPE)
    acc_ref[...] += jnp.dot(onehot, msg_ref[...].astype(_GATHER_SCATTER_DTYPE),
                            preferred_element_type=jnp.float32)

    @pl.when(k == pl.num_programs(1) - 1)
    def _():
        # node_mlp(cat([flow_in, flow_out], 1)) — the concat is already the column
        # layout of acc, and W3 was re-split at the padded boundary in the wrapper.
        h = jnp.maximum(
            jnp.dot(acc_ref[...], w3_ref[...],
                    preferred_element_type=jnp.float32) + b3_ref[...], 0.0)
        o = jnp.dot(h, w4_ref[...],
                    preferred_element_type=jnp.float32) + b4_ref[...]
        out_ref[...] = jnp.maximum(o, 0.0).astype(out_ref.dtype)


# ----------------------------------------------------------------------------
# Wrapper
# ----------------------------------------------------------------------------
def time_aware_node_model_forward(x, edge_index, edge_attr, params, *,
                                  tn=128, te=256):
    """JAX wrapper mirroring TimeAwareNodeModel.forward (node_agg_fn = sum).

    tn: node-tile size (>=128; multiple of 8).
    te: edge-tile size (multiple of 128; use 128 on v5e, 256 on v6e/v7x).
    """
    f32 = jnp.float32
    N, Dn = x.shape
    E, De = edge_attr.shape
    p_in, p_out, p_node = params["flow_in"], params["flow_out"], params["node"]
    Hf = p_in["w1"].shape[1]
    Df = p_in["w2"].shape[1]
    Hn = p_node["w3"].shape[1]
    Do = p_node["w4"].shape[1]

    # Lane-dense padding of every feature dim; tile-aligned padding of N and E.
    Dn_p, De_p = _round_up(Dn, _LANE), _round_up(De, _LANE)
    Hf_p, Df_p = _round_up(Hf, _LANE), _round_up(Df, _LANE)
    Hn_p, Do_p = _round_up(Hn, _LANE), _round_up(Do, _LANE)
    N_p = _round_up(N, tn)
    E_p = _round_up(E, te)
    n_nt = N_p // tn
    n_et = E_p // te

    def pad2(a, r, c):
        a = jnp.asarray(a, f32)
        return jnp.pad(a, ((0, r - a.shape[0]), (0, c - a.shape[1])))

    x_p = pad2(x, N_p, Dn_p)
    e_p = pad2(edge_attr, E_p, De_p)

    row = edge_index[0].astype(jnp.int32)
    col = edge_index[1].astype(jnp.int32)
    pad_idx = lambda v: jnp.pad(v, (0, E_p - E), constant_values=-1)   # -1 = inert sentinel
    row_p = pad_idx(row)
    col_p = pad_idx(col)
    row_sub = row_p.reshape(E_p, 1)     # sublane-major for kernel A
    col_sub = col_p.reshape(E_p, 1)
    row_lane = row_p.reshape(1, E_p)    # lane-major for kernel B

    # Flow MLP weights: W1 is (Dn+De, Hf) -> split into x-rows / edge-rows (folds the
    # per-edge concat into the first Linear), pad, and stack the two directions on a
    # leading axis (index 0 = flow_in, 1 = flow_out).
    def dir_params(p):
        w1 = jnp.asarray(p["w1"], f32)
        return (pad2(w1[:Dn], Dn_p, Hf_p),
                pad2(w1[Dn:], De_p, Hf_p),
                pad2(jnp.asarray(p["b1"], f32).reshape(1, Hf), 1, Hf_p),
                pad2(p["w2"], Hf_p, Df_p),
                pad2(jnp.asarray(p["b2"], f32).reshape(1, Df), 1, Df_p))

    di, do = dir_params(p_in), dir_params(p_out)
    w1x_s, w1e_s, b1_s, w2_s, b2_s = (jnp.stack([a, b]) for a, b in zip(di, do))

    # Node MLP: W3 rows [0:Df] multiply flow_in, rows [Df:2Df] multiply flow_out;
    # re-split at the padded boundary Df_p.
    w3 = jnp.asarray(p_node["w3"], f32)
    w3_p = jnp.zeros((2 * Df_p, Hn_p), f32)
    w3_p = w3_p.at[:Df, :Hn].set(w3[:Df])
    w3_p = w3_p.at[Df_p:Df_p + Df, :Hn].set(w3[Df:])
    b3_p = pad2(jnp.asarray(p_node["b3"], f32).reshape(1, Hn), 1, Hn_p)
    w4_p = pad2(p_node["w4"], Hn_p, Do_p)
    b4_p = pad2(jnp.asarray(p_node["b4"], f32).reshape(1, Do), 1, Do_p)

    vmem_limit = 32 * 1024 * 1024   # explicit; well under v7x's 64 MiB physical VMEM

    # -------- Kernel A: per-edge messages (E-tiled, independent tiles) --------
    msg = pl.pallas_call(
        _edge_mlp_kernel,
        out_shape=jax.ShapeDtypeStruct((E_p, 2 * Df_p), f32),
        grid=(n_et,),
        in_specs=[
            pl.BlockSpec((te, 1), lambda k: (k, 0)),             # row
            pl.BlockSpec((te, 1), lambda k: (k, 0)),             # col
            pl.BlockSpec((N_p, Dn_p), lambda k: (0, 0)),         # x (resident)
            pl.BlockSpec((te, De_p), lambda k: (k, 0)),          # edge_attr tile
            pl.BlockSpec((2, Dn_p, Hf_p), lambda k: (0, 0, 0)),  # W1[:Dn] (in/out)
            pl.BlockSpec((2, De_p, Hf_p), lambda k: (0, 0, 0)),  # W1[Dn:] (in/out)
            pl.BlockSpec((2, 1, Hf_p), lambda k: (0, 0, 0)),     # b1 (in/out)
            pl.BlockSpec((2, Hf_p, Df_p), lambda k: (0, 0, 0)),  # W2 (in/out)
            pl.BlockSpec((2, 1, Df_p), lambda k: (0, 0, 0)),     # b2 (in/out)
        ],
        out_specs=pl.BlockSpec((te, 2 * Df_p), lambda k: (k, 0)),
        compiler_params=pltpu.CompilerParams(
            dimension_semantics=("parallel",),
            vmem_limit_bytes=vmem_limit),
    )(row_sub, col_sub, x_p, e_p, w1x_s, w1e_s, b1_s, w2_s, b2_s)

    # -------- Kernel B: scatter-sum over E + node MLP (N-parallel, E-reduction) -----
    out_p = pl.pallas_call(
        _scatter_node_mlp_kernel,
        out_shape=jax.ShapeDtypeStruct((N_p, Do_p), f32),
        grid=(n_nt, n_et),
        in_specs=[
            pl.BlockSpec((1, te), lambda i, k: (0, k)),          # row (lane-major)
            pl.BlockSpec((te, 2 * Df_p), lambda i, k: (k, 0)),   # per-edge messages
            pl.BlockSpec((2 * Df_p, Hn_p), lambda i, k: (0, 0)), # W3 (resident)
            pl.BlockSpec((1, Hn_p), lambda i, k: (0, 0)),        # b3
            pl.BlockSpec((Hn_p, Do_p), lambda i, k: (0, 0)),     # W4
            pl.BlockSpec((1, Do_p), lambda i, k: (0, 0)),        # b4
        ],
        out_specs=pl.BlockSpec((tn, Do_p), lambda i, k: (i, 0)),
        scratch_shapes=[pltpu.VMEM((tn, 2 * Df_p), f32)],        # flow accumulator
        compiler_params=pltpu.CompilerParams(
            dimension_semantics=("parallel", "arbitrary"),
            vmem_limit_bytes=vmem_limit),
    )(row_lane, msg, w3_p, b3_p, w4_p, b4_p)

    return out_p[:N, :Do]


# ----------------------------------------------------------------------------
# Pure-JAX reference of the same forward pass
# ----------------------------------------------------------------------------
def _reference(x, edge_index, edge_attr, params):
    N = x.shape[0]
    row, col = edge_index[0], edge_index[1]

    def mlp2(inp, w1, b1, w2, b2):
        h = jnp.maximum(inp @ w1 + b1, 0.0)
        return jnp.maximum(h @ w2 + b2, 0.0)

    edge_in = jnp.concatenate([x[col], edge_attr], axis=1)

    def flow(mask, p):
        m = mlp2(edge_in, p["w1"], p["b1"], p["w2"], p["b2"])
        m = m * mask[:, None].astype(jnp.float32)
        return jnp.zeros((N, m.shape[1]), jnp.float32).at[row].add(m)

    flow_out = flow(row < col, params["flow_out"])
    flow_in = flow(row > col, params["flow_in"])
    fl = jnp.concatenate([flow_in, flow_out], axis=1)
    pn = params["node"]
    return mlp2(fl, pn["w3"], pn["b3"], pn["w4"], pn["b4"])


if __name__ == "__main__":
    # Small shapes consistent with the module's forward pass.
    N, E = 24, 300            # nodes, edges
    Dn, De = 32, 16           # node / edge feature dims
    Hf, Df = 64, 16           # flow-MLP hidden / output dims
    Hn, Do = 32, 16           # node-MLP hidden / output dims

    key = jax.random.PRNGKey(0)
    keys = jax.random.split(key, 8)

    x = jax.random.normal(keys[0], (N, Dn), jnp.float32)
    edge_attr = jax.random.normal(keys[1], (E, De), jnp.float32)
    edge_index = jnp.stack([
        jax.random.randint(keys[2], (E,), 0, N),
        jax.random.randint(keys[3], (E,), 0, N),
    ], axis=0)

    def mlp_params(k, din, h, dout, scale=0.1):
        k1, k2, k3, k4 = jax.random.split(k, 4)
        return {"w1": jax.random.normal(k1, (din, h), jnp.float32) * scale,
                "b1": jax.random.normal(k2, (h,), jnp.float32) * scale,
                "w2": jax.random.normal(k3, (h, dout), jnp.float32) * scale,
                "b2": jax.random.normal(k4, (dout,), jnp.float32) * scale}

    p_in = mlp_params(keys[4], Dn + De, Hf, Df)
    p_out = mlp_params(keys[5], Dn + De, Hf, Df)
    p_nd = mlp_params(keys[6], 2 * Df, Hn, Do)
    params = {
        "flow_in": p_in,
        "flow_out": p_out,
        "node": {"w3": p_nd["w1"], "b3": p_nd["b1"],
                 "w4": p_nd["w2"], "b4": p_nd["b2"]},
    }

    out = time_aware_node_model_forward(x, edge_index, edge_attr, params)
    out = jax.block_until_ready(out)

    ref = jax.block_until_ready(_reference(x, edge_index, edge_attr, params))
    np.testing.assert_allclose(np.asarray(out), np.asarray(ref), rtol=1e-4, atol=1e-4)

    print("KERNEL_OK")
</pallas_src>

<mosaic_0001>
module attributes {stable_mosaic.version = 11 : i64} {
  func.func @_edge_mlp_kernel(%arg0: i32, %arg1: memref<256x1xi32, #tpu.memory_space<vmem>>, %arg2: memref<256x1xi32, #tpu.memory_space<vmem>>, %arg3: memref<128x128xf32, #tpu.memory_space<vmem>>, %arg4: memref<256x128xf32, #tpu.memory_space<vmem>>, %arg5: memref<2x128x128xf32, #tpu.memory_space<vmem>>, %arg6: memref<2x128x128xf32, #tpu.memory_space<vmem>>, %arg7: memref<2x1x128xf32, #tpu.memory_space<vmem>>, %arg8: memref<2x128x128xf32, #tpu.memory_space<vmem>>, %arg9: memref<2x1x128xf32, #tpu.memory_space<vmem>>, %arg10: memref<256x256xf32, #tpu.memory_space<vmem>>) attributes {dimension_semantics = [#tpu.dimension_semantics<parallel>], iteration_bounds = array<i64: 2>, scalar_prefetch = 0 : i64, scratch_operands = 0 : i64, tpu.core_type = #tpu.core_type<tc>, window_params = [{transform_indices = @transform_0, window_bounds = array<i64: 256, 1>}, {transform_indices = @transform_1, window_bounds = array<i64: 256, 1>}, {pipeline_mode = #tpu.pipeline_mode<synchronous>, transform_indices = @transform_2, window_bounds = array<i64: 128, 128>}, {transform_indices = @transform_3, window_bounds = array<i64: 256, 128>}, {pipeline_mode = #tpu.pipeline_mode<synchronous>, transform_indices = @transform_4, window_bounds = array<i64: 2, 128, 128>}, {pipeline_mode = #tpu.pipeline_mode<synchronous>, transform_indices = @transform_5, window_bounds = array<i64: 2, 128, 128>}, {pipeline_mode = #tpu.pipeline_mode<synchronous>, transform_indices = @transform_6, window_bounds = array<i64: 2, 1, 128>}, {pipeline_mode = #tpu.pipeline_mode<synchronous>, transform_indices = @transform_7, window_bounds = array<i64: 2, 128, 128>}, {pipeline_mode = #tpu.pipeline_mode<synchronous>, transform_indices = @transform_8, window_bounds = array<i64: 2, 1, 128>}, {transform_indices = @transform_9, window_bounds = array<i64: 256, 256>}]} {
    %c0 = arith.constant 0 : index
    %c0_0 = arith.constant 0 : index
    %0 = vector.load %arg1[%c0, %c0_0] : memref<256x1xi32, #tpu.memory_space<vmem>>, vector<256x1xi32>
    %c0_1 = arith.constant 0 : index
    %c0_2 = arith.constant 0 : index
    %1 = vector.load %arg2[%c0_1, %c0_2] : memref<256x1xi32, #tpu.memory_space<vmem>>, vector<256x1xi32>
    %2 = tpu.iota {dimensions = array<i32: 1>} : vector<256x128xi32>
    %3 = vector.broadcast %1 : vector<256x1xi32> to vector<256x128xi32>
    %4 = arith.cmpi eq, %2, %3 : vector<256x128xi32>
    %5 = arith.extui %4 : vector<256x128xi1> to vector<256x128xi32>
    %6 = arith.sitofp %5 : vector<256x128xi32> to vector<256x128xf32>
    %c0_3 = arith.constant 0 : index
    %c0_4 = arith.constant 0 : index
    %7 = vector.load %arg3[%c0_3, %c0_4] : memref<128x128xf32, #tpu.memory_space<vmem>>, vector<128x128xf32>
    %cst = arith.constant dense<0.000000e+00> : vector<256x128xf32>
    %8 = tpu.matmul %6, %7, %cst {dimension_numbers = #tpu.dot_dimension_numbers<[1], [0], [0], [1], [0, 0, 1, 1], [], []>} : vector<256x128xf32>, vector<128x128xf32>, vector<256x128xf32> -> vector<256x128xf32>
    %c0_5 = arith.constant 0 : index
    %c0_6 = arith.constant 0 : index
    %9 = vector.load %arg4[%c0_5, %c0_6] : memref<256x128xf32, #tpu.memory_space<vmem>>, vector<256x128xf32>
    %c0_7 = arith.constant 0 : index
    %c0_8 = arith.constant 0 : index
    %c0_9 = arith.constant 0 : index
    %10 = vector.load %arg5[%c0_7, %c0_8, %c0_9] : memref<2x128x128xf32, #tpu.memory_space<vmem>>, vector<1x128x128xf32>
    %11 = vector.shape_cast %10 : vector<1x128x128xf32> to vector<128x128xf32>
    %cst_10 = arith.constant dense<0.000000e+00> : vector<256x128xf32>
    %12 = tpu.matmul %8, %11, %cst_10 {dimension_numbers = #tpu.dot_dimension_numbers<[1], [0], [0], [1], [0, 0, 1, 1], [], []>} : vector<256x128xf32>, vector<128x128xf32>, vector<256x128xf32> -> vector<256x128xf32>
    %c0_11 = arith.constant 0 : index
    %c0_12 = arith.constant 0 : index
    %c0_13 = arith.constant 0 : index
    %13 = vector.load %arg6[%c0_11, %c0_12, %c0_13] : memref<2x128x128xf32, #tpu.memory_space<vmem>>, vector<1x128x128xf32>
    %14 = vector.shape_cast %13 : vector<1x128x128xf32> to vector<128x128xf32>
    %cst_14 = arith.constant dense<0.000000e+00> : vector<256x128xf32>
    %15 = tpu.matmul %9, %14, %cst_14 {dimension_numbers = #tpu.dot_dimension_numbers<[1], [0], [0], [1], [0, 0, 1, 1], [], []>} : vector<256x128xf32>, vector<128x128xf32>, vector<256x128xf32> -> vector<256x128xf32>
    %16 = arith.addf %12, %15 : vector<256x128xf32>
    %c0_15 = arith.constant 0 : index
    %c0_16 = arith.constant 0 : index
    %c0_17 = arith.constant 0 : index
    %17 = vector.load %arg7[%c0_15, %c0_16, %c0_17] : memref<2x1x128xf32, #tpu.memory_space<vmem>>, vector<1x1x128xf32>
    %18 = vector.shape_cast %17 : vector<1x1x128xf32> to vector<1x128xf32>
    %19 = vector.broadcast %18 : vector<1x128xf32> to vector<256x128xf32>
    %20 = arith.addf %16, %19 : vector<256x128xf32>
    %cst_18 = arith.constant 0.000000e+00 : f32
    %21 = vector.broadcast %cst_18 : f32 to vector<256x128xf32>
    %22 = arith.maximumf %20, %21 : vector<256x128xf32>
    %c0_19 = arith.constant 0 : index
    %c0_20 = arith.constant 0 : index
    %c0_21 = arith.constant 0 : index
    %23 = vector.load %arg8[%c0_19, %c0_20, %c0_21] : memref<2x128x128xf32, #tpu.memory_space<vmem>>, vector<1x128x128xf32>
    %24 = vector.shape_cast %23 : vector<1x128x128xf32> to vector<128x128xf32>
    %cst_22 = arith.constant dense<0.000000e+00> : vector<256x128xf32>
    %25 = tpu.matmul %22, %24, %cst_22 {dimension_numbers = #tpu.dot_dimension_numbers<[1], [0], [0], [1], [0, 0, 1, 1], [], []>} : vector<256x128xf32>, vector<128x128xf32>, vector<256x128xf32> -> vector<256x128xf32>
    %c0_23 = arith.constant 0 : index
    %c0_24 = arith.constant 0 : index
    %c0_25 = arith.constant 0 : index
    %26 = vector.load %arg9[%c0_23, %c0_24, %c0_25] : memref<2x1x128xf32, #tpu.memory_space<vmem>>, vector<1x1x128xf32>
    %27 = vector.shape_cast %26 : vector<1x1x128xf32> to vector<1x128xf32>
    %28 = vector.broadcast %27 : vector<1x128xf32> to vector<256x128xf32>
    %29 = arith.addf %25, %28 : vector<256x128xf32>
    %cst_26 = arith.constant 0.000000e+00 : f32
    %30 = vector.broadcast %cst_26 : f32 to vector<256x128xf32>
    %31 = arith.maximumf %29, %30 : vector<256x128xf32>
    %32 = arith.cmpi sgt, %0, %1 : vector<256x1xi32>
    %33 = arith.extui %32 : vector<256x1xi1> to vector<256x1xi32>
    %34 = arith.sitofp %33 : vector<256x1xi32> to vector<256x1xf32>
    %35 = vector.broadcast %34 : vector<256x1xf32> to vector<256x128xf32>
    %36 = arith.mulf %31, %35 : vector<256x128xf32>
    %c1 = arith.constant 1 : index
    %c0_27 = arith.constant 0 : index
    %c0_28 = arith.constant 0 : index
    %37 = vector.load %arg5[%c1, %c0_27, %c0_28] : memref<2x128x128xf32, #tpu.memory_space<vmem>>, vector<1x128x128xf32>
    %38 = vector.shape_cast %37 : vector<1x128x128xf32> to vector<128x128xf32>
    %cst_29 = arith.constant dense<0.000000e+00> : vector<256x128xf32>
    %39 = tpu.matmul %8, %38, %cst_29 {dimension_numbers = #tpu.dot_dimension_numbers<[1], [0], [0], [1], [0, 0, 1, 1], [], []>} : vector<256x128xf32>, vector<128x128xf32>, vector<256x128xf32> -> vector<256x128xf32>
    %c1_30 = arith.constant 1 : index
    %c0_31 = arith.constant 0 : index
    %c0_32 = arith.constant 0 : index
    %40 = vector.load %arg6[%c1_30, %c0_31, %c0_32] : memref<2x128x128xf32, #tpu.memory_space<vmem>>, vector<1x128x128xf32>
    %41 = vector.shape_cast %40 : vector<1x128x128xf32> to vector<128x128xf32>
    %cst_33 = arith.constant dense<0.000000e+00> : vector<256x128xf32>
    %42 = tpu.matmul %9, %41, %cst_33 {dimension_numbers = #tpu.dot_dimension_numbers<[1], [0], [0], [1], [0, 0, 1, 1], [], []>} : vector<256x128xf32>, vector<128x128xf32>, vector<256x128xf32> -> vector<256x128xf32>
    %43 = arith.addf %39, %42 : vector<256x128xf32>
    %c1_34 = arith.constant 1 : index
    %c0_35 = arith.constant 0 : index
    %c0_36 = arith.constant 0 : index
    %44 = vector.load %arg7[%c1_34, %c0_35, %c0_36] : memref<2x1x128xf32, #tpu.memory_space<vmem>>, vector<1x1x128xf32>
    %45 = vector.shape_cast %44 : vector<1x1x128xf32> to vector<1x128xf32>
    %46 = vector.broadcast %45 : vector<1x128xf32> to vector<256x128xf32>
    %47 = arith.addf %43, %46 : vector<256x128xf32>
    %cst_37 = arith.constant 0.000000e+00 : f32
    %48 = vector.broadcast %cst_37 : f32 to vector<256x128xf32>
    %49 = arith.maximumf %47, %48 : vector<256x128xf32>
    %c1_38 = arith.constant 1 : index
    %c0_39 = arith.constant 0 : index
    %c0_40 = arith.constant 0 : index
    %50 = vector.load %arg8[%c1_38, %c0_39, %c0_40] : memref<2x128x128xf32, #tpu.memory_space<vmem>>, vector<1x128x128xf32>
    %51 = vector.shape_cast %50 : vector<1x128x128xf32> to vector<128x128xf32>
    %cst_41 = arith.constant dense<0.000000e+00> : vector<256x128xf32>
    %52 = tpu.matmul %49, %51, %cst_41 {dimension_numbers = #tpu.dot_dimension_numbers<[1], [0], [0], [1], [0, 0, 1, 1], [], []>} : vector<256x128xf32>, vector<128x128xf32>, vector<256x128xf32> -> vector<256x128xf32>
    %c1_42 = arith.constant 1 : index
    %c0_43 = arith.constant 0 : index
    %c0_44 = arith.constant 0 : index
    %53 = vector.load %arg9[%c1_42, %c0_43, %c0_44] : memref<2x1x128xf32, #tpu.memory_space<vmem>>, vector<1x1x128xf32>
    %54 = vector.shape_cast %53 : vector<1x1x128xf32> to vector<1x128xf32>
    %55 = vector.broadcast %54 : vector<1x128xf32> to vector<256x128xf32>
    %56 = arith.addf %52, %55 : vector<256x128xf32>
    %cst_45 = arith.constant 0.000000e+00 : f32
    %57 = vector.broadcast %cst_45 : f32 to vector<256x128xf32>
    %58 = arith.maximumf %56, %57 : vector<256x128xf32>
    %59 = arith.cmpi slt, %0, %1 : vector<256x1xi32>
    %60 = arith.extui %59 : vector<256x1xi1> to vector<256x1xi32>
    %61 = arith.sitofp %60 : vector<256x1xi32> to vector<256x1xf32>
    %62 = vector.broadcast %61 : vector<256x1xf32> to vector<256x128xf32>
    %63 = arith.mulf %58, %62 : vector<256x128xf32>
    %c0_46 = arith.constant 0 : index
    %c0_47 = arith.constant 0 : index
    %64 = vector.load %arg10[%c0_46, %c0_47] : memref<256x256xf32, #tpu.memory_space<vmem>>, vector<256x128xf32>
    tpu.vector_store %arg10[%c0_46, %c0_47], %36 {strides = array<i32>} : memref<256x256xf32, #tpu.memory_space<vmem>>, vector<256x128xf32>,
    %c0_48 = arith.constant 0 : index
    %c128 = arith.constant 128 : index
    %65 = vector.load %arg10[%c0_48, %c128] : memref<256x256xf32, #tpu.memory_space<vmem>>, vector<256x128xf32>
    tpu.vector_store %arg10[%c0_48, %c128], %63 {strides = array<i32>} : memref<256x256xf32, #tpu.memory_space<vmem>>, vector<256x128xf32>,
    return
  }
  func.func @transform_0(%arg0: i32) -> (i32, i32) {
    %c0_i32 = arith.constant 0 : i32
    %c0_i32_0 = arith.constant 0 : i32
    return %arg0, %c0_i32 : i32, i32
  }
  func.func @transform_1(%arg0: i32) -> (i32, i32) {
    %c0_i32 = arith.constant 0 : i32
    %c0_i32_0 = arith.constant 0 : i32
    return %arg0, %c0_i32 : i32, i32
  }
  func.func @transform_2(%arg0: i32) -> (i32, i32) {
    %c0_i32 = arith.constant 0 : i32
    %c0_i32_0 = arith.constant 0 : i32
    %c0_i32_1 = arith.constant 0 : i32
    return %c0_i32, %c0_i32_0 : i32, i32
  }
  func.func @transform_3(%arg0: i32) -> (i32, i32) {
    %c0_i32 = arith.constant 0 : i32
    %c0_i32_0 = arith.constant 0 : i32
    return %arg0, %c0_i32 : i32, i32
  }
  func.func @transform_4(%arg0: i32) -> (i32, i32, i32) {
    %c0_i32 = arith.constant 0 : i32
    %c0_i32_0 = arith.constant 0 : i32
    %c0_i32_1 = arith.constant 0 : i32
    %c0_i32_2 = arith.constant 0 : i32
    return %c0_i32, %c0_i32_0, %c0_i32_1 : i32, i32, i32
  }
  func.func @transform_5(%arg0: i32) -> (i32, i32, i32) {
    %c0_i32 = arith.constant 0 : i32
    %c0_i32_0 = arith.constant 0 : i32
    %c0_i32_1 = arith.constant 0 : i32
    %c0_i32_2 = arith.constant 0 : i32
    return %c0_i32, %c0_i32_0, %c0_i32_1 : i32, i32, i32
  }
  func.func @transform_6(%arg0: i32) -> (i32, i32, i32) {
    %c0_i32 = arith.constant 0 : i32
    %c0_i32_0 = arith.constant 0 : i32
    %c0_i32_1 = arith.constant 0 : i32
    %c0_i32_2 = arith.constant 0 : i32
    return %c0_i32, %c0_i32_0, %c0_i32_1 : i32, i32, i32
  }
  func.func @transform_7(%arg0: i32) -> (i32, i32, i32) {
    %c0_i32 = arith.constant 0 : i32
    %c0_i32_0 = arith.constant 0 : i32
    %c0_i32_1 = arith.constant 0 : i32
    %c0_i32_2 = arith.constant 0 : i32
    return %c0_i32, %c0_i32_0, %c0_i32_1 : i32, i32, i32
  }
  func.func @transform_8(%arg0: i32) -> (i32, i32, i32) {
    %c0_i32 = arith.constant 0 : i32
    %c0_i32_0 = arith.constant 0 : i32
    %c0_i32_1 = arith.constant 0 : i32
    %c0_i32_2 = arith.constant 0 : i32
    return %c0_i32, %c0_i32_0, %c0_i32_1 : i32, i32, i32
  }
  func.func @transform_9(%arg0: i32) -> (i32, i32) {
    %c0_i32 = arith.constant 0 : i32
    %c0_i32_0 = arith.constant 0 : i32
    return %arg0, %c0_i32 : i32, i32
  }
}

</mosaic_0001>

<bundles_post_ra>
// kernel: tpu_custom_call.1
= control target key start
LH: loop header
LB: loop body
LE: loop exit
PB: predicated region body
PF: predicated region fallthrough
CT: control target
= control target key end

     0   :  { %14 = vsyncpa [#allocation3], 0  ;;  %s6583_s0 = inlined_call_operand.vmem [shape: s32[512,1], index: 0, kind: input, shape index: {}]   ;;  %s6584_s1 = inlined_call_operand.vmem [shape: s32[512,1], index: 1, kind: input, shape index: {}]   ;;  %s6585_s2 = inlined_call_operand.hbm [shape: f32[128,128], index: 2, kind: input, shape index: {}]   ;;  %s6586_s3 = inlined_call_operand.vmem [shape: f32[512,128], index: 3, kind: input, shape index: {}]   ;;  %s6587_s4 = inlined_call_operand.vmem [shape: f32[2,128,128], index: 4, kind: input, shape index: {}]   ;;  %s6588_s5 = inlined_call_operand.vmem [shape: f32[2,128,128], index: 5, kind: input, shape index: {}]   ;;  %s6589_s6 = inlined_call_operand.vmem [shape: f32[2,1,128], index: 6, kind: input, shape index: {}]   ;;  %s6590_s7 = inlined_call_operand.hbm [shape: f32[2,128,128], index: 7, kind: input, shape index: {}]   ;;  %s6591_s8 = inlined_call_operand.vmem [shape: f32[2,1,128], index: 8, kind: input, shape index: {}]   ;;  %s6592_s9 = inlined_call_operand.hbm [shape: f32[512,256], index: 9, kind: output, shape index: {}]  }
   0x1   :  { %15 = vsyncpa [#allocation6], 0 }
   0x2   :  { %16 = vsyncpa [#allocation4], 0 }
   0x3   :  { %18 = vsyncpa [#allocation4 + $0x1], 0  ;;  %s4901_s30 = smov 0   ;;  %s4903_s10 = smov 0  }
   0x4   :  { %s4905_s11 = smov 0   ;;  %s4907_s12 = smov 0  }
   0x5 LB: > { %s4922_s13 = sadd.s32 4294967295, %s4839_s12   ;;  %s3373_s14 = sadd.s32 4294967294, %s4839_s12   ;;  %s4839_s12 = sphi %s4907_s12, %s6764_s12   ;;  %s4835_s11 = sphi %s4905_s11, %s6763_s11   ;;  %s4831_s10 = sphi %s4903_s10, %s6762_s10   ;;  %s4827_s30 = sphi %s4901_s30, %s6761_s30  }
   0x6   : > { %s4926_s15 = sadd.s32 1, %s4839_s12   ;;  %s235_s16 = sadd.s32 1, %s4835_s11 }
   0x7   : > { %s232_s17 = ssub.s32 %s4839_s12, %s4926_s15  ;;  %p245_p0 = scmp.ne.s32.totalorder %s4835_s11, %s4831_s10 }
   0x8   : > { %p233_p1 = scmp.eq.s32.totalorder %s232_s17, 0  ;;  %p246_p2 = scmp.eq.s32.totalorder %s4922_s13, 1 }
   0x9   : > { %p251_p3 = scmp.ne.s32.totalorder %s4831_s10, %s4827_s30  ;;  %p252_p4 = scmp.eq.s32.totalorder %s3373_s14, 1 }
   0xa   : > { %s4937_s18 = scalar_select %p233_p1, %s4835_s11, %s235_s16  }
   0xb   : > { %p4939_p5 = por %p246_p2, %p245_p0  ;;  %p4943_p6 = por %p252_p4, %p251_p3 }
   0xc   : > { %p3374_p7 = scmp.ge.s32.totalorder %s4839_s12, 1  ;;  %p259_p8 = scmp.lt.s32.totalorder %s4839_s12, 3 }
   0xd   : > { %s6641_s20 = scalar_select %p4943_p6, 1, 0 }
   0xe   : > { %p6593_p9 = scmp.eq.s32.totalorder %s4922_s13, 0  ;;  %p4950_p10 = pnand %p3374_p7, %p259_p8 }
   0xf   : > { %s4841_s22 = smov [#allocation2]   ;;  %s4842_s25 = smov [#allocation5]  }
  0x10   : > { %s271_s23 = sshll.u32 %s4841_s22, 4  ;;  %p4500_p11 = pneg %p4950_p10  ;;  %s272_s23 = int_to_ptr.vmem [resolvable:$true] %s271_s23 }
  0x11   : > { %s293_s26 = sshll.u32 %s4842_s25, 4  ;;  %s4730_s27 = scalar_lea.vmem %s272_s23, 2048  ;;  %s294_s26 = int_to_ptr.vmem [resolvable:$true] %s293_s26 }
  0x12   : > { %p4958_p12 = pnand %p6593_p9, %p4500_p11  ;;  %p4731_p0 = scmp.ne.s32.totalorder %s272_s23, %s4730_s27 }
  0x13   : > { %p4738_p3 = scmp.lt.s32.totalorder %s272_s23, %s272_s23  ;;  %p4739_p4 = scmp.lt.s32.totalorder %s4730_s27, %s4730_s27 }
  0x14   : > { %p4721_p13 = pneg %p4958_p12 }
  0x15   : > { %p4740_p7 = por %p4739_p4, %p4738_p3 }
  0x16   : > { %p4733_p1 = pnand %p4731_p0, %p4721_p13 }
  0x18   : > { %p4734_p2 = pneg %p4733_p1 }
  0x1a   : > { %p4741_p8 = pnand %p4740_p7, %p4734_p2 }
  0x1c   : > { %4744 = shalt.err (!%p4741_p8)
}
  0x1d   : > { %s4843_s28 = smov 128   ;;  %s4844_s29 = smov 8  }
  0x1e   : > { %4503 = dma.hbm_to_vmem [thread:$0]  (!%p4958_p12), %s6585_s2, 2048, %s272_s23, [#allocation3], %s4843_s28, %s4843_s28, %s4844_s29  }
  0x1f   : > { %s4756_s17 = scalar_lea.vmem %s294_s26, 4096  ;;  %p4764_p9 = scmp.lt.s32.totalorder %s294_s26, %s294_s26 }
  0x20   : > { %p4757_p11 = scmp.ne.s32.totalorder %s294_s26, %s4756_s17  ;;  %p4765_p6 = scmp.lt.s32.totalorder %s4756_s17, %s4756_s17 }
  0x22   : > { %p4759_p0 = pnand %p4757_p11, %p4721_p13  ;;  %p4766_p3 = por %p4765_p6, %p4764_p9 }
  0x24   : > { %p4760_p1 = pneg %p4759_p0 }
  0x26   : > { %p4767_p2 = pnand %p4766_p3, %p4760_p1 }
  0x28   : > { %4770 = shalt.err (!%p4767_p2)
}
  0x29   : > { %4506 = dma.hbm_to_vmem [thread:$0]  (!%p4958_p12), %s6590_s7, 4096, %s294_s26, [#allocation6], %s4843_s28, %s4843_s28, %s4844_s29  }
  0x2a   : > { %339 = sbr.rel (%p4950_p10) target bundleno = 1128 (0x468), region = 56 }
  0x2f   : > { %p6644_p4 = scmp.eq.s32.totalorder %s4922_s13, 0 }
  0x31   : > { %4814 = dma.done.wait (%p6644_p4), [#allocation3], 2048   ;;  %p6645_p13 = pmov %p6644_p4 }
  0x32   : > { %p6646_p7 = pmov %p6644_p4 }
  0x33   : > { %4816 = vsyncadd (%p6645_p13), [#allocation3], 4294965248 }
  0x34   : > { %4818 = dma.done.wait (%p6646_p7), [#allocation6], 4096   ;;  %p6647_p6 = pmov %p6644_p4 }
  0x35   : > { %s3382_s23 = sshll.u32 %s4922_s13, 5  ;;  %v4845_v0 = vmov 0   ;;  %v681_v31 = vld [vmem:[#allocation2 + $0x78] sm:$0xff]  ;;  %v680_v32 = vld [vmem:[#allocation2 + $0x70] sm:$0xff]  ;;  %v679_v51 = vld [vmem:[#allocation2 + $0x68] sm:$0xff]  ;;  %s386_s26 = sand.u32 1, %s4831_s10  }
  0x36   : > { %4820 = vsyncadd (%p6647_p6), [#allocation6], 4294963200  ;;  %4558 = vset.pattern.permute.xlu1 %v4845_v0  ;;  %4557 = vset.pattern.permute.xlu0 %v4845_v0  ;;  %p390_p9 = scmp.lt.s32.totalorder %s3382_s23, 63  ;;  %v678_v61 = vld [vmem:[#allocation2 + $0x60] sm:$0xff]  ;;  %s3561_s25 = sshll.u32 %s4922_s13, 13 }
  0x37   : > { %3898 = vmatprep.subr.mxu0 %v681_v31  ;;  %4458 = vmatprep.subr.mxu1 %v681_v31  ;;  %s6535_s28 = scalar_lea.hbm %s6592_s9, %s3561_s25  ;;  %s6543_s13 = scalar_lea.sflag [#allocation4], %s386_s26 }
  0x38   : > { %s6766_s23 = smov (!%p390_p9, %s3382_s23), 63  ;;  %3899 = vmatpush3.msra.mxu0 %v681_v31  ;;  %4474 = vmatpush3.msra.mxu1 %v681_v31  ;;  %v6631_v31 = vmov 0.0   ;;  %s4848_s16 = smov [#allocation7]  }
  0x39   : > { %s4991_s21 = sshll.u32 %s6766_s23, 3  ;;  %3900 = vmatprep.subr.mxu0 %v680_v32  ;;  %4459 = vmatprep.subr.mxu1 %v680_v32 }
  0x3a   : > { %s4997_s27 = scalar_lea.vmem %s6584_s1, %s4991_s21  ;;  %s5035_s14 = scalar_lea.vmem %s6583_s0, %s4991_s21  ;;  %3901 = vmatpush3.msra.mxu0 %v680_v32  ;;  %4475 = vmatpush3.msra.mxu1 %v680_v32 }
  0x3b   : > { %v5000_v1 = vld [vmem:[%s4997_s27 + $0x10] sm:$0xff]  ;;  %v5003_v2 = vld [vmem:[%s4997_s27] sm:$0xff]  ;;  %v5008_v3 = vld [vmem:[%s4997_s27 + $0x18] sm:$0xff]  ;;  %3902 = vmatprep.subr.mxu0 %v679_v51  ;;  %4460 = vmatprep.subr.mxu1 %v679_v51  ;;  %s5811_s29 = scalar_lea.vmem %s6586_s3, %s4991_s21  ;;  %s4775_s21 = sshll.u32 %s4848_s16, 4  ;;  %s4776_s21 = int_to_ptr.vmem [resolvable:$false] %s4775_s21 }
  0x3c   : > { %481 = vperm.xlu1 %4558, %v5000_v1   ;;  %475 = vperm.xlu0 %4557, %v5003_v2   ;;  %v5011_v4 = vld [vmem:[%s4997_s27 + $0x8] sm:$0xff]  ;;  %v5019_v6 = vld [vmem:[%s4997_s27 + $0x20] sm:$0xff]  ;;  %v5024_v7 = vld [vmem:[%s4997_s27 + $0x38] sm:$0xff]  ;;  %s4777_s17 = scalar_lea.vmem %s4776_s21, 16384 }
  0x3d   : > { %v5016_v5 = vld [vmem:[%s4997_s27 + $0x28] sm:$0xff]  ;;  %v5027_v8 = vld [vmem:[%s4997_s27 + $0x30] sm:$0xff]  ;;  %v5041_v10 = vld [vmem:[%s4997_s27 + $0x40] sm:$0xff]  ;;  %3903 = vmatpush3.msra.mxu0 %v679_v51  ;;  %4476 = vmatpush3.msra.mxu1 %v679_v51 }
  0x3e   : > { %6648 = vst [vmem:[#allocation11_spill] sm:$0xff] %v5027_v8  ;;  %v5038_v9 = vld [vmem:[%s4997_s27 + $0x48] sm:$0xff]  ;;  %v5044_v11 = vld [vmem:[%s5035_s14 + $0x10] sm:$0xff]  ;;  %v5047_v12 = vld [vmem:[%s5035_s14] sm:$0xff]  ;;  %3904 = vmatprep.subr.mxu0 %v678_v61  ;;  %4461 = vmatprep.subr.mxu1 %v678_v61 }
  0x3f   : > { %6649 = vst [vmem:[#allocation12_spill] sm:$0xff] %v5044_v11  ;;  %v5050_v13 = vld [vmem:[%s5035_s14 + $0x18] sm:$0xff]  ;;  %v5055_v14 = vld [vmem:[%s5035_s14 + $0x8] sm:$0xff]  ;;  %v5061_v16 = vld [vmem:[%s5035_s14 + $0x20] sm:$0xff]  ;;  %vm2900_vm0 = vcmp.lt.s32.totalorder %v5044_v11, %v5000_v1  ;;  %vm2898_vm1 = vcmp.lt.s32.totalorder %v5047_v12, %v5003_v2  ;;  %3905 = vmatpush3.msra.mxu0 %v678_v61  ;;  %4477 = vmatpush3.msra.mxu1 %v678_v61 }
  0x40   : > { %484 = vperm.xlu1 %4558, %v5008_v3   ;;  %478 = vperm.xlu0 %4557, %v5011_v4   ;;  %6650 = vst [vmem:[#allocation13_spill] sm:$0xff] %v5050_v13  ;;  %v5058_v15 = vld [vmem:[%s5035_s14 + $0x28] sm:$0xff]  ;;  %v5064_v17 = vld [vmem:[%s4997_s27 + $0x58] sm:$0xff]  ;;  %v5067_v18 = vld [vmem:[%s4997_s27 + $0x50] sm:$0xff]  ;;  %vm2901_vm2 = vcmp.lt.s32.totalorder %v5050_v13, %v5008_v3  ;;  %vm2899_vm3 = vcmp.lt.s32.totalorder %v5055_v14, %v5011_v4  ;;  %v5265_v32 = vsel %vm2900_vm0, 1.0, %v6631_v31 }
  0x41   : > { %v5070_v19 = vld [vmem:[%s5035_s14 + $0x38] sm:$0xff]  ;;  %v5073_v20 = vld [vmem:[%s5035_s14 + $0x30] sm:$0xff]  ;;  %v5076_v21 = vld [vmem:[%s5035_s14 + $0x48] sm:$0xff]  ;;  %vm2903_vm4 = vcmp.lt.s32.totalorder %v5058_v15, %v5016_v5  ;;  %vm2902_vm5 = vcmp.lt.s32.totalorder %v5061_v16, %v5019_v6  ;;  %6656 = vst [vmem:[#allocation19_spill] sm:$0xff] %v5265_v32  ;;  %v5271_v51 = vsel %vm2901_vm2, 1.0, %v6631_v31  ;;  %v5285_v11 = vsel %vm2899_vm3, 1.0, %v6631_v31 }
  0x42   : > { %6651 = vst [vmem:[#allocation14_spill] sm:$0xff] %v5073_v20  ;;  %v5085_v22 = vld [vmem:[%s5035_s14 + $0x40] sm:$0xff]  ;;  %v5088_v23 = vld [vmem:[%s5035_s14 + $0x58] sm:$0xff]  ;;  %v5091_v24 = vld [vmem:[%s5035_s14 + $0x50] sm:$0xff]  ;;  %vm2905_vm6 = vcmp.lt.s32.totalorder %v5070_v19, %v5024_v7  ;;  %vm2904_vm7 = vcmp.lt.s32.totalorder %v5073_v20, %v5027_v8  ;;  %v5311_v20 = vsel %vm2903_vm4, 1.0, %v6631_v31  ;;  %vm6667_vm0 = vcmp.lt.s32.totalorder %v5076_v21, %v5038_v9 }
  0x43   : > { %v5094_v25 = vld [vmem:[%s4997_s27 + $0x68] sm:$0xff]  ;;  %v5097_v26 = vld [vmem:[%s4997_s27 + $0x60] sm:$0xff]  ;;  %v5114_v29 = vld [vmem:[%s4997_s27 + $0x78] sm:$0xff]  ;;  %vm2906_vm9 = vcmp.lt.s32.totalorder %v5085_v22, %v5041_v10  ;;  %vm2909_vm10 = vcmp.lt.s32.totalorder %v5088_v23, %v5064_v17  ;;  %vm2908_vm11 = vcmp.lt.s32.totalorder %v5091_v24, %v5067_v18  ;;  %6657 = vst [vmem:[#allocation20_spill] sm:$0xff] %v5271_v51  ;;  %v5291_v13 = vsel %vm2904_vm7, 1.0, %v6631_v31 }
  0x44   : > { %490 = vperm.xlu1 %4558, %v5016_v5   ;;  %487 = vperm.xlu0 %4557, %v5019_v6   ;;  %v5108_v27 = vld [vmem:[%s5035_s14 + $0x68] sm:$0xff]  ;;  %v5111_v28 = vld [vmem:[%s5035_s14 + $0x60] sm:$0xff]  ;;  %v5117_v30 = vld [vmem:[%s5035_s14 + $0x78] sm:$0xff]  ;;  %6659 = vst [vmem:[#allocation22_spill] sm:$0xff] %v5285_v11  ;;  %v5299_v32 = vsel %vm2905_vm6, 1.0, %v6631_v31  ;;  %v5305_v51 = vsel %vm2902_vm5, 1.0, %v6631_v31 }
  0x45   : > { %v5126_v33 = vld [vmem:[%s4997_s27 + $0x70] sm:$0xff]  ;;  %v5132_v35 = vld [vmem:[%s4997_s27 + $0x88] sm:$0xff]  ;;  %v5138_v37 = vld [vmem:[%s4997_s27 + $0x80] sm:$0xff]  ;;  %6660 = vst [vmem:[#allocation23_spill] sm:$0xff] %v5291_v13  ;;  %v5321_v11 = vsel %vm2908_vm11, 1.0, %v6631_v31  ;;  %vm6671_vm2 = vcmp.lt.s32.totalorder %v5117_v30, %v5114_v29  ;;  %vm6673_vm3 = vcmp.lt.s32.totalorder %v5111_v28, %v5097_v26  ;;  %vm6675_vm4 = vcmp.lt.s32.totalorder %v5108_v27, %v5094_v25 }
  0x46   : > { %v5129_v34 = vld [vmem:[%s5035_s14 + $0x70] sm:$0xff]  ;;  %v5135_v36 = vld [vmem:[%s5035_s14 + $0x88] sm:$0xff]  ;;  %v5141_v38 = vld [vmem:[%s5035_s14 + $0x80] sm:$0xff]  ;;  %6661 = vst [vmem:[#allocation24_spill] sm:$0xff] %v5299_v32  ;;  %v5369_v13 = vsel %vm6675_vm4, 1.0, %v6631_v31  ;;  %vm1779_vm4 = vcmp.gt.s32.totalorder %v5070_v19, %v5024_v7 }
  0x47   : > { %6652 = vst [vmem:[#allocation15_spill] sm:$0xff] %v5129_v34  ;;  %v5150_v39 = vld [vmem:[%s4997_s27 + $0x98] sm:$0xff]  ;;  %v5156_v41 = vld [vmem:[%s4997_s27 + $0x90] sm:$0xff]  ;;  %v5162_v43 = vld [vmem:[%s4997_s27 + $0xa8] sm:$0xff]  ;;  %vm6681_vm7 = vcmp.lt.s32.totalorder %v5141_v38, %v5138_v37 }
  0x48   : > { %496 = vperm.xlu1 %4558, %v5024_v7   ;;  %493 = vperm.xlu0 %4557, %v5027_v8   ;;  %v5153_v40 = vld [vmem:[%s5035_s14 + $0x98] sm:$0xff]  ;;  %v5159_v42 = vld [vmem:[%s5035_s14 + $0x90] sm:$0xff]  ;;  %v5165_v44 = vld [vmem:[%s5035_s14 + $0xa8] sm:$0xff]  ;;  %6662 = vst [vmem:[#allocation25_spill] sm:$0xff] %v5305_v51  ;;  %v5327_v8 = vsel %vm2909_vm10, 1.0, %v6631_v31  ;;  %v5343_v51 = vsel %vm6667_vm0, 1.0, %v6631_v31 }
  0x49   : > { %v5174_v45 = vld [vmem:[%s4997_s27 + $0xa0] sm:$0xff]  ;;  %v5180_v47 = vld [vmem:[%s4997_s27 + $0xb8] sm:$0xff]  ;;  %v5186_v49 = vld [vmem:[%s4997_s27 + $0xb0] sm:$0xff]  ;;  %6663 = vst [vmem:[#allocation26_spill] sm:$0xff] %v5311_v20  ;;  %vm6677_vm5 = vcmp.lt.s32.totalorder %v5159_v42, %v5156_v41  ;;  %vm6679_vm6 = vcmp.lt.s32.totalorder %v5153_v40, %v5150_v39 }
  0x4a   : > { %v5177_v46 = vld [vmem:[%s5035_s14 + $0xa0] sm:$0xff]  ;;  %v5183_v48 = vld [vmem:[%s5035_s14 + $0xb8] sm:$0xff]  ;;  %v5189_v50 = vld [vmem:[%s5035_s14 + $0xb0] sm:$0xff]  ;;  %6664 = vst [vmem:[#allocation27_spill] sm:$0xff] %v5321_v11  ;;  %v5357_v11 = vsel %vm6671_vm2, 1.0, %v6631_v31  ;;  %v5379_v32 = vsel %vm6677_vm5, 1.0, %v6631_v31  ;;  %vm1777_vm2 = vcmp.gt.s32.totalorder %v5058_v15, %v5016_v5 }
  0x4b   : > { %v5200_v52 = vld [vmem:[%s4997_s27 + $0xc8] sm:$0xff]  ;;  %v5206_v54 = vld [vmem:[%s4997_s27 + $0xc0] sm:$0xff]  ;;  %v5218_v56 = vld [vmem:[%s4997_s27 + $0xd8] sm:$0xff]  ;;  %vm2920_vm12 = vcmp.lt.s32.totalorder %v5189_v50, %v5186_v49  ;;  %6665 = vst [vmem:[#allocation28_spill] sm:$0xff] %v5327_v8  ;;  %v5363_v8 = vsel %vm6673_vm3, 1.0, %v6631_v31  ;;  %vm6686_vm10 = vcmp.lt.s32.totalorder %v5183_v48, %v5180_v47  ;;  %vm6688_vm11 = vcmp.lt.s32.totalorder %v5177_v46, %v5174_v45 }
  0x4c   : > { %502 = vperm.xlu1 %4558, %v5038_v9   ;;  %499 = vperm.xlu0 %4557, %v5041_v10   ;;  %6653 = vst [vmem:[#allocation16_spill] sm:$0xff] %v5200_v52  ;;  %v5203_v53 = vld [vmem:[%s5035_s14 + $0xc8] sm:$0xff]  ;;  %v5209_v55 = vld [vmem:[%s5035_s14 + $0xc0] sm:$0xff]  ;;  %v5221_v57 = vld [vmem:[%s5035_s14 + $0xd8] sm:$0xff]  ;;  %vm1776_vm3 = vcmp.gt.s32.totalorder %v5061_v16, %v5019_v6 }
  0x4d   : > { %v5224_v58 = vld [vmem:[%s4997_s27 + $0xd0] sm:$0xff]  ;;  %v5236_v60 = vld [vmem:[%s4997_s27 + $0xe8] sm:$0xff]  ;;  %vm2925_vm13 = vcmp.lt.s32.totalorder %v5221_v57, %v5218_v56  ;;  %v5250_v63 = vld [vmem:[%s4997_s27 + $0xe0] sm:$0xff]  ;;  %6668 = vst [vmem:[#allocation30_spill] sm:$0xff] %v5343_v51  ;;  %vm6694_vm0 = vcmp.lt.s32.totalorder %v5209_v55, %v5206_v54 }
  0x4e   : > { %v5233_v59 = vld [vmem:[%s5035_s14 + $0xd0] sm:$0xff]  ;;  %6654 = vst [vmem:[#allocation17_spill] sm:$0xff] %v5236_v60  ;;  %v5247_v62 = vld [vmem:[%s5035_s14 + $0xe8] sm:$0xff]  ;;  %v5253_v0 = vld [vmem:[%s5035_s14 + $0xe0] sm:$0xff] }
  0x4f   : > { %vm2924_vm14 = vcmp.lt.s32.totalorder %v5233_v59, %v5224_v58  ;;  %6655 = vst [vmem:[#allocation18_spill] sm:$0xff] %v5247_v62  ;;  %vm2927_vm15 = vcmp.lt.s32.totalorder %v5247_v62, %v5236_v60  ;;  %vm2926_vm8 = vcmp.lt.s32.totalorder %v5253_v0, %v5250_v63  ;;  %v677_v52 = vld [vmem:[#allocation2 + $0x58] sm:$0xff]  ;;  %v5279_v62 = vsel %vm2898_vm1, 1.0, %v6631_v31  ;;  %v676_v61 = vld [vmem:[#allocation2 + $0x50] sm:$0xff]  ;;  %6672 = vst [vmem:[#allocation32_spill] sm:$0xff] %v5357_v11 }
  0x50   : > { %508 = vperm.xlu1 %4558, %v5064_v17   ;;  %505 = vperm.xlu0 %4557, %v5067_v18   ;;  %6658 = vst [vmem:[#allocation21_spill] sm:$0xff] %v5279_v62  ;;  %v5337_v60 = vsel %vm2906_vm9, 1.0, %v6631_v31  ;;  %vm6669_vm1 = vcmp.lt.s32.totalorder %v5129_v34, %v5126_v33  ;;  %6674 = vst [vmem:[#allocation33_spill] sm:$0xff] %v5363_v8  ;;  %v675_v51 = vld [vmem:[#allocation2 + $0x48] sm:$0xff]  ;;  %v5385_v34 = vsel %vm6679_vm6, 1.0, %v6631_v31  ;;  %v5405_v8 = vsel %vm2920_vm12, 1.0, %v6631_v31 }
  0x51   : > { %3906 = vmatprep.subr.mxu0 %v677_v52  ;;  %4462 = vmatprep.subr.mxu1 %v677_v52  ;;  %6666 = vst [vmem:[#allocation29_spill] sm:$0xff] %v5337_v60  ;;  %v5349_v20 = vsel %vm6669_vm1, 1.0, %v6631_v31  ;;  %6676 = vst [vmem:[#allocation34_spill] sm:$0xff] %v5369_v13  ;;  %v5393_v60 = vsel %vm6681_vm7, 1.0, %v6631_v31  ;;  %vm6683_vm9 = vcmp.lt.s32.totalorder %v5135_v36, %v5132_v35  ;;  %v5421_v13 = vsel %vm6688_vm11, 1.0, %v6631_v31 }
  0x52   : > { %6670 = vst [vmem:[#allocation31_spill] sm:$0xff] %v5349_v20  ;;  %3907 = vmatpush3.msra.mxu0 %v677_v52  ;;  %4478 = vmatpush3.msra.mxu1 %v677_v52  ;;  %6678 = vst [vmem:[#allocation35_spill] sm:$0xff] %v5379_v32  ;;  %v5399_v62 = vsel %vm6683_vm9, 1.0, %v6631_v31  ;;  %v674_v52 = vld [vmem:[#allocation2 + $0x40] sm:$0xff]  ;;  %vm6690_vm12 = vcmp.lt.s32.totalorder %v5165_v44, %v5162_v43  ;;  %v5443_v20 = vsel %vm2925_vm13, 1.0, %v6631_v31  ;;  %v5465_v32 = vsel %vm2926_vm8, 1.0, %v6631_v31 }
  0x53   : > { %3908 = vmatprep.subr.mxu0 %v676_v61  ;;  %6680 = vst [vmem:[#allocation36_spill] sm:$0xff] %v5385_v34  ;;  %4463 = vmatprep.subr.mxu1 %v676_v61  ;;  %6682 = vst [vmem:[#allocation37_spill] sm:$0xff] %v5393_v60  ;;  %v5415_v34 = vsel %vm6686_vm10, 1.0, %v6631_v31  ;;  %v5451_v60 = vsel %vm6694_vm0, 1.0, %v6631_v31  ;;  %v5471_v11 = vsel %vm2927_vm15, 1.0, %v6631_v31  ;;  %vm1772_vm13 = vcmp.gt.s32.totalorder %v5047_v12, %v5003_v2  ;;  %v5497_v2 = vld [vmem:[%s4997_s27 + $0xf8] sm:$0xff] }
  0x54   : > { %514 = vperm.xlu1 %4558, %v5094_v25   ;;  %511 = vperm.xlu0 %4557, %v5097_v26   ;;  %6684 = vst [vmem:[#allocation38_spill] sm:$0xff] %v5399_v62  ;;  %6685 = vst [vmem:[#allocation39_spill] sm:$0xff] %v5405_v8  ;;  %v5437_v62 = vsel %vm2924_vm14, 1.0, %v6631_v31  ;;  %v673_v8 = vld [vmem:[#allocation2 + $0x38] sm:$0xff]  ;;  %vm1773_vm1 = vcmp.gt.s32.totalorder %v5055_v14, %v5011_v4  ;;  %vm1781_vm6 = vcmp.gt.s32.totalorder %v5076_v21, %v5038_v9 }
  0x55   : > { %3909 = vmatpush3.msra.mxu0 %v676_v61  ;;  %4479 = vmatpush3.msra.mxu1 %v676_v61  ;;  %6687 = vst [vmem:[#allocation40_spill] sm:$0xff] %v5415_v34  ;;  %6689 = vst [vmem:[#allocation41_spill] sm:$0xff] %v5421_v13  ;;  %v5427_v61 = vsel %vm6690_vm12, 1.0, %v6631_v31  ;;  %v6696_v13 = vld [vmem:[#allocation16_spill] sm:$0xff]  ;;  %v672_v34 = vld [vmem:[#allocation2 + $0x30] sm:$0xff]  ;;  %vm1780_vm7 = vcmp.gt.s32.totalorder %v5085_v22, %v5041_v10  ;;  %vm1783_vm9 = vcmp.gt.s32.totalorder %v5088_v23, %v5064_v17 }
  0x56   : > { %6691 = vst [vmem:[#allocation42_spill] sm:$0xff] %v5427_v61  ;;  %3910 = vmatprep.subr.mxu0 %v675_v51  ;;  %6692 = vst [vmem:[#allocation43_spill] sm:$0xff] %v5437_v62  ;;  %4464 = vmatprep.subr.mxu1 %v675_v51  ;;  %vm6697_vm14 = vcmp.lt.s32.totalorder %v5203_v53, %v6696_v13  ;;  %v6698_v62 = vld [vmem:[#allocation18_spill] sm:$0xff]  ;;  %vm1782_vm10 = vcmp.gt.s32.totalorder %v5091_v24, %v5067_v18  ;;  %v6705_v17 = vld [vmem:[#allocation15_spill] sm:$0xff] }
  0x57   : > { %6693 = vst [vmem:[#allocation44_spill] sm:$0xff] %v5443_v20  ;;  %3911 = vmatpush3.msra.mxu0 %v675_v51  ;;  %6695 = vst [vmem:[#allocation45_spill] sm:$0xff] %v5451_v60  ;;  %v5457_v61 = vsel %vm6697_vm14, 1.0, %v6631_v31  ;;  %4480 = vmatpush3.msra.mxu1 %v675_v51  ;;  %v6699_v20 = vld [vmem:[#allocation17_spill] sm:$0xff]  ;;  %v671_v31 = vld [vmem:[#allocation2 + $0x28] sm:$0xff]  ;;  %vm1785_vm11 = vcmp.gt.s32.totalorder %v5108_v27, %v5094_v25  ;;  %vm1784_vm12 = vcmp.gt.s32.totalorder %v5111_v28, %v5097_v26 }
  0x58   : > { %520 = vperm.xlu1 %4558, %v5114_v29   ;;  %517 = vperm.xlu0 %4557, %v5126_v33   ;;  %v670_v60 = vld [vmem:[#allocation2 + $0x20] sm:$0xff]  ;;  %vm1787_vm0 = vcmp.gt.s32.totalorder %v5117_v30, %v5114_v29  ;;  %vm1786_vm14 = vcmp.gt.s32.totalorder %v6705_v17, %v5126_v33 }
  0x59   : > { %3912 = vmatprep.subr.mxu0 %v674_v52  ;;  %4465 = vmatprep.subr.mxu1 %v674_v52  ;;  %v666_v51 = vld [vmem:[#allocation2] sm:$0xff] }
  0x5a   : > { %3913 = vmatpush3.msra.mxu0 %v674_v52  ;;  %4481 = vmatpush3.msra.mxu1 %v674_v52  ;;  %v668_v52 = vld [vmem:[#allocation2 + $0x10] sm:$0xff] }
  0x5b   : > { %3914 = vmatprep.subr.mxu0 %v673_v8  ;;  %4466 = vmatprep.subr.mxu1 %v673_v8 }
  0x5c   : > { %526 = vperm.xlu1 %4558, %v5132_v35   ;;  %523 = vperm.xlu0 %4557, %v5138_v37  }
  0x5d   : > { %3915 = vmatpush3.msra.mxu0 %v673_v8  ;;  %4482 = vmatpush3.msra.mxu1 %v673_v8  ;;  %v669_v8 = vld [vmem:[#allocation2 + $0x18] sm:$0xff] }
  0x5e   : > { %3916 = vmatprep.subr.mxu0 %v672_v34  ;;  %4467 = vmatprep.subr.mxu1 %v672_v34 }
  0x5f   : > { %3917 = vmatpush3.msra.mxu0 %v672_v34  ;;  %4483 = vmatpush3.msra.mxu1 %v672_v34  ;;  %v6700_v34 = vld [vmem:[#allocation12_spill] sm:$0xff] }
  0x60   : > { %532 = vperm.xlu1 %4558, %v5150_v39   ;;  %529 = vperm.xlu0 %4557, %v5156_v41   ;;  %vm1774_vm8 = vcmp.gt.s32.totalorder %v6700_v34, %v5000_v1  ;;  %v6702_v1 = vmov 0.0  }
  0x61   : > { %3918 = vmatprep.subr.mxu0 %v671_v31  ;;  %4468 = vmatprep.subr.mxu1 %v671_v31  ;;  %v3456_v34 = vsel %vm1774_vm8, 1.0, %v6702_v1  ;;  %v3454_v12 = vsel %vm1772_vm13, 1.0, %v6702_v1  ;;  %v3455_v14 = vsel %vm1773_vm1, 1.0, %v6702_v1  ;;  %v3461_v7 = vsel %vm1779_vm4, 1.0, %v6702_v1 }
  0x62   : > { %3919 = vmatpush3.msra.mxu0 %v671_v31  ;;  %4484 = vmatpush3.msra.mxu1 %v671_v31  ;;  %v6701_v31 = vld [vmem:[#allocation13_spill] sm:$0xff]  ;;  %v4559_v6 = vpack.i.bf16 %v3455_v14, %v3454_v12  ;;  %v3458_v19 = vsel %vm1776_vm3, 1.0, %v6702_v1  ;;  %v3464_v5 = vsel %vm1782_vm10, 1.0, %v6702_v1  ;;  %v3465_v15 = vsel %vm1783_vm9, 1.0, %v6702_v1 }
  0x63   : > { %3920 = vmatprep.subr.mxu0 %v670_v60  ;;  %4469 = vmatprep.subr.mxu1 %v670_v60  ;;  %vm1775_vm15 = vcmp.gt.s32.totalorder %v6701_v31, %v5008_v3  ;;  %v5500_v3 = vld [vmem:[%s4997_s27 + $0xf0] sm:$0xff]  ;;  %v6704_v31 = vld [vmem:[#allocation14_spill] sm:$0xff]  ;;  %v3462_v12 = vsel %vm1780_vm7, 1.0, %v6702_v1  ;;  %v3463_v10 = vsel %vm1781_vm6, 1.0, %v6702_v1  ;;  %v4584_v18 = vpack.i.bf16 %v3465_v15, %v3464_v5  ;;  %v6725_v5 = vld [vmem:[#allocation31_spill] sm:$0xff] }
  0x64   : > { %538 = vperm.xlu1 %4558, %v5162_v43   ;;  %535 = vperm.xlu0 %4557, %v5174_v45   ;;  %v3457_v4 = vsel %vm1775_vm15, 1.0, %v6702_v1  ;;  %v4579_v22 = vpack.i.bf16 %v3463_v10, %v3462_v12  ;;  %v3468_v23 = vsel %vm1786_vm14, 1.0, %v6702_v1  ;;  %v3469_v9 = vsel %vm1787_vm0, 1.0, %v6702_v1  ;;  %v6727_v12 = vld [vmem:[#allocation34_spill] sm:$0xff]  ;;  %v6728_v10 = vld [vmem:[#allocation33_spill] sm:$0xff] }
  0x65   : > { %3921 = vmatpush3.msra.mxu0 %v670_v60  ;;  %4485 = vmatpush3.msra.mxu1 %v670_v60  ;;  %v667_v60 = vld [vmem:[#allocation2 + $0x8] sm:$0xff]  ;;  %v3466_v21 = vsel %vm1784_vm12, 1.0, %v6702_v1  ;;  %v3467_v24 = vsel %vm1785_vm11, 1.0, %v6702_v1  ;;  %vm1789_vm8 = vcmp.gt.s32.totalorder %v5135_v36, %v5132_v35  ;;  %vm1788_vm13 = vcmp.gt.s32.totalorder %v5141_v38, %v5138_v37 }
  0x66   : > { %3922 = vmatprep.subr.mxu0 %v669_v8  ;;  %4470 = vmatprep.subr.mxu1 %v669_v8  ;;  %vm1791_vm15 = vcmp.gt.s32.totalorder %v5153_v40, %v5150_v39  ;;  %vm1790_vm1 = vcmp.gt.s32.totalorder %v5159_v42, %v5156_v41  ;;  %v4594_v25 = vpack.i.bf16 %v3469_v9, %v3468_v23  ;;  %v3470_v29 = vsel %vm1788_vm13, 1.0, %v6702_v1  ;;  %v439_v40 = vld [vmem:[%s5035_s14 + $0xf8] sm:$0xff]  ;;  %v438_v41 = vld [vmem:[%s5035_s14 + $0xf0] sm:$0xff] }
  0x67   : > { %3923 = vmatpush3.msra.mxu0 %v669_v8  ;;  %4486 = vmatpush3.msra.mxu1 %v669_v8  ;;  %v6703_v8 = vld [vmem:[#allocation11_spill] sm:$0xff]  ;;  %v4589_v26 = vpack.i.bf16 %v3467_v24, %v3466_v21  ;;  %v3472_v27 = vsel %vm1790_vm1, 1.0, %v6702_v1  ;;  %v3473_v28 = vsel %vm1791_vm15, 1.0, %v6702_v1  ;;  %v3471_v30 = vsel %vm1789_vm8, 1.0, %v6702_v1  ;;  %v6733_v9 = vld [vmem:[#allocation38_spill] sm:$0xff]  ;;  %v6734_v21 = vld [vmem:[#allocation37_spill] sm:$0xff] }
  0x68   : > { %544 = vperm.xlu1 %4558, %v5180_v47   ;;  %541 = vperm.xlu0 %4557, %v5186_v49   ;;  %vm1778_vm5 = vcmp.gt.s32.totalorder %v6704_v31, %v6703_v8  ;;  %vm1792_vm3 = vcmp.gt.s32.totalorder %v5177_v46, %v5174_v45  ;;  %vm1795_vm4 = vcmp.gt.s32.totalorder %v5183_v48, %v5180_v47  ;;  %v6715_v8 = vld [vmem:[#allocation26_spill] sm:$0xff]  ;;  %v6716_v31 = vld [vmem:[#allocation25_spill] sm:$0xff] }
  0x69   : > { %3924 = vmatprep.subr.mxu0 %v668_v52  ;;  %4471 = vmatprep.subr.mxu1 %v668_v52  ;;  %v3460_v16 = vsel %vm1778_vm5, 1.0, %v6702_v1  ;;  %vm1794_vm5 = vcmp.gt.s32.totalorder %v5189_v50, %v5186_v49  ;;  %v4604_v33 = vpack.i.bf16 %v3473_v28, %v3472_v27  ;;  %v4599_v35 = vpack.i.bf16 %v3471_v30, %v3470_v29  ;;  %v6739_v28 = vld [vmem:[#allocation42_spill] sm:$0xff]  ;;  %v6740_v29 = vld [vmem:[#allocation41_spill] sm:$0xff] }
  0x6a   : > { %3925 = vmatpush3.msra.mxu0 %v668_v52  ;;  %4487 = vmatpush3.msra.mxu1 %v668_v52  ;;  %v4564_v52 = vpack.i.bf16 %v3457_v4, %v3456_v34  ;;  %v4574_v34 = vpack.i.bf16 %v3461_v7, %v3460_v16  ;;  %v3476_v36 = vsel %vm1794_vm5, 1.0, %v6702_v1  ;;  %v3477_v37 = vsel %vm1795_vm4, 1.0, %v6702_v1  ;;  %v6719_v16 = vld [vmem:[#allocation27_spill] sm:$0xff] }
  0x6b   : > { %3926 = vmatprep.subr.mxu0 %v667_v60  ;;  %4472 = vmatprep.subr.mxu1 %v667_v60  ;;  %v3474_v38 = vsel %vm1792_vm3, 1.0, %v6702_v1  ;;  %vm1797_vm6 = vcmp.gt.s32.totalorder %v5203_v53, %v6696_v13  ;;  %vm1796_vm7 = vcmp.gt.s32.totalorder %v5209_v55, %v5206_v54  ;;  %vm1799_vm9 = vcmp.gt.s32.totalorder %v5221_v57, %v5218_v56  ;;  %v6707_v57 = vld [vmem:[#allocation19_spill] sm:$0xff] }
  0x6c   : > { %550 = vperm.xlu1 %4558, %v6696_v13   ;;  %547 = vperm.xlu0 %4557, %v5206_v54   ;;  %vm1798_vm10 = vcmp.gt.s32.totalorder %v5233_v59, %v5224_v58  ;;  %v4614_v42 = vpack.i.bf16 %v3477_v37, %v3476_v36  ;;  %v3481_v45 = vsel %vm1799_vm9, 1.0, %v6702_v1  ;;  %v3478_v13 = vsel %vm1796_vm7, 1.0, %v6702_v1  ;;  %v6709_v59 = vld [vmem:[#allocation22_spill] sm:$0xff]  ;;  %v6742_v37 = vld [vmem:[#allocation44_spill] sm:$0xff] }
  0x6d   : > { %3927 = vmatpush3.msra.mxu0 %v667_v60  ;;  %4488 = vmatpush3.msra.mxu1 %v667_v60  ;;  %v3459_v60 = vsel %vm1777_vm2, 1.0, %v6702_v1  ;;  %vm1793_vm2 = vcmp.gt.s32.totalorder %v5165_v44, %v5162_v43  ;;  %v3480_v44 = vsel %vm1798_vm10, 1.0, %v6702_v1  ;;  %v3479_v46 = vsel %vm1797_vm6, 1.0, %v6702_v1 }
  0x6e   : > { %3928 = vmatprep.subr.mxu0 %v666_v51  ;;  %4473 = vmatprep.subr.mxu1 %v666_v51  ;;  %v4569_v4 = vpack.i.bf16 %v3459_v60, %v3458_v19  ;;  %v3475_v39 = vsel %vm1793_vm2, 1.0, %v6702_v1  ;;  %vm1801_vm11 = vcmp.gt.s32.totalorder %v6698_v62, %v6699_v20  ;;  %vm1800_vm12 = vcmp.gt.s32.totalorder %v5253_v0, %v5250_v63  ;;  %v6710_v62 = vld [vmem:[#allocation21_spill] sm:$0xff]  ;;  %v6712_v0 = vld [vmem:[#allocation24_spill] sm:$0xff]  ;;  %v6721_v19 = vld [vmem:[#allocation30_spill] sm:$0xff] }
  0x6f   : > { %3929 = vmatpush3.msra.mxu0 %v666_v51  ;;  %4489 = vmatpush3.msra.mxu1 %v666_v51  ;;  %v4609_v43 = vpack.i.bf16 %v3475_v39, %v3474_v38  ;;  %vm1803_vm0 = vcmp.gt.s32.totalorder %v439_v40, %v5497_v2  ;;  %vm1802_vm14 = vcmp.gt.s32.totalorder %v438_v41, %v5500_v3  ;;  %v3482_v53 = vsel %vm1800_vm12, 1.0, %v6702_v1  ;;  %v6713_v51 = vld [vmem:[#allocation23_spill] sm:$0xff]  ;;  %v6722_v60 = vld [vmem:[#allocation29_spill] sm:$0xff] }
  0x70   : > { %556 = vperm.xlu1 %4558, %v5218_v56   ;;  %553 = vperm.xlu0 %4557, %v5224_v58   ;;  %v4624_v47 = vpack.i.bf16 %v3481_v45, %v3480_v44  ;;  %v4619_v48 = vpack.i.bf16 %v3479_v46, %v3478_v13  ;;  %v3484_v49 = vsel %vm1802_vm14, 1.0, %v6702_v1  ;;  %v3485_v50 = vsel %vm1803_vm0, 1.0, %v6702_v1  ;;  %v6706_v56 = vld [vmem:[#allocation20_spill] sm:$0xff]  ;;  %v6743_v38 = vld [vmem:[#allocation43_spill] sm:$0xff] }
  0x71   : > { %v3483_v54 = vsel %vm1801_vm11, 1.0, %v6702_v1  ;;  %v6708_v58 = vpack.i.bf16 %v6706_v56, %v6707_v57  ;;  %v6714_v14 = vpack.i.bf16 %v6712_v0, %v6713_v51  ;;  %v6729_v17 = vpack.i.bf16 %v6727_v12, %v6728_v10  ;;  %v945_v0 = vld [vmem:[%s6587_s4 + $0x30] sm:$0xff]  ;;  %v944_v51 = vld [vmem:[%s6587_s4 + $0x28] sm:$0xff]  ;;  %v967_v10 = vld [vmem:[%s6588_s5 + $0x60] sm:$0xff] }
  0x72   : > { %v4629_v55 = vpack.i.bf16 %v3483_v54, %v3482_v53  ;;  %v6735_v24 = vpack.i.bf16 %v6733_v9, %v6734_v21  ;;  %vm2929_vm8 = vcmp.lt.s32.totalorder %v439_v40, %v5497_v2  ;;  %vm2928_vm13 = vcmp.lt.s32.totalorder %v438_v41, %v5500_v3  ;;  %v968_v12 = vld [vmem:[%s6588_s5 + $0x68] sm:$0xff] }
  0x73   : > { %v6741_v30 = vpack.i.bf16 %v6739_v28, %v6740_v29  ;;  %v3553_v36 = vsel %vm2929_vm8, 1.0, %v6702_v1  ;;  %v6744_v39 = vpack.i.bf16 %v6742_v37, %v6743_v38  ;;  %v4847_v45 = vmov 1.0   ;;  %v962_v28 = vld [vmem:[%s6588_s5 + $0x38] sm:$0xff]  ;;  %v961_v29 = vld [vmem:[%s6588_s5 + $0x30] sm:$0xff] }
  0x74   : > { %562 = vperm.xlu1 %4558, %v6699_v20   ;;  %559 = vperm.xlu0 %4557, %v5250_v63   ;;  %v4634_v20 = vpack.i.bf16 %v3485_v50, %v3484_v49  ;;  %v6711_v63 = vpack.i.bf16 %v6709_v59, %v6710_v62  ;;  %v951_v49 = vld [vmem:[%s6587_s4 + $0x60] sm:$0xff]  ;;  %v950_v50 = vld [vmem:[%s6587_s4 + $0x58] sm:$0xff] }
  0x75   : > { %v946_v59 = vld [vmem:[%s6587_s4 + $0x38] sm:$0xff] }
  0x78   : > { %568 = vperm.xlu1 %4558, %v5497_v2   ;;  %565 = vperm.xlu0 %4557, %v5500_v3   ;;  %v6745_v2 = vld [vmem:[#allocation45_spill] sm:$0xff] }
  0x79   : > { %v6746_v3 = vpack.i.bf16 %v5457_v61, %v6745_v2  ;;  %v6747_v61 = vpack.i.bf16 %v5471_v11, %v5465_v32  ;;  %v952_v11 = vld [vmem:[%s6587_s4 + $0x68] sm:$0xff]  ;;  %v957_v2 = vld [vmem:[%s6588_s5 + $0x10] sm:$0xff] }
  0x7c   : > { %4565 = vperm.xlu1 %4558, %v4564_v52   ;;  %4560 = vperm.xlu0 %4557, %v4559_v6   ;;  %v6717_v52 = vpack.i.bf16 %v6715_v8, %v6716_v31  ;;  %v6718_v6 = vld [vmem:[#allocation28_spill] sm:$0xff]  ;;  %v943_v31 = vld [vmem:[%s6587_s4 + $0x20] sm:$0xff] }
  0x7d   : > { %v6720_v7 = vpack.i.bf16 %v6718_v6, %v6719_v16 }
  0x80   : > { %4575 = vperm.xlu1 %4558, %v4574_v34   ;;  %4570 = vperm.xlu0 %4557, %v4569_v4   ;;  %v6723_v34 = vpack.i.bf16 %v6721_v19, %v6722_v60  ;;  %v6724_v4 = vld [vmem:[#allocation32_spill] sm:$0xff] }
  0x81   : > { %v6726_v15 = vpack.i.bf16 %v6724_v4, %v6725_v5  ;;  %v969_v4 = vld [vmem:[%s6588_s5 + $0x70] sm:$0xff] }
  0x84   : > { %4585 = vperm.xlu1 %4558, %v4584_v18   ;;  %4580 = vperm.xlu0 %4557, %v4579_v22   ;;  %v6730_v18 = vld [vmem:[#allocation36_spill] sm:$0xff]  ;;  %v6731_v22 = vld [vmem:[#allocation35_spill] sm:$0xff] }
  0x85   : > { %v6732_v23 = vpack.i.bf16 %v6730_v18, %v6731_v22  ;;  %v966_v22 = vld [vmem:[%s6588_s5 + $0x58] sm:$0xff] }
  0x88   : > { %4595 = vperm.xlu1 %4558, %v4594_v25   ;;  %4590 = vperm.xlu0 %4557, %v4589_v26   ;;  %v6736_v25 = vld [vmem:[#allocation40_spill] sm:$0xff]  ;;  %v6737_v26 = vld [vmem:[#allocation39_spill] sm:$0xff] }
  0x89   : > { %v6738_v27 = vpack.i.bf16 %v6736_v25, %v6737_v26  ;;  %v963_v25 = vld [vmem:[%s6588_s5 + $0x40] sm:$0xff] }
  0x8c   : > { %4605 = vperm.xlu1 %4558, %v4604_v33   ;;  %4600 = vperm.xlu0 %4557, %v4599_v35   ;;  %v472_v33 = vlaneseq  ;;  %v3552_v35 = vsel %vm2928_vm13, 1.0, %v6702_v1  ;;  %v954_v1 = vld [vmem:[%s6587_s4 + $0x78] sm:$0xff] }
  0x8d   : > { %v4714_v41 = vpack.i.bf16 %v3553_v36, %v3552_v35  ;;  %4058 = vmatprep.subr.mxu0 %v954_v1  ;;  %v960_v35 = vld [vmem:[%s6588_s5 + $0x28] sm:$0xff]  ;;  %v959_v36 = vld [vmem:[%s6588_s5 + $0x20] sm:$0xff] }
  0x8e   : > { %v5641_v40 = vand.u32 127, %v472_v33 }
  0x90   : > { %4615 = vperm.xlu1 %4558, %v4614_v42   ;;  %4610 = vperm.xlu0 %4557, %v4609_v43   ;;  %v5646_v42 = vld [vmem:[%s6588_s5 + $0x78] sm:$0xff] }
  0x91   : > { %3978 = vmatprep.subr.mxu1 %v5646_v42 }
  0x94   : > { %4625 = vperm.xlu1 %4558, %v4624_v47   ;;  %4620 = vperm.xlu0 %4557, %v4619_v48   ;;  %v953_v47 = vld [vmem:[%s6587_s4 + $0x70] sm:$0xff] }
  0x98   : > { %4635 = vperm.xlu1 %4558, %v4634_v20   ;;  %4630 = vperm.xlu0 %4557, %v4629_v55   ;;  %v949_v20 = vld [vmem:[%s6587_s4 + $0x50] sm:$0xff]  ;;  %v948_v55 = vld [vmem:[%s6587_s4 + $0x48] sm:$0xff] }
  0x9c   : > { %4645 = vperm.xlu1 %4558, %v6708_v58   ;;  %4640 = vperm.xlu0 %4557, %v6711_v63   ;;  %v947_v58 = vld [vmem:[%s6587_s4 + $0x40] sm:$0xff] }
  0xa0   : > { %4655 = vperm.xlu1 %4558, %v6714_v14   ;;  %4650 = vperm.xlu0 %4557, %v6717_v52   ;;  %v942_v52 = vld [vmem:[%s6587_s4 + $0x18] sm:$0xff] }
  0xa4   : > { %4665 = vperm.xlu1 %4558, %v6720_v7   ;;  %4660 = vperm.xlu0 %4557, %v6723_v34   ;;  %v941_v7 = vld [vmem:[%s6587_s4 + $0x10] sm:$0xff]  ;;  %v940_v34 = vld [vmem:[%s6587_s4 + $0x8] sm:$0xff] }
  0xa8   : > { %4675 = vperm.xlu1 %4558, %v6726_v15   ;;  %4670 = vperm.xlu0 %4557, %v6729_v17  }
  0xac   : > { %4685 = vperm.xlu1 %4558, %v6732_v23   ;;  %4680 = vperm.xlu0 %4557, %v6735_v24   ;;  %v965_v23 = vld [vmem:[%s6588_s5 + $0x50] sm:$0xff]  ;;  %v964_v24 = vld [vmem:[%s6588_s5 + $0x48] sm:$0xff] }
  0xb0   : > { %4695 = vperm.xlu1 %4558, %v6738_v27   ;;  %4690 = vperm.xlu0 %4557, %v6741_v30  }
  0xb4   : > { %4705 = vperm.xlu1 %4558, %v6744_v39   ;;  %4700 = vperm.xlu0 %4557, %v6746_v3   ;;  %v958_v39 = vld [vmem:[%s6588_s5 + $0x18] sm:$0xff] }
  0xb7   : > { %v482_v43 = vpop.permute.xlu1 %481  ;;  %v476_v44 = vpop.permute.xlu0 %475 }
  0xb8   : > { %4715 = vperm.xlu1 %4558, %v4714_v41   ;;  %4710 = vperm.xlu0 %4557, %v6747_v61   ;;  %vm570_vm15 = vcmp.eq.s32.totalorder %v5641_v40, %v476_v44  ;;  %vm572_vm1 = vcmp.eq.s32.totalorder %v5641_v40, %v482_v43  ;;  %v939_v43 = vld [vmem:[%s6587_s4] sm:$0xff]  ;;  %v5821_v44 = vld [vmem:[%s5811_s29 + $0x8] sm:$0xff]  ;;  %v5825_v61 = vld [vmem:[%s5811_s29 + $0x10] sm:$0xff] }
  0xb9   : > { %3930 = vmatprep.mubr.msk.f32.mxu0 %vm570_vm15, %v4847_v45 }
  0xbb   : > { %v485_v13 = vpop.permute.xlu1 %484  ;;  %v479_v46 = vpop.permute.xlu0 %478 }
  0xbc   : > { %vm571_vm2 = vcmp.eq.s32.totalorder %v5641_v40, %v479_v46  ;;  %vm573_vm3 = vcmp.eq.s32.totalorder %v5641_v40, %v485_v13  ;;  %v5833_v13 = vld [vmem:[%s5811_s29 + $0x20] sm:$0xff]  ;;  %v5837_v46 = vld [vmem:[%s5811_s29 + $0x28] sm:$0xff] }
  0xbd   : > { %3931 = vmatmul.mubr.msk.f32.vlgmr.msra.gmra.mxu0 %vm571_vm2, %v4847_v45 }
  0xbe   : > { %3933 = vmatprep.mubr.msk.f32.mxu0 %vm572_vm1, %v4847_v45  ;;  %4059 = vmatpush3.msra.mxu0 %v954_v1  ;;  %v955_v1 = vld [vmem:[%s6588_s5] sm:$0xff] }
  0xbf   : > { %v491_v32 = vpop.permute.xlu1 %490  ;;  %v488_v48 = vpop.permute.xlu0 %487  ;;  %4060 = vmatprep.subr.mxu0 %v953_v47 }
  0xc0   : > { %vm574_vm4 = vcmp.eq.s32.totalorder %v5641_v40, %v488_v48  ;;  %4061 = vmatpush3.msra.mxu0 %v953_v47  ;;  %vm575_vm5 = vcmp.eq.s32.totalorder %v5641_v40, %v491_v32  ;;  %v5841_v47 = vld [vmem:[%s5811_s29 + $0x30] sm:$0xff]  ;;  %v5849_v32 = vld [vmem:[%s5811_s29 + $0x40] sm:$0xff]  ;;  %v5853_v48 = vld [vmem:[%s5811_s29 + $0x48] sm:$0xff] }
  0xc1   : > { %3934 = vmatmul.mubr.msk.f32.gmra.mxu0 %vm573_vm3, %v4847_v45  ;;  %4062 = vmatprep.subr.mxu0 %v952_v11 }
  0xc2   : > { %3936 = vmatprep.mubr.msk.f32.mxu0 %vm574_vm4, %v4847_v45  ;;  %4063 = vmatpush3.msra.mxu0 %v952_v11  ;;  %v5845_v11 = vld [vmem:[%s5811_s29 + $0x38] sm:$0xff] }
  0xc3   : > { %v497_v53 = vpop.permute.xlu1 %496  ;;  %v494_v54 = vpop.permute.xlu0 %493  ;;  %4064 = vmatprep.subr.mxu0 %v951_v49 }
  0xc4   : > { %vm576_vm6 = vcmp.eq.s32.totalorder %v5641_v40, %v494_v54  ;;  %4065 = vmatpush3.msra.mxu0 %v951_v49  ;;  %vm577_vm7 = vcmp.eq.s32.totalorder %v5641_v40, %v497_v53  ;;  %v5857_v49 = vld [vmem:[%s5811_s29 + $0x50] sm:$0xff]  ;;  %v5865_v53 = vld [vmem:[%s5811_s29 + $0x60] sm:$0xff]  ;;  %v5869_v54 = vld [vmem:[%s5811_s29 + $0x68] sm:$0xff] }
  0xc5   : > { %3937 = vmatmul.mubr.msk.f32.gmra.mxu0 %vm575_vm5, %v4847_v45  ;;  %4066 = vmatprep.subr.mxu0 %v950_v50 }
  0xc6   : > { %3939 = vmatprep.mubr.msk.f32.mxu0 %vm576_vm6, %v4847_v45  ;;  %4067 = vmatpush3.msra.mxu0 %v950_v50  ;;  %v5861_v50 = vld [vmem:[%s5811_s29 + $0x58] sm:$0xff] }
  0xc7   : > { %v503_v56 = vpop.permute.xlu1 %502  ;;  %v500_v57 = vpop.permute.xlu0 %499  ;;  %4068 = vmatprep.subr.mxu0 %v949_v20 }
  0xc8   : > { %vm578_vm9 = vcmp.eq.s32.totalorder %v5641_v40, %v500_v57  ;;  %4069 = vmatpush3.msra.mxu0 %v949_v20  ;;  %vm579_vm10 = vcmp.eq.s32.totalorder %v5641_v40, %v503_v56  ;;  %v5873_v20 = vld [vmem:[%s5811_s29 + $0x70] sm:$0xff]  ;;  %v5881_v56 = vld [vmem:[%s5811_s29 + $0x80] sm:$0xff]  ;;  %v5885_v57 = vld [vmem:[%s5811_s29 + $0x88] sm:$0xff] }
  0xc9   : > { %3940 = vmatmul.mubr.msk.f32.gmra.mxu0 %vm577_vm7, %v4847_v45  ;;  %4070 = vmatprep.subr.mxu0 %v948_v55 }
  0xca   : > { %3942 = vmatprep.mubr.msk.f32.mxu0 %vm578_vm9, %v4847_v45  ;;  %4071 = vmatpush3.msra.mxu0 %v948_v55  ;;  %v5877_v55 = vld [vmem:[%s5811_s29 + $0x78] sm:$0xff] }
  0xcb   : > { %v509_v62 = vpop.permute.xlu1 %508  ;;  %v506_v63 = vpop.permute.xlu0 %505  ;;  %4072 = vmatprep.subr.mxu0 %v947_v58 }
  0xcc   : > { %vm580_vm11 = vcmp.eq.s32.totalorder %v5641_v40, %v506_v63  ;;  %4073 = vmatpush3.msra.mxu0 %v947_v58  ;;  %vm581_vm12 = vcmp.eq.s32.totalorder %v5641_v40, %v509_v62  ;;  %v5889_v58 = vld [vmem:[%s5811_s29 + $0x90] sm:$0xff]  ;;  %v5897_v62 = vld [vmem:[%s5811_s29 + $0xa0] sm:$0xff]  ;;  %v5901_v63 = vld [vmem:[%s5811_s29 + $0xa8] sm:$0xff] }
  0xcd   : > { %3943 = vmatmul.mubr.msk.f32.gmra.mxu0 %vm579_vm10, %v4847_v45  ;;  %4074 = vmatprep.subr.mxu0 %v946_v59 }
  0xce   : > { %3945 = vmatprep.mubr.msk.f32.mxu0 %vm580_vm11, %v4847_v45  ;;  %4075 = vmatpush3.msra.mxu0 %v946_v59  ;;  %v5893_v59 = vld [vmem:[%s5811_s29 + $0x98] sm:$0xff] }
  0xcf   : > { %v515_v14 = vpop.permute.xlu1 %514  ;;  %v512_v8 = vpop.permute.xlu0 %511  ;;  %4076 = vmatprep.subr.mxu0 %v945_v0 }
  0xd0   : > { %vm582_vm0 = vcmp.eq.s32.totalorder %v5641_v40, %v512_v8  ;;  %4077 = vmatpush3.msra.mxu0 %v945_v0  ;;  %vm583_vm14 = vcmp.eq.s32.totalorder %v5641_v40, %v515_v14  ;;  %v5905_v0 = vld [vmem:[%s5811_s29 + $0xb0] sm:$0xff]  ;;  %v5913_v14 = vld [vmem:[%s5811_s29 + $0xc0] sm:$0xff]  ;;  %v5917_v8 = vld [vmem:[%s5811_s29 + $0xc8] sm:$0xff] }
  0xd1   : > { %3946 = vmatmul.mubr.msk.f32.gmra.mxu0 %vm581_vm12, %v4847_v45  ;;  %4078 = vmatprep.subr.mxu0 %v944_v51 }
  0xd2   : > { %3948 = vmatprep.mubr.msk.f32.mxu0 %vm582_vm0, %v4847_v45  ;;  %4079 = vmatpush3.msra.mxu0 %v944_v51  ;;  %v5909_v51 = vld [vmem:[%s5811_s29 + $0xb8] sm:$0xff] }
  0xd3   : > { %v521_v6 = vpop.permute.xlu1 %520  ;;  %v518_v16 = vpop.permute.xlu0 %517  ;;  %4080 = vmatprep.subr.mxu0 %v943_v31 }
  0xd4   : > { %vm584_vm8 = vcmp.eq.s32.totalorder %v5641_v40, %v518_v16  ;;  %4081 = vmatpush3.msra.mxu0 %v943_v31  ;;  %vm585_vm13 = vcmp.eq.s32.totalorder %v5641_v40, %v521_v6  ;;  %v5921_v31 = vld [vmem:[%s5811_s29 + $0xd0] sm:$0xff]  ;;  %v5929_v6 = vld [vmem:[%s5811_s29 + $0xe0] sm:$0xff]  ;;  %v5933_v16 = vld [vmem:[%s5811_s29 + $0xe8] sm:$0xff] }
  0xd5   : > { %3949 = vmatmul.mubr.msk.f32.gmra.mxu0 %vm583_vm14, %v4847_v45  ;;  %4082 = vmatprep.subr.mxu0 %v942_v52 }
  0xd6   : > { %3951 = vmatprep.mubr.msk.f32.mxu0 %vm584_vm8, %v4847_v45  ;;  %4083 = vmatpush3.msra.mxu0 %v942_v52  ;;  %v5925_v52 = vld [vmem:[%s5811_s29 + $0xd8] sm:$0xff] }
  0xd7   : > { %v527_v19 = vpop.permute.xlu1 %526  ;;  %v524_v60 = vpop.permute.xlu0 %523  ;;  %4084 = vmatprep.subr.mxu0 %v941_v7 }
  0xd8   : > { %vm587_vm15 = vcmp.eq.s32.totalorder %v5641_v40, %v527_v19  ;;  %vm586_vm1 = vcmp.eq.s32.totalorder %v5641_v40, %v524_v60  ;;  %4085 = vmatpush3.msra.mxu0 %v941_v7  ;;  %v5937_v7 = vld [vmem:[%s5811_s29 + $0xf0] sm:$0xff]  ;;  %v5941_v19 = vld [vmem:[%s5811_s29 + $0xf8] sm:$0xff] }
  0xd9   : > { %3952 = vmatmul.mubr.msk.f32.gmra.mxu0 %vm585_vm13, %v4847_v45  ;;  %3954 = vmatprep.mubr.msk.f32.mxu1 %vm586_vm1, %v4847_v45  ;;  %v1507_v60 = vld [vmem:[#allocation5 + $0x78] sm:$0xff] }
  0xda   : > { %3955 = vmatmul.mubr.msk.f32.vlgmr.msra.gmra.mxu1 %vm587_vm15, %v4847_v45  ;;  %4086 = vmatprep.subr.mxu0 %v940_v34 }
  0xdb   : > { %v533_v5 = vpop.permute.xlu1 %532  ;;  %v530_v15 = vpop.permute.xlu0 %529  ;;  %3979 = vmatpush3.msra.mxu1 %v5646_v42  ;;  %4087 = vmatpush3.msra.mxu0 %v940_v34  ;;  %v956_v42 = vld [vmem:[%s6588_s5 + $0x8] sm:$0xff]  ;;  %v1506_v34 = vld [vmem:[#allocation5 + $0x70] sm:$0xff] }
  0xdc   : > { %vm589_vm2 = vcmp.eq.s32.totalorder %v5641_v40, %v533_v5  ;;  %vm588_vm3 = vcmp.eq.s32.totalorder %v5641_v40, %v530_v15  ;;  %3980 = vmatprep.subr.mxu1 %v969_v4  ;;  %4088 = vmatprep.subr.mxu0 %v939_v43  ;;  %v1504_v5 = vld [vmem:[#allocation5 + $0x60] sm:$0xff]  ;;  %v1503_v15 = vld [vmem:[#allocation5 + $0x58] sm:$0xff] }
  0xdd   : > { %3957 = vmatprep.mubr.msk.f32.mxu1 %vm588_vm3, %v4847_v45  ;;  %3981 = vmatpush3.msra.mxu1 %v969_v4  ;;  %v1505_v4 = vld [vmem:[#allocation5 + $0x68] sm:$0xff] }
  0xde   : > { %3958 = vmatmul.mubr.msk.f32.gmra.mxu1 %vm589_vm2, %v4847_v45  ;;  %3982 = vmatprep.subr.mxu1 %v968_v12 }
  0xdf   : > { %v539_v17 = vpop.permute.xlu1 %538  ;;  %v536_v18 = vpop.permute.xlu0 %535  ;;  %3983 = vmatpush3.msra.mxu1 %v968_v12  ;;  %4089 = vmatpush3.msra.mxu0 %v939_v43  ;;  %v1502_v12 = vld [vmem:[#allocation5 + $0x50] sm:$0xff] }
  0xe0   : > { %vm591_vm4 = vcmp.eq.s32.totalorder %v5641_v40, %v539_v17  ;;  %vm590_vm5 = vcmp.eq.s32.totalorder %v5641_v40, %v536_v18  ;;  %3984 = vmatprep.subr.mxu1 %v967_v10  ;;  %v1500_v17 = vld [vmem:[#allocation5 + $0x40] sm:$0xff]  ;;  %v1499_v18 = vld [vmem:[#allocation5 + $0x38] sm:$0xff] }
  0xe1   : > { %3960 = vmatprep.mubr.msk.f32.mxu1 %vm590_vm5, %v4847_v45  ;;  %3985 = vmatpush3.msra.mxu1 %v967_v10  ;;  %v1501_v10 = vld [vmem:[#allocation5 + $0x48] sm:$0xff] }
  0xe2   : > { %3961 = vmatmul.mubr.msk.f32.gmra.mxu1 %vm591_vm4, %v4847_v45  ;;  %3986 = vmatprep.subr.mxu1 %v966_v22 }
  0xe3   : > { %v545_v9 = vpop.permute.xlu1 %544  ;;  %v542_v21 = vpop.permute.xlu0 %541  ;;  %3987 = vmatpush3.msra.mxu1 %v966_v22  ;;  %v1498_v22 = vld [vmem:[#allocation5 + $0x30] sm:$0xff] }
  0xe4   : > { %vm593_vm6 = vcmp.eq.s32.totalorder %v5641_v40, %v545_v9  ;;  %vm592_vm7 = vcmp.eq.s32.totalorder %v5641_v40, %v542_v21  ;;  %3988 = vmatprep.subr.mxu1 %v965_v23  ;;  %v1496_v9 = vld [vmem:[#allocation5 + $0x20] sm:$0xff]  ;;  %v1495_v21 = vld [vmem:[#allocation5 + $0x18] sm:$0xff] }
  0xe5   : > { %3963 = vmatprep.mubr.msk.f32.mxu1 %vm592_vm7, %v4847_v45  ;;  %3989 = vmatpush3.msra.mxu1 %v965_v23  ;;  %v1497_v23 = vld [vmem:[#allocation5 + $0x28] sm:$0xff] }
  0xe6   : > { %3964 = vmatmul.mubr.msk.f32.gmra.mxu1 %vm593_vm6, %v4847_v45  ;;  %3990 = vmatprep.subr.mxu1 %v964_v24 }
  0xe7   : > { %v551_v26 = vpop.permute.xlu1 %550  ;;  %v548_v27 = vpop.permute.xlu0 %547  ;;  %3991 = vmatpush3.msra.mxu1 %v964_v24  ;;  %v1494_v24 = vld [vmem:[#allocation5 + $0x10] sm:$0xff] }
  0xe8   : > { %vm595_vm9 = vcmp.eq.s32.totalorder %v5641_v40, %v551_v26  ;;  %vm594_vm10 = vcmp.eq.s32.totalorder %v5641_v40, %v548_v27  ;;  %3992 = vmatprep.subr.mxu1 %v963_v25 }
  0xe9   : > { %3966 = vmatprep.mubr.msk.f32.mxu1 %vm594_vm10, %v4847_v45  ;;  %3993 = vmatpush3.msra.mxu1 %v963_v25 }
  0xea   : > { %3967 = vmatmul.mubr.msk.f32.gmra.mxu1 %vm595_vm9, %v4847_v45  ;;  %3994 = vmatprep.subr.mxu1 %v962_v28 }
  0xeb   : > { %v557_v30 = vpop.permute.xlu1 %556  ;;  %v554_v33 = vpop.permute.xlu0 %553  ;;  %3995 = vmatpush3.msra.mxu1 %v962_v28 }
  0xec   : > { %vm597_vm11 = vcmp.eq.s32.totalorder %v5641_v40, %v557_v30  ;;  %vm596_vm12 = vcmp.eq.s32.totalorder %v5641_v40, %v554_v33  ;;  %3996 = vmatprep.subr.mxu1 %v961_v29 }
  0xed   : > { %3969 = vmatprep.mubr.msk.f32.mxu1 %vm596_vm12, %v4847_v45  ;;  %3997 = vmatpush3.msra.mxu1 %v961_v29 }
  0xee   : > { %3970 = vmatmul.mubr.msk.f32.gmra.mxu1 %vm597_vm11, %v4847_v45  ;;  %3998 = vmatprep.subr.mxu1 %v960_v35 }
  0xef   : > { %v563_v37 = vpop.permute.xlu1 %562  ;;  %v560_v38 = vpop.permute.xlu0 %559  ;;  %3999 = vmatpush3.msra.mxu1 %v960_v35 }
  0xf0   : > { %vm599_vm0 = vcmp.eq.s32.totalorder %v5641_v40, %v563_v37  ;;  %vm598_vm14 = vcmp.eq.s32.totalorder %v5641_v40, %v560_v38  ;;  %4000 = vmatprep.subr.mxu1 %v959_v36 }
  0xf1   : > { %3972 = vmatprep.mubr.msk.f32.mxu1 %vm598_vm14, %v4847_v45  ;;  %4001 = vmatpush3.msra.mxu1 %v959_v36 }
  0xf2   : > { %3973 = vmatmul.mubr.msk.f32.gmra.mxu1 %vm599_vm0, %v4847_v45  ;;  %4002 = vmatprep.subr.mxu1 %v958_v39 }
  0xf3   : > { %v569_v3 = vpop.permute.xlu1 %568  ;;  %v566_v41 = vpop.permute.xlu0 %565  ;;  %4003 = vmatpush3.msra.mxu1 %v958_v39 }
  0xf4   : > { %vm601_vm8 = vcmp.eq.s32.totalorder %v5641_v40, %v569_v3  ;;  %vm600_vm13 = vcmp.eq.s32.totalorder %v5641_v40, %v566_v41  ;;  %4004 = vmatprep.subr.mxu1 %v957_v2  ;;  %v5814_v40 = vld [vmem:[%s5811_s29] sm:$0xff] }
  0xf5   : > { %3975 = vmatprep.mubr.msk.f32.mxu1 %vm600_vm13, %v4847_v45  ;;  %4005 = vmatpush3.msra.mxu1 %v957_v2 }
  0xf6   : > { %3976 = vmatmul.mubr.msk.f32.gmra.mxu1 %vm601_vm8, %v4847_v45  ;;  %4006 = vmatprep.subr.mxu1 %v956_v42  ;;  %v5829_v45 = vld [vmem:[%s5811_s29 + $0x18] sm:$0xff]  ;;  %s3381_s29 = sshll.u32 %s386_s26, 9 }
  0xf7   : > { %4007 = vmatpush3.msra.mxu1 %v956_v42  ;;  %4010 = vmatprep.mubr.f32.mxu1 %v5814_v40  ;;  %s6307_s14 = scalar_lea.vmem [#allocation7], %s3381_s29 }
  0xf8   : > { %4008 = vmatprep.subr.mxu1 %v955_v1  ;;  %s3265_s23 = sshll.u32 %s6307_s14, 4  ;;  %s6537_s23 = int_to_ptr.vmem [resolvable:$true] %s3265_s23 }
  0xf9   : > { %4009 = vmatpush3.msra.mxu1 %v955_v1  ;;  %s4771_s29 = scalar_lea.vmem %s6537_s23, 8192  ;;  %p4778_p11 = scmp.lt.s32.totalorder %s6537_s23, %s4776_s21 }
  0xfa   : > { %4011 = vmatmul.mubr.f32.vlgmr.msra.gmra.mxu1 %v5821_v44  ;;  %4138 = vmatprep.subr.mxu1 %v1507_v60  ;;  %p4772_p10 = scmp.ne.s32.totalorder %s6537_s23, %s4771_s29  ;;  %p4779_p0 = scmp.lt.s32.totalorder %s4777_s17, %s4771_s29 }
  0xfb   : > { %4013 = vmatprep.mubr.f32.mxu1 %v5825_v61  ;;  %4139 = vmatpush3.msra.mxu1 %v1507_v60 }
  0xfc   : > { %4140 = vmatprep.subr.mxu1 %v1506_v34  ;;  %p4773_p12 = pnand %p4772_p10, %p4939_p5  ;;  %p4780_p1 = por %p4779_p0, %p4778_p11 }
  0xfd   : > { %4141 = vmatpush3.msra.mxu1 %v1506_v34 }
  0xfe   : > { %4014 = vmatmul.mubr.f32.gmra.mxu1 %v5829_v45  ;;  %4142 = vmatprep.subr.mxu1 %v1505_v4  ;;  %p4774_p8 = pneg %p4773_p12 }
  0xff   : > { %4016 = vmatprep.mubr.f32.mxu1 %v5833_v13  ;;  %4143 = vmatpush3.msra.mxu1 %v1505_v4 }
 0x100   : > { %4144 = vmatprep.subr.mxu1 %v1504_v5  ;;  %p4781_p3 = pnand %p4780_p1, %p4774_p8 }
 0x101   : > { %4145 = vmatpush3.msra.mxu1 %v1504_v5 }
 0x102   : > { %4017 = vmatmul.mubr.f32.gmra.mxu1 %v5837_v46  ;;  %4146 = vmatprep.subr.mxu1 %v1503_v15 }
 0x103   : > { %4019 = vmatprep.mubr.f32.mxu1 %v5841_v47  ;;  %4147 = vmatpush3.msra.mxu1 %v1503_v15 }
 0x104   : > { %4148 = vmatprep.subr.mxu1 %v1502_v12 }
 0x105   : > { %4149 = vmatpush3.msra.mxu1 %v1502_v12 }
 0x106   : > { %4020 = vmatmul.mubr.f32.gmra.mxu1 %v5845_v11  ;;  %4150 = vmatprep.subr.mxu1 %v1501_v10 }
 0x107   : > { %4022 = vmatprep.mubr.f32.mxu1 %v5849_v32  ;;  %4151 = vmatpush3.msra.mxu1 %v1501_v10 }
 0x108   : > { %4152 = vmatprep.subr.mxu1 %v1500_v17 }
 0x109   : > { %4153 = vmatpush3.msra.mxu1 %v1500_v17 }
 0x10a   : > { %4023 = vmatmul.mubr.f32.gmra.mxu1 %v5853_v48  ;;  %4154 = vmatprep.subr.mxu1 %v1499_v18 }
 0x10b   : > { %4025 = vmatprep.mubr.f32.mxu1 %v5857_v49  ;;  %4155 = vmatpush3.msra.mxu1 %v1499_v18 }
 0x10c   : > { %4156 = vmatprep.subr.mxu1 %v1498_v22 }
 0x10d   : > { %4157 = vmatpush3.msra.mxu1 %v1498_v22 }
 0x10e   : > { %4026 = vmatmul.mubr.f32.gmra.mxu1 %v5861_v50  ;;  %4158 = vmatprep.subr.mxu1 %v1497_v23 }
 0x10f   : > { %4028 = vmatprep.mubr.f32.mxu1 %v5865_v53  ;;  %4159 = vmatpush3.msra.mxu1 %v1497_v23 }
 0x110   : > { %4160 = vmatprep.subr.mxu1 %v1496_v9 }
 0x111   : > { %4161 = vmatpush3.msra.mxu1 %v1496_v9 }
 0x112   : > { %4029 = vmatmul.mubr.f32.gmra.mxu1 %v5869_v54  ;;  %4162 = vmatprep.subr.mxu1 %v1495_v21 }
 0x113   : > { %4031 = vmatprep.mubr.f32.mxu1 %v5873_v20  ;;  %4163 = vmatpush3.msra.mxu1 %v1495_v21 }
 0x114   : > { %4164 = vmatprep.subr.mxu1 %v1494_v24 }
 0x115   : > { %4165 = vmatpush3.msra.mxu1 %v1494_v24 }
 0x116   : > { %4032 = vmatmul.mubr.f32.gmra.mxu1 %v5877_v55 }
 0x117   : > { %4034 = vmatprep.mubr.f32.mxu1 %v5881_v56 }
 0x11a   : > { %4035 = vmatmul.mubr.f32.gmra.mxu1 %v5885_v57 }
 0x11b   : > { %4037 = vmatprep.mubr.f32.mxu1 %v5889_v58 }
 0x11e   : > { %4038 = vmatmul.mubr.f32.gmra.mxu1 %v5893_v59 }
 0x11f   : > { %4040 = vmatprep.mubr.f32.mxu1 %v5897_v62 }
 0x122   : > { %4041 = vmatmul.mubr.f32.gmra.mxu1 %v5901_v63 }
 0x123   : > { %4043 = vmatprep.mubr.f32.mxu1 %v5905_v0 }
 0x126   : > { %4044 = vmatmul.mubr.f32.gmra.mxu1 %v5909_v51 }
 0x127   : > { %4046 = vmatprep.mubr.f32.mxu1 %v5913_v14 }
 0x12a   : > { %4047 = vmatmul.mubr.f32.gmra.mxu1 %v5917_v8 }
 0x12b   : > { %4049 = vmatprep.mubr.f32.mxu1 %v5921_v31 }
 0x12e   : > { %4050 = vmatmul.mubr.f32.gmra.mxu1 %v5925_v52 }
 0x12f   : > { %4052 = vmatprep.mubr.f32.mxu1 %v5929_v6 }
 0x132   : > { %4053 = vmatmul.mubr.f32.gmra.mxu1 %v5933_v16 }
 0x133   : > { %4055 = vmatprep.mubr.f32.mxu1 %v5937_v7 }
 0x136   : > { %4056 = vmatmul.mubr.f32.gmra.mxu1 %v5941_v19 }
 0x17d   : > { %v5944_v25 = vpop.f32.mrf.mxu0 }
 0x17f   : > { %v5946_v26 = vpop.f32.mrf.mxu0 }
 0x180   : > { %4090 = vmatprep.mubr.f32.mxu0 %v5946_v26 }
 0x181   : > { %v5949_v27 = vpop.f32.mrf.mxu0  ;;  %4091 = vmatmul.mubr.f32.vlgmr.msra.gmra.mxu0 %v5944_v25 }
 0x183   : > { %v5952_v28 = vpop.f32.mrf.mxu0 }
 0x184   : > { %4093 = vmatprep.mubr.f32.mxu0 %v5952_v28 }
 0x185   : > { %v5955_v29 = vpop.f32.mrf.mxu0  ;;  %4094 = vmatmul.mubr.f32.gmra.mxu0 %v5949_v27 }
 0x187   : > { %v5958_v30 = vpop.f32.mrf.mxu0 }
 0x188   : > { %4096 = vmatprep.mubr.f32.mxu0 %v5958_v30 }
 0x189   : > { %v5961_v33 = vpop.f32.mrf.mxu0  ;;  %4097 = vmatmul.mubr.f32.gmra.mxu0 %v5955_v29 }
 0x18b   : > { %v5964_v35 = vpop.f32.mrf.mxu0 }
 0x18c   : > { %4099 = vmatprep.mubr.f32.mxu0 %v5964_v35 }
 0x18d   : > { %v5967_v36 = vpop.f32.mrf.mxu0  ;;  %4100 = vmatmul.mubr.f32.gmra.mxu0 %v5961_v33 }
 0x18f   : > { %v5970_v37 = vpop.f32.mrf.mxu0 }
 0x190   : > { %4102 = vmatprep.mubr.f32.mxu0 %v5970_v37 }
 0x191   : > { %v5973_v38 = vpop.f32.mrf.mxu0  ;;  %4103 = vmatmul.mubr.f32.gmra.mxu0 %v5967_v36 }
 0x193   : > { %v5976_v39 = vpop.f32.mrf.mxu0 }
 0x194   : > { %4105 = vmatprep.mubr.f32.mxu0 %v5976_v39 }
 0x195   : > { %v5979_v2 = vpop.f32.mrf.mxu0  ;;  %4106 = vmatmul.mubr.f32.gmra.mxu0 %v5973_v38 }
 0x197   : > { %v5982_v3 = vpop.f32.mrf.mxu0 }
 0x198   : > { %4108 = vmatprep.mubr.f32.mxu0 %v5982_v3 }
 0x199   : > { %v5985_v41 = vpop.f32.mrf.mxu0  ;;  %4109 = vmatmul.mubr.f32.gmra.mxu0 %v5979_v2 }
 0x19a   : > { %v5988_v42 = vpop.f32.mrf.mxu1 }
 0x19b   : > { %v5990_v1 = vpop.f32.mrf.mxu0 }
 0x19c   : > { %v5992_v43 = vpop.f32.mrf.mxu1  ;;  %4111 = vmatprep.mubr.f32.mxu0 %v5990_v1 }
 0x19d   : > { %4112 = vmatmul.mubr.f32.gmra.mxu0 %v5985_v41 }
 0x19e   : > { %v5996_v60 = vpop.f32.mrf.mxu1  ;;  %4114 = vmatprep.mubr.f32.mxu0 %v5992_v43 }
 0x1a0   : > { %v5999_v34 = vpop.f32.mrf.mxu1 }
 0x1a1   : > { %4115 = vmatmul.mubr.f32.gmra.mxu0 %v5988_v42 }
 0x1a2   : > { %v6002_v4 = vpop.f32.mrf.mxu1  ;;  %4117 = vmatprep.mubr.f32.mxu0 %v5999_v34 }
 0x1a4   : > { %v6005_v5 = vpop.f32.mrf.mxu1 }
 0x1a5   : > { %4118 = vmatmul.mubr.f32.gmra.mxu0 %v5996_v60 }
 0x1a6   : > { %v6008_v15 = vpop.f32.mrf.mxu1  ;;  %4120 = vmatprep.mubr.f32.mxu0 %v6005_v5 }
 0x1a8   : > { %v6011_v12 = vpop.f32.mrf.mxu1 }
 0x1a9   : > { %4121 = vmatmul.mubr.f32.gmra.mxu0 %v6002_v4 }
 0x1aa   : > { %v6014_v10 = vpop.f32.mrf.mxu1  ;;  %4123 = vmatprep.mubr.f32.mxu0 %v6011_v12 }
 0x1ab   : > { %6748 = vst [vmem:[#allocation16_spill] sm:$0xff] %v6014_v10 }
 0x1ac   : > { %v6017_v17 = vpop.f32.mrf.mxu1 }
 0x1ad   : > { %4124 = vmatmul.mubr.f32.gmra.mxu0 %v6008_v15 }
 0x1ae   : > { %v6020_v18 = vpop.f32.mrf.mxu1  ;;  %4126 = vmatprep.mubr.f32.mxu0 %v6017_v17 }
 0x1b0   : > { %v6023_v22 = vpop.f32.mrf.mxu1 }
 0x1b1   : > { %6749 = vst [vmem:[#allocation18_spill] sm:$0xff] %v6023_v22  ;;  %4127 = vmatmul.mubr.f32.gmra.mxu0 %v6014_v10  ;;  %v1493_v10 = vld [vmem:[#allocation5 + $0x8] sm:$0xff] }
 0x1b2   : > { %v6026_v23 = vpop.f32.mrf.mxu1  ;;  %4129 = vmatprep.mubr.f32.mxu0 %v6023_v22  ;;  %4166 = vmatprep.subr.mxu1 %v1493_v10  ;;  %v1492_v22 = vld [vmem:[#allocation5] sm:$0xff] }
 0x1b3   : > { %6750 = vst [vmem:[#allocation17_spill] sm:$0xff] %v6026_v23  ;;  %4167 = vmatpush3.msra.mxu1 %v1493_v10  ;;  %v3515_v10 = vld [vmem:[%s6588_s5 + $0xe8] sm:$0xff] }
 0x1b4   : > { %v6029_v9 = vpop.f32.mrf.mxu1  ;;  %4168 = vmatprep.subr.mxu1 %v1492_v22 }
 0x1b5   : > { %6751 = vst [vmem:[#allocation12_spill] sm:$0xff] %v6029_v9  ;;  %4130 = vmatmul.mubr.f32.gmra.mxu0 %v6020_v18  ;;  %4169 = vmatpush3.msra.mxu1 %v1492_v22  ;;  %v3514_v22 = vld [vmem:[%s6588_s5 + $0xe0] sm:$0xff] }
 0x1b6   : > { %v6032_v21 = vpop.f32.mrf.mxu1  ;;  %4132 = vmatprep.mubr.f32.mxu0 %v6029_v9  ;;  %v3517_v9 = vld [vmem:[%s6588_s5 + $0xf8] sm:$0xff] }
 0x1b7   : > { %6752 = vst [vmem:[#allocation13_spill] sm:$0xff] %v6032_v21  ;;  %4218 = vmatprep.subr.mxu0 %v3517_v9 }
 0x1b8   : > { %v6035_v24 = vpop.f32.mrf.mxu1  ;;  %4219 = vmatpush3.msra.mxu0 %v3517_v9  ;;  %v3513_v9 = vld [vmem:[%s6588_s5 + $0xd8] sm:$0xff] }
 0x1b9   : > { %6753 = vst [vmem:[#allocation11_spill] sm:$0xff] %v6035_v24  ;;  %4133 = vmatmul.mubr.f32.gmra.mxu0 %v6026_v23  ;;  %v6047_v23 = vld [vmem:[%s6587_s4 + $0xf8] sm:$0xff] }
 0x1ba   : > { %4135 = vmatprep.mubr.f32.mxu0 %v6035_v24  ;;  %4298 = vmatprep.subr.mxu1 %v6047_v23 }
 0x1bd   : > { %4136 = vmatmul.mubr.f32.gmra.mxu0 %v6032_v21  ;;  %v4012_v21 = vpop.f32.mrf.mxu1 }
 0x1be   : > { %4250 = vmatprep.mubr.f32.mxu0 %v5814_v40  ;;  %v3516_v40 = vld [vmem:[%s6588_s5 + $0xf0] sm:$0xff] }
 0x1bf   : > { %4220 = vmatprep.subr.mxu0 %v3516_v40  ;;  %v1037_v24 = vpop.f32.mrf.mxu1 }
 0x1c0   : > { %4221 = vmatpush3.msra.mxu0 %v3516_v40  ;;  %v3512_v40 = vld [vmem:[%s6588_s5 + $0xd0] sm:$0xff] }
 0x1c1   : > { %4222 = vmatprep.subr.mxu0 %v3515_v10 }
 0x1c2   : > { %4223 = vmatpush3.msra.mxu0 %v3515_v10  ;;  %v3511_v10 = vld [vmem:[%s6588_s5 + $0xc8] sm:$0xff] }
 0x1c3   : > { %4224 = vmatprep.subr.mxu0 %v3514_v22 }
 0x1c4   : > { %4225 = vmatpush3.msra.mxu0 %v3514_v22  ;;  %v3510_v22 = vld [vmem:[%s6588_s5 + $0xc0] sm:$0xff] }
 0x1c5   : > { %4226 = vmatprep.subr.mxu0 %v3513_v9 }
 0x1c6   : > { %4227 = vmatpush3.msra.mxu0 %v3513_v9  ;;  %v3509_v9 = vld [vmem:[%s6588_s5 + $0xb8] sm:$0xff] }
 0x1c7   : > { %4228 = vmatprep.subr.mxu0 %v3512_v40 }
 0x1c8   : > { %4229 = vmatpush3.msra.mxu0 %v3512_v40  ;;  %v3508_v40 = vld [vmem:[%s6588_s5 + $0xb0] sm:$0xff] }
 0x1c9   : > { %4230 = vmatprep.subr.mxu0 %v3511_v10 }
 0x1ca   : > { %4231 = vmatpush3.msra.mxu0 %v3511_v10  ;;  %v3507_v10 = vld [vmem:[%s6588_s5 + $0xa8] sm:$0xff] }
 0x1cb   : > { %4232 = vmatprep.subr.mxu0 %v3510_v22 }
 0x1cc   : > { %4233 = vmatpush3.msra.mxu0 %v3510_v22  ;;  %v3506_v22 = vld [vmem:[%s6588_s5 + $0xa0] sm:$0xff] }
 0x1cd   : > { %4234 = vmatprep.subr.mxu0 %v3509_v9 }
 0x1ce   : > { %4235 = vmatpush3.msra.mxu0 %v3509_v9  ;;  %v3505_v9 = vld [vmem:[%s6588_s5 + $0x98] sm:$0xff] }
 0x1cf   : > { %4236 = vmatprep.subr.mxu0 %v3508_v40 }
 0x1d0   : > { %4237 = vmatpush3.msra.mxu0 %v3508_v40  ;;  %v3504_v40 = vld [vmem:[%s6588_s5 + $0x90] sm:$0xff] }
 0x1d1   : > { %4238 = vmatprep.subr.mxu0 %v3507_v10 }
 0x1d2   : > { %4239 = vmatpush3.msra.mxu0 %v3507_v10  ;;  %v3503_v10 = vld [vmem:[%s6588_s5 + $0x88] sm:$0xff] }
 0x1d3   : > { %4240 = vmatprep.subr.mxu0 %v3506_v22 }
 0x1d4   : > { %4241 = vmatpush3.msra.mxu0 %v3506_v22  ;;  %v3502_v22 = vld [vmem:[%s6588_s5 + $0x80] sm:$0xff] }
 0x1d5   : > { %4242 = vmatprep.subr.mxu0 %v3505_v9 }
 0x1d6   : > { %4243 = vmatpush3.msra.mxu0 %v3505_v9  ;;  %v4015_v9 = vpop.f32.mrf.mxu1 }
 0x1d7   : > { %4244 = vmatprep.subr.mxu0 %v3504_v40 }
 0x1d8   : > { %4245 = vmatpush3.msra.mxu0 %v3504_v40  ;;  %v1047_v40 = vpop.f32.mrf.mxu1 }
 0x1d9   : > { %4246 = vmatprep.subr.mxu0 %v3503_v10 }
 0x1da   : > { %4247 = vmatpush3.msra.mxu0 %v3503_v10  ;;  %v4018_v10 = vpop.f32.mrf.mxu1 }
 0x1db   : > { %4248 = vmatprep.subr.mxu0 %v3502_v22 }
 0x1dc   : > { %4249 = vmatpush3.msra.mxu0 %v3502_v22  ;;  %v1057_v22 = vpop.f32.mrf.mxu1 }
 0x1dd   : > { %4251 = vmatmul.mubr.f32.vlgmr.msra.gmra.mxu0 %v5821_v44 }
 0x1de   : > { %4253 = vmatprep.mubr.f32.mxu0 %v5825_v61  ;;  %v6105_v44 = vpop.f32.mrf.mxu1 }
 0x1e0   : > { %v6109_v61 = vpop.f32.mrf.mxu1 }
 0x1e1   : > { %4254 = vmatmul.mubr.f32.gmra.mxu0 %v5829_v45 }
 0x1e2   : > { %4256 = vmatprep.mubr.f32.mxu0 %v5833_v13  ;;  %v6113_v45 = vpop.f32.mrf.mxu1 }
 0x1e4   : > { %v6117_v13 = vpop.f32.mrf.mxu1 }
 0x1e5   : > { %4257 = vmatmul.mubr.f32.gmra.mxu0 %v5837_v46 }
 0x1e6   : > { %4259 = vmatprep.mubr.f32.mxu0 %v5841_v47  ;;  %v6121_v46 = vpop.f32.mrf.mxu1 }
 0x1e8   : > { %v6125_v47 = vpop.f32.mrf.mxu1 }
 0x1e9   : > { %4260 = vmatmul.mubr.f32.gmra.mxu0 %v5845_v11 }
 0x1ea   : > { %4262 = vmatprep.mubr.f32.mxu0 %v5849_v32  ;;  %v6129_v11 = vpop.f32.mrf.mxu1 }
 0x1ec   : > { %v6133_v32 = vpop.f32.mrf.mxu1 }
 0x1ed   : > { %4263 = vmatmul.mubr.f32.gmra.mxu0 %v5853_v48 }
 0x1ee   : > { %4265 = vmatprep.mubr.f32.mxu0 %v5857_v49  ;;  %v6137_v48 = vpop.f32.mrf.mxu1 }
 0x1f0   : > { %v6141_v49 = vpop.f32.mrf.mxu1 }
 0x1f1   : > { %4266 = vmatmul.mubr.f32.gmra.mxu0 %v5861_v50 }
 0x1f2   : > { %4268 = vmatprep.mubr.f32.mxu0 %v5865_v53 }
 0x1f5   : > { %4269 = vmatmul.mubr.f32.gmra.mxu0 %v5869_v54  ;;  %v6147_v54 = vld [vmem:[%s6589_s6] ss:$0 sm:$0xff] }
 0x1f6   : > { %4271 = vmatprep.mubr.f32.mxu0 %v5873_v20 }
 0x1f9   : > { %4272 = vmatmul.mubr.f32.gmra.mxu0 %v5877_v55  ;;  %v6150_v55 = vpop.f32.mrf.mxu1 }
 0x1fa   : > { %4274 = vmatprep.mubr.f32.mxu0 %v5881_v56 }
 0x1fd   : > { %4275 = vmatmul.mubr.f32.gmra.mxu0 %v5885_v57 }
 0x1fe   : > { %4277 = vmatprep.mubr.f32.mxu0 %v5889_v58 }
 0x201   : > { %4278 = vmatmul.mubr.f32.gmra.mxu0 %v5893_v59 }
 0x202   : > { %4280 = vmatprep.mubr.f32.mxu0 %v5897_v62 }
 0x205   : > { %4281 = vmatmul.mubr.f32.gmra.mxu0 %v5901_v63 }
 0x206   : > { %4283 = vmatprep.mubr.f32.mxu0 %v5905_v0  ;;  %v6155_v0 = vpop.f32.mrf.mxu1 }
 0x209   : > { %4284 = vmatmul.mubr.f32.gmra.mxu0 %v5909_v51 }
 0x20a   : > { %4286 = vmatprep.mubr.f32.mxu0 %v5913_v14 }
 0x20d   : > { %4287 = vmatmul.mubr.f32.gmra.mxu0 %v5917_v8 }
 0x20e   : > { %4289 = vmatprep.mubr.f32.mxu0 %v5921_v31 }
 0x211   : > { %4290 = vmatmul.mubr.f32.gmra.mxu0 %v5925_v52 }
 0x212   : > { %4292 = vmatprep.mubr.f32.mxu0 %v5929_v6 }
 0x215   : > { %4293 = vmatmul.mubr.f32.gmra.mxu0 %v5933_v16 }
 0x216   : > { %4295 = vmatprep.mubr.f32.mxu0 %v5937_v7  ;;  %v3500_v7 = vld [vmem:[%s6587_s4 + $0xf0] sm:$0xff] }
 0x219   : > { %4296 = vmatmul.mubr.f32.gmra.mxu0 %v5941_v19 }
 0x241   : > { %v4092_v50 = vpop.f32.mrf.mxu0 }
 0x242   : > { %v1268_v53 = vadd.f32 %v4092_v50, %v4012_v21  ;;  %v6162_v21 = vpop.f32.mrf.mxu1 }
 0x243   : > { %v1262_v20 = vpop.f32.mrf.mxu0 }
 0x244   : > { %v1263_v56 = vadd.f32 %v1262_v20, %v1037_v24  ;;  %v1429_v57 = vadd.f32 %v6147_v54, %v1268_v53 }
 0x245   : > { %v4095_v58 = vpop.f32.mrf.mxu0 }
 0x246   : > { %v1428_v59 = vadd.f32 %v6147_v54, %v1263_v56  ;;  %v1278_v62 = vadd.f32 %v4095_v58, %v4015_v9  ;;  %v1461_v8 = vmax.f32 %v1429_v57, 0.0  ;;  %v6174_v57 = vpop.f32.mrf.mxu1 }
 0x247   : > { %v1272_v63 = vpop.f32.mrf.mxu0 }
 0x248   : > { %v1460_v51 = vmax.f32 %v1428_v59, 0.0  ;;  %v1273_v14 = vadd.f32 %v1272_v63, %v1047_v40  ;;  %v1431_v31 = vadd.f32 %v6147_v54, %v1278_v62  ;;  %v3499_v40 = vld [vmem:[%s6587_s4 + $0xe8] sm:$0xff]  ;;  %v3497_v62 = vld [vmem:[%s6587_s4 + $0xd8] sm:$0xff] }
 0x249   : > { %v4098_v52 = vpop.f32.mrf.mxu0 }
 0x24a   : > { %v1430_v6 = vadd.f32 %v6147_v54, %v1273_v14  ;;  %v1288_v16 = vadd.f32 %v4098_v52, %v4018_v10  ;;  %4170 = vmatprep.mubr.f32.mxu1 %v1460_v51  ;;  %v1463_v50 = vmax.f32 %v1431_v31, 0.0  ;;  %v6186_v52 = vpop.f32.mrf.mxu1 }
 0x24b   : > { %v1282_v19 = vpop.f32.mrf.mxu0  ;;  %4171 = vmatmul.mubr.f32.vlgmr.msra.gmra.mxu1 %v1461_v8 }
 0x24c   : > { %v1462_v24 = vmax.f32 %v1430_v6, 0.0  ;;  %v1283_v9 = vadd.f32 %v1282_v19, %v1057_v22  ;;  %4299 = vmatpush3.msra.mxu1 %v6047_v23  ;;  %v1433_v10 = vadd.f32 %v6147_v54, %v1288_v16  ;;  %v3498_v22 = vld [vmem:[%s6587_s4 + $0xe0] sm:$0xff] }
 0x24d   : > { %v4101_v53 = vpop.f32.mrf.mxu0  ;;  %4300 = vmatprep.subr.mxu1 %v3500_v7 }
 0x24e   : > { %v1432_v20 = vadd.f32 %v6147_v54, %v1283_v9  ;;  %v1298_v56 = vadd.f32 %v4101_v53, %v6105_v44  ;;  %4173 = vmatprep.mubr.f32.mxu1 %v1462_v24  ;;  %4301 = vmatpush3.msra.mxu1 %v3500_v7  ;;  %v1465_v44 = vmax.f32 %v1433_v10, 0.0  ;;  %v3495_v7 = vld [vmem:[%s6587_s4 + $0xc8] sm:$0xff]  ;;  %v6198_v10 = vpop.f32.mrf.mxu1 }
 0x24f   : > { %v1292_v23 = vpop.f32.mrf.mxu0  ;;  %4174 = vmatmul.mubr.f32.gmra.mxu1 %v1463_v50  ;;  %4302 = vmatprep.subr.mxu1 %v3499_v40 }
 0x250   : > { %v1464_v58 = vmax.f32 %v1432_v20, 0.0  ;;  %v1293_v59 = vadd.f32 %v1292_v23, %v6109_v61  ;;  %4303 = vmatpush3.msra.mxu1 %v3499_v40  ;;  %v1435_v63 = vadd.f32 %v6147_v54, %v1298_v56  ;;  %v3496_v61 = vld [vmem:[%s6587_s4 + $0xd0] sm:$0xff]  ;;  %v3493_v56 = vld [vmem:[%s6587_s4 + $0xb8] sm:$0xff] }
 0x251   : > { %v4104_v51 = vpop.f32.mrf.mxu0  ;;  %4304 = vmatprep.subr.mxu1 %v3498_v22 }
 0x252   : > { %v1434_v14 = vadd.f32 %v6147_v54, %v1293_v59  ;;  %v1308_v8 = vadd.f32 %v4104_v51, %v6113_v45  ;;  %4176 = vmatprep.mubr.f32.mxu1 %v1464_v58  ;;  %4305 = vmatpush3.msra.mxu1 %v3498_v22  ;;  %v1467_v45 = vmax.f32 %v1435_v63, 0.0 }
 0x253   : > { %v1302_v31 = vpop.f32.mrf.mxu0  ;;  %4177 = vmatmul.mubr.f32.gmra.mxu1 %v1465_v44  ;;  %4306 = vmatprep.subr.mxu1 %v3497_v62  ;;  %v6210_v44 = vpop.f32.mrf.mxu1 }
 0x254   : > { %v1466_v6 = vmax.f32 %v1434_v14, 0.0  ;;  %v1303_v16 = vadd.f32 %v1302_v31, %v6117_v13  ;;  %4307 = vmatpush3.msra.mxu1 %v3497_v62  ;;  %v1437_v19 = vadd.f32 %v6147_v54, %v1308_v8  ;;  %v3494_v13 = vld [vmem:[%s6587_s4 + $0xc0] sm:$0xff]  ;;  %v3491_v14 = vld [vmem:[%s6587_s4 + $0xa8] sm:$0xff] }
 0x255   : > { %v4107_v24 = vpop.f32.mrf.mxu0  ;;  %4308 = vmatprep.subr.mxu1 %v3496_v61 }
 0x256   : > { %v1436_v9 = vadd.f32 %v6147_v54, %v1303_v16  ;;  %v1318_v40 = vadd.f32 %v4107_v24, %v6121_v46  ;;  %4179 = vmatprep.mubr.f32.mxu1 %v1466_v6  ;;  %4309 = vmatpush3.msra.mxu1 %v3496_v61  ;;  %v1469_v46 = vmax.f32 %v1437_v19, 0.0  ;;  %v3489_v24 = vld [vmem:[%s6587_s4 + $0x98] sm:$0xff] }
 0x257   : > { %v1312_v50 = vpop.f32.mrf.mxu0  ;;  %4180 = vmatmul.mubr.f32.gmra.mxu1 %v1467_v45  ;;  %4310 = vmatprep.subr.mxu1 %v3495_v7 }
 0x258   : > { %v1468_v53 = vmax.f32 %v1436_v9, 0.0  ;;  %v1313_v20 = vadd.f32 %v1312_v50, %v6125_v47  ;;  %4311 = vmatpush3.msra.mxu1 %v3495_v7  ;;  %v1439_v22 = vadd.f32 %v6147_v54, %v1318_v40  ;;  %v3492_v47 = vld [vmem:[%s6587_s4 + $0xb0] sm:$0xff]  ;;  %v1147_v7 = vpop.f32.mrf.mxu1 }
 0x259   : > { %v4110_v23 = vpop.f32.mrf.mxu0  ;;  %4312 = vmatprep.subr.mxu1 %v3494_v13 }
 0x25a   : > { %v1438_v58 = vadd.f32 %v6147_v54, %v1313_v20  ;;  %v1328_v59 = vadd.f32 %v4110_v23, %v6129_v11  ;;  %4182 = vmatprep.mubr.f32.mxu1 %v1468_v53  ;;  %4313 = vmatpush3.msra.mxu1 %v3494_v13  ;;  %v1471_v11 = vmax.f32 %v1439_v22, 0.0  ;;  %v4048_v20 = vpop.f32.mrf.mxu1  ;;  %v3487_v22 = vld [vmem:[%s6587_s4 + $0x88] sm:$0xff] }
 0x25b   : > { %v1322_v62 = vpop.f32.mrf.mxu0  ;;  %4183 = vmatmul.mubr.f32.gmra.mxu1 %v1469_v46  ;;  %4314 = vmatprep.subr.mxu1 %v3493_v56 }
 0x25c   : > { %v1470_v63 = vmax.f32 %v1438_v58, 0.0  ;;  %v1323_v51 = vadd.f32 %v1322_v62, %v6133_v32  ;;  %4315 = vmatpush3.msra.mxu1 %v3493_v56  ;;  %v1441_v8 = vadd.f32 %v6147_v54, %v1328_v59  ;;  %v3490_v32 = vld [vmem:[%s6587_s4 + $0xa0] sm:$0xff] }
 0x25d   : > { %v4113_v61 = vpop.f32.mrf.mxu0  ;;  %4316 = vmatprep.subr.mxu1 %v3492_v47 }
 0x25e   : > { %v1440_v31 = vadd.f32 %v6147_v54, %v1323_v51  ;;  %v1338_v6 = vadd.f32 %v4113_v61, %v6137_v48  ;;  %4185 = vmatprep.mubr.f32.mxu1 %v1470_v63  ;;  %4317 = vmatpush3.msra.mxu1 %v3492_v47  ;;  %v1473_v9 = vmax.f32 %v1441_v8, 0.0  ;;  %v1157_v63 = vpop.f32.mrf.mxu1 }
 0x25f   : > { %v1332_v16 = vpop.f32.mrf.mxu0  ;;  %4186 = vmatmul.mubr.f32.gmra.mxu1 %v1471_v11  ;;  %4318 = vmatprep.subr.mxu1 %v3491_v14 }
 0x260   : > { %v1472_v45 = vmax.f32 %v1440_v31, 0.0  ;;  %v1333_v19 = vadd.f32 %v1332_v16, %v6141_v49  ;;  %4319 = vmatpush3.msra.mxu1 %v3491_v14  ;;  %v1443_v48 = vadd.f32 %v6147_v54, %v1338_v6  ;;  %v3488_v49 = vld [vmem:[%s6587_s4 + $0x90] sm:$0xff] }
 0x261   : > { %v4116_v40 = vpop.f32.mrf.mxu0  ;;  %4320 = vmatprep.subr.mxu1 %v3490_v32 }
 0x262   : > { %v1442_v13 = vadd.f32 %v6147_v54, %v1333_v19  ;;  %v1348_v50 = vadd.f32 %v4116_v40, %v6150_v55  ;;  %4188 = vmatprep.mubr.f32.mxu1 %v1472_v45  ;;  %4321 = vmatpush3.msra.mxu1 %v3490_v32  ;;  %v1475_v23 = vmax.f32 %v1443_v48, 0.0  ;;  %v4051_v32 = vpop.f32.mrf.mxu1 }
 0x263   : > { %v1342_v53 = vpop.f32.mrf.mxu0  ;;  %4189 = vmatmul.mubr.f32.gmra.mxu1 %v1473_v9  ;;  %4322 = vmatprep.subr.mxu1 %v3489_v24 }
 0x264   : > { %v1474_v56 = vmax.f32 %v1442_v13, 0.0  ;;  %v1343_v46 = vadd.f32 %v1342_v53, %v6155_v0  ;;  %4323 = vmatpush3.msra.mxu1 %v3489_v24  ;;  %v1445_v55 = vadd.f32 %v6147_v54, %v1348_v50  ;;  %v3486_v0 = vld [vmem:[%s6587_s4 + $0x80] sm:$0xff] }
 0x265   : > { %v4119_v58 = vpop.f32.mrf.mxu0  ;;  %4324 = vmatprep.subr.mxu1 %v3488_v49 }
 0x266   : > { %v1444_v59 = vadd.f32 %v6147_v54, %v1343_v46  ;;  %v1358_v47 = vadd.f32 %v4119_v58, %v6162_v21  ;;  %4191 = vmatprep.mubr.f32.mxu1 %v1474_v56  ;;  %4325 = vmatpush3.msra.mxu1 %v3488_v49  ;;  %v1477_v11 = vmax.f32 %v1445_v55, 0.0 }
 0x267   : > { %v1352_v62 = vpop.f32.mrf.mxu0  ;;  %4192 = vmatmul.mubr.f32.gmra.mxu1 %v1475_v23  ;;  %4326 = vmatprep.subr.mxu1 %v3487_v22 }
 0x268   : > { %v1476_v51 = vmax.f32 %v1444_v59, 0.0  ;;  %v1353_v14 = vadd.f32 %v1352_v62, %v6174_v57  ;;  %4327 = vmatpush3.msra.mxu1 %v3487_v22  ;;  %v1447_v8 = vadd.f32 %v6147_v54, %v1358_v47 }
 0x269   : > { %v4122_v61 = vpop.f32.mrf.mxu0  ;;  %4328 = vmatprep.subr.mxu1 %v3486_v0 }
 0x26a   : > { %v1446_v21 = vadd.f32 %v6147_v54, %v1353_v14  ;;  %v1368_v31 = vadd.f32 %v4122_v61, %v6186_v52  ;;  %4194 = vmatprep.mubr.f32.mxu1 %v1476_v51  ;;  %4329 = vmatpush3.msra.mxu1 %v3486_v0  ;;  %v1479_v19 = vmax.f32 %v1447_v8, 0.0  ;;  %v1167_v52 = vpop.f32.mrf.mxu1 }
 0x26b   : > { %v1362_v6 = vpop.f32.mrf.mxu0  ;;  %4195 = vmatmul.mubr.f32.gmra.mxu1 %v1477_v11 }
 0x26c   : > { %v1478_v16 = vmax.f32 %v1446_v21, 0.0  ;;  %v1363_v45 = vadd.f32 %v1362_v6, %v6198_v10  ;;  %v1449_v57 = vadd.f32 %v6147_v54, %v1368_v31  ;;  %v4054_v23 = vpop.f32.mrf.mxu1 }
 0x26d   : > { %v4125_v24 = vpop.f32.mrf.mxu0 }
 0x26e   : > { %v1448_v9 = vadd.f32 %v6147_v54, %v1363_v45  ;;  %v1378_v48 = vadd.f32 %v4125_v24, %v6210_v44  ;;  %4197 = vmatprep.mubr.f32.mxu1 %v1478_v16  ;;  %v1481_v49 = vmax.f32 %v1449_v57, 0.0  ;;  %v1177_v51 = vpop.f32.mrf.mxu1 }
 0x26f   : > { %v1372_v40 = vpop.f32.mrf.mxu0  ;;  %4198 = vmatmul.mubr.f32.gmra.mxu1 %v1479_v19 }
 0x270   : > { %v1480_v13 = vmax.f32 %v1448_v9, 0.0  ;;  %v1373_v50 = vadd.f32 %v1372_v40, %v1147_v7  ;;  %v1451_v53 = vadd.f32 %v6147_v54, %v1378_v48  ;;  %v4057_v31 = vpop.f32.mrf.mxu1 }
 0x271   : > { %v4128_v56 = vpop.f32.mrf.mxu0 }
 0x272   : > { %v1450_v10 = vadd.f32 %v6147_v54, %v1373_v50  ;;  %v1388_v46 = vadd.f32 %v4128_v56, %v4048_v20  ;;  %4200 = vmatprep.mubr.f32.mxu1 %v1480_v13  ;;  %v1483_v44 = vmax.f32 %v1451_v53, 0.0  ;;  %v1187_v48 = vpop.f32.mrf.mxu1 }
 0x273   : > { %v1382_v22 = vpop.f32.mrf.mxu0  ;;  %4201 = vmatmul.mubr.f32.gmra.mxu1 %v1481_v49 }
 0x274   : > { %v1482_v55 = vmax.f32 %v1450_v10, 0.0  ;;  %v1383_v58 = vadd.f32 %v1382_v22, %v1157_v63  ;;  %v1453_v59 = vadd.f32 %v6147_v54, %v1388_v46 }
 0x275   : > { %v4131_v47 = vpop.f32.mrf.mxu0 }
 0x276   : > { %v1452_v0 = vadd.f32 %v6147_v54, %v1383_v58  ;;  %v1398_v7 = vadd.f32 %v4131_v47, %v4051_v32  ;;  %4203 = vmatprep.mubr.f32.mxu1 %v1482_v55  ;;  %v1485_v20 = vmax.f32 %v1453_v59, 0.0  ;;  %v4566_v58 = vpop.permute.xlu1 %4565 }
 0x277   : > { %v1392_v62 = vpop.f32.mrf.mxu0  ;;  %4204 = vmatmul.mubr.f32.gmra.mxu1 %v1483_v44 }
 0x278   : > { %v1484_v14 = vmax.f32 %v1452_v0, 0.0  ;;  %v1393_v11 = vadd.f32 %v1392_v62, %v1167_v52  ;;  %v1455_v8 = vadd.f32 %v6147_v54, %v1398_v7 }
 0x279   : > { %v4134_v61 = vpop.f32.mrf.mxu0 }
 0x27a   : > { %v1454_v21 = vadd.f32 %v6147_v54, %v1393_v11  ;;  %v1408_v63 = vadd.f32 %v4134_v61, %v4054_v23  ;;  %4206 = vmatprep.mubr.f32.mxu1 %v1484_v14  ;;  %v1487_v32 = vmax.f32 %v1455_v8, 0.0  ;;  %v4568_v14 = vunpack.i.h.bf16 %v4566_v58 }
 0x27b   : > { %v1402_v6 = vpop.f32.mrf.mxu0  ;;  %4207 = vmatmul.mubr.f32.gmra.mxu1 %v1485_v20 }
 0x27c   : > { %v1486_v16 = vmax.f32 %v1454_v21, 0.0  ;;  %v1403_v45 = vadd.f32 %v1402_v6, %v1177_v51  ;;  %v1457_v19 = vadd.f32 %v6147_v54, %v1408_v63  ;;  %v4567_v63 = vunpack.i.l.bf16 %v4566_v58 }
 0x27d   : > { %v4137_v57 = vpop.f32.mrf.mxu0 }
 0x27e   : > { %v1456_v24 = vadd.f32 %v6147_v54, %v1403_v45  ;;  %v1418_v9 = vadd.f32 %v4137_v57, %v4057_v31  ;;  %4209 = vmatprep.mubr.f32.mxu1 %v1486_v16  ;;  %v1489_v50 = vmax.f32 %v1457_v19, 0.0 }
 0x27f   : > { %v1412_v40 = vpop.f32.mrf.mxu0  ;;  %4210 = vmatmul.mubr.f32.gmra.mxu1 %v1487_v32 }
 0x280   : > { %v1488_v52 = vmax.f32 %v1456_v24, 0.0  ;;  %v1413_v13 = vadd.f32 %v1412_v40, %v1187_v48  ;;  %v1459_v49 = vadd.f32 %v6147_v54, %v1418_v9  ;;  %v4576_v48 = vpop.permute.xlu1 %4575 }
 0x282   : > { %v1458_v53 = vadd.f32 %v6147_v54, %v1413_v13  ;;  %4212 = vmatprep.mubr.f32.mxu1 %v1488_v52  ;;  %v1491_v10 = vmax.f32 %v1459_v49, 0.0  ;;  %v2632_v54 = vld [vmem:[#allocation5 + $0xf8] sm:$0xff] }
 0x283   : > { %4213 = vmatmul.mubr.f32.gmra.mxu1 %v1489_v50  ;;  %4378 = vmatprep.subr.mxu0 %v2632_v54 }
 0x284   : > { %v1490_v56 = vmax.f32 %v1458_v53, 0.0  ;;  %4379 = vmatpush3.msra.mxu0 %v2632_v54 }
 0x286   : > { %4215 = vmatprep.mubr.f32.mxu1 %v1490_v56 }
 0x287   : > { %4216 = vmatmul.mubr.f32.gmra.mxu1 %v1491_v10  ;;  %v4578_v10 = vunpack.i.h.bf16 %v4576_v48 }
 0x288   : > { %4330 = vmatprep.mubr.f32.mxu1 %v5946_v26  ;;  %v2630_v26 = vld [vmem:[#allocation5 + $0xe8] sm:$0xff] }
 0x28b   : > { %4331 = vmatmul.mubr.f32.vlgmr.msra.gmra.mxu1 %v5944_v25  ;;  %v2631_v25 = vld [vmem:[#allocation5 + $0xf0] sm:$0xff] }
 0x28c   : > { %4333 = vmatprep.mubr.f32.mxu1 %v5952_v28  ;;  %4380 = vmatprep.subr.mxu0 %v2631_v25  ;;  %v2628_v28 = vld [vmem:[#allocation5 + $0xd8] sm:$0xff] }
 0x28d   : > { %4381 = vmatpush3.msra.mxu0 %v2631_v25 }
 0x28e   : > { %4382 = vmatprep.subr.mxu0 %v2630_v26 }
 0x28f   : > { %4334 = vmatmul.mubr.f32.gmra.mxu1 %v5949_v27  ;;  %4383 = vmatpush3.msra.mxu0 %v2630_v26  ;;  %v2629_v27 = vld [vmem:[#allocation5 + $0xe0] sm:$0xff] }
 0x290   : > { %4336 = vmatprep.mubr.f32.mxu1 %v5958_v30  ;;  %4384 = vmatprep.subr.mxu0 %v2629_v27  ;;  %v2626_v30 = vld [vmem:[#allocation5 + $0xc8] sm:$0xff] }
 0x291   : > { %4385 = vmatpush3.msra.mxu0 %v2629_v27 }
 0x292   : > { %4386 = vmatprep.subr.mxu0 %v2628_v28 }
 0x293   : > { %4337 = vmatmul.mubr.f32.gmra.mxu1 %v5955_v29  ;;  %4387 = vmatpush3.msra.mxu0 %v2628_v28  ;;  %v2627_v29 = vld [vmem:[#allocation5 + $0xd0] sm:$0xff] }
 0x294   : > { %4339 = vmatprep.mubr.f32.mxu1 %v5964_v35  ;;  %4388 = vmatprep.subr.mxu0 %v2627_v29  ;;  %v2624_v35 = vld [vmem:[#allocation5 + $0xb8] sm:$0xff] }
 0x295   : > { %4389 = vmatpush3.msra.mxu0 %v2627_v29  ;;  %v4577_v29 = vunpack.i.l.bf16 %v4576_v48 }
 0x296   : > { %4390 = vmatprep.subr.mxu0 %v2626_v30 }
 0x297   : > { %4340 = vmatmul.mubr.f32.gmra.mxu1 %v5961_v33  ;;  %4391 = vmatpush3.msra.mxu0 %v2626_v30  ;;  %v2625_v33 = vld [vmem:[#allocation5 + $0xc0] sm:$0xff] }
 0x298   : > { %4342 = vmatprep.mubr.f32.mxu1 %v5970_v37  ;;  %4392 = vmatprep.subr.mxu0 %v2625_v33  ;;  %v6755_v37 = vld [vmem:[#allocation18_spill] sm:$0xff] }
 0x299   : > { %4393 = vmatpush3.msra.mxu0 %v2625_v33 }
 0x29a   : > { %4394 = vmatprep.subr.mxu0 %v2624_v35 }
 0x29b   : > { %4343 = vmatmul.mubr.f32.gmra.mxu1 %v5967_v36  ;;  %v6754_v36 = vld [vmem:[#allocation16_spill] sm:$0xff]  ;;  %4395 = vmatpush3.msra.mxu0 %v2624_v35 }
 0x29c   : > { %4345 = vmatprep.mubr.f32.mxu1 %v5976_v39  ;;  %v6756_v39 = vld [vmem:[#allocation12_spill] sm:$0xff] }
 0x29d   : > { %v6301_v46 = vpop.f32.mrf.mxu0 }
 0x29f   : > { %4346 = vmatmul.mubr.f32.gmra.mxu1 %v5973_v38  ;;  %v2623_v38 = vld [vmem:[#allocation5 + $0xb0] sm:$0xff]  ;;  %v6305_v51 = vpop.f32.mrf.mxu0 }
 0x2a0   : > { %4348 = vmatprep.mubr.f32.mxu1 %v5982_v3  ;;  %4396 = vmatprep.subr.mxu0 %v2623_v38  ;;  %v6757_v3 = vld [vmem:[#allocation17_spill] sm:$0xff] }
 0x2a1   : > { %4397 = vmatpush3.msra.mxu0 %v2623_v38  ;;  %v6313_v32 = vpop.f32.mrf.mxu0 }
 0x2a3   : > { %4349 = vmatmul.mubr.f32.gmra.mxu1 %v5979_v2  ;;  %v2622_v2 = vld [vmem:[#allocation5 + $0xa8] sm:$0xff]  ;;  %v6319_v56 = vpop.f32.mrf.mxu0 }
 0x2a4   : > { %4351 = vmatprep.mubr.f32.mxu1 %v5990_v1  ;;  %4398 = vmatprep.subr.mxu0 %v2622_v2  ;;  %v6759_v1 = vld [vmem:[#allocation13_spill] sm:$0xff] }
 0x2a5   : > { %4399 = vmatpush3.msra.mxu0 %v2622_v2 }
 0x2a7   : > { %4352 = vmatmul.mubr.f32.gmra.mxu1 %v5985_v41  ;;  %v6758_v41 = vld [vmem:[#allocation11_spill] sm:$0xff] }
 0x2a8   : > { %4354 = vmatprep.mubr.f32.mxu1 %v5992_v43  ;;  %v2620_v43 = vld [vmem:[#allocation5 + $0x98] sm:$0xff] }
 0x2ab   : > { %4355 = vmatmul.mubr.f32.gmra.mxu1 %v5988_v42  ;;  %v2621_v42 = vld [vmem:[#allocation5 + $0xa0] sm:$0xff] }
 0x2ac   : > { %4357 = vmatprep.mubr.f32.mxu1 %v5999_v34  ;;  %4400 = vmatprep.subr.mxu0 %v2621_v42  ;;  %v2618_v34 = vld [vmem:[#allocation5 + $0x88] sm:$0xff] }
 0x2ad   : > { %4401 = vmatpush3.msra.mxu0 %v2621_v42 }
 0x2ae   : > { %4402 = vmatprep.subr.mxu0 %v2620_v43 }
 0x2af   : > { %4358 = vmatmul.mubr.f32.gmra.mxu1 %v5996_v60  ;;  %4403 = vmatpush3.msra.mxu0 %v2620_v43  ;;  %v2619_v60 = vld [vmem:[#allocation5 + $0x90] sm:$0xff] }
 0x2b0   : > { %4360 = vmatprep.mubr.f32.mxu1 %v6005_v5  ;;  %4404 = vmatprep.subr.mxu0 %v2619_v60  ;;  %v6296_v5 = vld [vmem:[%s6591_s8] ss:$0 sm:$0xff] }
 0x2b1   : > { %4405 = vmatpush3.msra.mxu0 %v2619_v60 }
 0x2b2   : > { %4406 = vmatprep.subr.mxu0 %v2618_v34 }
 0x2b3   : > { %4361 = vmatmul.mubr.f32.gmra.mxu1 %v6002_v4  ;;  %4407 = vmatpush3.msra.mxu0 %v2618_v34  ;;  %v2617_v4 = vld [vmem:[#allocation5 + $0x80] sm:$0xff] }
 0x2b4   : > { %4363 = vmatprep.mubr.f32.mxu1 %v6011_v12  ;;  %4408 = vmatprep.subr.mxu0 %v2617_v4 }
 0x2b5   : > { %4409 = vmatpush3.msra.mxu0 %v2617_v4 }
 0x2b7   : > { %4364 = vmatmul.mubr.f32.gmra.mxu1 %v6008_v15  ;;  %v4561_v15 = vpop.permute.xlu0 %4560 }
 0x2b8   : > { %4366 = vmatprep.mubr.f32.mxu1 %v6017_v17  ;;  %v4563_v22 = vunpack.i.h.bf16 %v4561_v15  ;;  %v4562_v59 = vunpack.i.l.bf16 %v4561_v15 }
 0x2bb   : > { %4367 = vmatmul.mubr.f32.gmra.mxu1 %v6754_v36  ;;  %v4571_v61 = vpop.permute.xlu0 %4570 }
 0x2bc   : > { %4369 = vmatprep.mubr.f32.mxu1 %v6755_v37  ;;  %v4573_v19 = vunpack.i.h.bf16 %v4571_v61  ;;  %v4572_v52 = vunpack.i.l.bf16 %v4571_v61  ;;  %v6325_v37 = vpop.f32.mrf.mxu0 }
 0x2be   : > { %v6331_v15 = vpop.f32.mrf.mxu0 }
 0x2bf   : > { %4370 = vmatmul.mubr.f32.gmra.mxu1 %v6020_v18  ;;  %v4581_v27 = vpop.permute.xlu0 %4580 }
 0x2c0   : > { %4372 = vmatprep.mubr.f32.mxu1 %v6756_v39  ;;  %v4583_v38 = vunpack.i.h.bf16 %v4581_v27 }
 0x2c3   : > { %4373 = vmatmul.mubr.f32.gmra.mxu1 %v6757_v3 }
 0x2c4   : > { %4375 = vmatprep.mubr.f32.mxu1 %v6758_v41  ;;  %v4586_v41 = vpop.permute.xlu1 %4585 }
 0x2c5   : > { %v4587_v58 = vunpack.i.l.bf16 %v4586_v41 }
 0x2c7   : > { %4376 = vmatmul.mubr.f32.gmra.mxu1 %v6759_v1  ;;  %v4582_v1 = vunpack.i.l.bf16 %v4581_v27 }
 0x30b   : > { %v4172_v12 = vpop.f32.mrf.mxu1 }
 0x30c   : > { %v1587_v17 = vadd.f32 %v4172_v12, %v6296_v5  ;;  %v4588_v12 = vunpack.i.h.bf16 %v4586_v41 }
 0x30d   : > { %v1581_v18 = vpop.f32.mrf.mxu1 }
 0x30e   : > { %v1741_v23 = vmax.f32 %v1587_v17, 0.0  ;;  %v1582_v55 = vadd.f32 %v6296_v5, %v1581_v18 }
 0x30f   : > { %v4175_v44 = vpop.f32.mrf.mxu1 }
 0x310   : > { %v2029_v47 = vmul.f32 %v4563_v22, %v1741_v23  ;;  %v1740_v0 = vmax.f32 %v1582_v55, 0.0  ;;  %v1597_v7 = vadd.f32 %v4175_v44, %v6296_v5  ;;  %v4591_v23 = vpop.permute.xlu0 %4590 }
 0x311   : > { %v1591_v62 = vpop.f32.mrf.mxu1 }
 0x312   : > { %3187 = vst [vmem:[%s6307_s14 + $0x10] sm:$0xff] %v2029_v47  ;;  %v2028_v11 = vmul.f32 %v4562_v59, %v1740_v0  ;;  %v1743_v20 = vmax.f32 %v1597_v7, 0.0  ;;  %v1592_v8 = vadd.f32 %v6296_v5, %v1591_v62  ;;  %v6337_v7 = vpop.f32.mrf.mxu0  ;;  %v4593_v62 = vunpack.i.h.bf16 %v4591_v23 }
 0x313   : > { %v4178_v21 = vpop.f32.mrf.mxu1 }
 0x314   : > { %3186 = vst [vmem:[%s6307_s14] sm:$0xff] %v2028_v11  ;;  %v2031_v31 = vmul.f32 %v4568_v14, %v1743_v20  ;;  %v1742_v6 = vmax.f32 %v1592_v8, 0.0  ;;  %v1607_v16 = vadd.f32 %v4178_v21, %v6296_v5  ;;  %v4596_v8 = vpop.permute.xlu1 %4595  ;;  %v4592_v21 = vunpack.i.l.bf16 %v4591_v23  ;;  %v4601_v48 = vpop.permute.xlu0 %4600 }
 0x315   : > { %v1601_v45 = vpop.f32.mrf.mxu1 }
 0x316   : > { %3189 = vst [vmem:[%s6307_s14 + $0x30] sm:$0xff] %v2031_v31  ;;  %v2030_v57 = vmul.f32 %v4567_v63, %v1742_v6  ;;  %v1745_v24 = vmax.f32 %v1607_v16, 0.0  ;;  %v1602_v9 = vadd.f32 %v6296_v5, %v1601_v45  ;;  %v6343_v45 = vpop.f32.mrf.mxu0 }
 0x317   : > { %v4181_v40 = vpop.f32.mrf.mxu1 }
 0x318   : > { %3188 = vst [vmem:[%s6307_s14 + $0x20] sm:$0xff] %v2030_v57  ;;  %v2033_v13 = vmul.f32 %v4573_v19, %v1745_v24  ;;  %v1744_v50 = vmax.f32 %v1602_v9, 0.0  ;;  %v1617_v49 = vadd.f32 %v4181_v40, %v6296_v5  ;;  %v4598_v19 = vunpack.i.h.bf16 %v4596_v8 }
 0x319   : > { %v1611_v53 = vpop.f32.mrf.mxu1 }
 0x31a   : > { %3191 = vst [vmem:[%s6307_s14 + $0x50] sm:$0xff] %v2033_v13  ;;  %v2032_v54 = vmul.f32 %v4572_v52, %v1744_v50  ;;  %v1747_v25 = vmax.f32 %v1617_v49, 0.0  ;;  %v1612_v26 = vadd.f32 %v6296_v5, %v1611_v53  ;;  %v4597_v52 = vunpack.i.l.bf16 %v4596_v8 }
 0x31b   : > { %v4184_v28 = vpop.f32.mrf.mxu1 }
 0x31c   : > { %3190 = vst [vmem:[%s6307_s14 + $0x40] sm:$0xff] %v2032_v54  ;;  %v2035_v30 = vmul.f32 %v4578_v10, %v1747_v25  ;;  %v1746_v33 = vmax.f32 %v1612_v26, 0.0  ;;  %v1627_v35 = vadd.f32 %v4184_v28, %v6296_v5  ;;  %v6349_v10 = vpop.f32.mrf.mxu0  ;;  %v4603_v54 = vunpack.i.h.bf16 %v4601_v48  ;;  %v4606_v28 = vpop.permute.xlu1 %4605 }
 0x31d   : > { %v1621_v36 = vpop.f32.mrf.mxu1 }
 0x31e   : > { %3193 = vst [vmem:[%s6307_s14 + $0x70] sm:$0xff] %v2035_v30  ;;  %v2034_v39 = vmul.f32 %v4577_v29, %v1746_v33  ;;  %v1749_v2 = vmax.f32 %v1627_v35, 0.0  ;;  %v1622_v3 = vadd.f32 %v6296_v5, %v1621_v36  ;;  %v4602_v30 = vunpack.i.l.bf16 %v4601_v48 }
 0x31f   : > { %v4187_v42 = vpop.f32.mrf.mxu1 }
 0x320   : > { %3192 = vst [vmem:[%s6307_s14 + $0x60] sm:$0xff] %v2034_v39  ;;  %v2037_v43 = vmul.f32 %v4583_v38, %v1749_v2  ;;  %v1748_v60 = vmax.f32 %v1622_v3, 0.0  ;;  %v1637_v34 = vadd.f32 %v4187_v42, %v6296_v5  ;;  %v6355_v39 = vpop.f32.mrf.mxu0  ;;  %v4608_v2 = vunpack.i.h.bf16 %v4606_v28 }
 0x321   : > { %v1631_v4 = vpop.f32.mrf.mxu1 }
 0x322   : > { %3195 = vst [vmem:[%s6307_s14 + $0x90] sm:$0xff] %v2037_v43  ;;  %v2036_v17 = vmul.f32 %v4582_v1, %v1748_v60  ;;  %v1751_v18 = vmax.f32 %v1637_v34, 0.0  ;;  %v1632_v22 = vadd.f32 %v6296_v5, %v1631_v4  ;;  %v4611_v1 = vpop.permute.xlu0 %4610  ;;  %v4607_v60 = vunpack.i.l.bf16 %v4606_v28 }
 0x323   : > { %v4190_v55 = vpop.f32.mrf.mxu1 }
 0x324   : > { %3194 = vst [vmem:[%s6307_s14 + $0x80] sm:$0xff] %v2036_v17  ;;  %v2039_v44 = vmul.f32 %v4588_v12, %v1751_v18  ;;  %v1750_v59 = vmax.f32 %v1632_v22, 0.0  ;;  %v1647_v47 = vadd.f32 %v4190_v55, %v6296_v5  ;;  %v6361_v18 = vpop.f32.mrf.mxu0  ;;  %v4613_v22 = vunpack.i.h.bf16 %v4611_v1 }
 0x325   : > { %v1641_v0 = vpop.f32.mrf.mxu1 }
 0x326   : > { %3197 = vst [vmem:[%s6307_s14 + $0xb0] sm:$0xff] %v2039_v44  ;;  %v2038_v14 = vmul.f32 %v4587_v58, %v1750_v59  ;;  %v1753_v11 = vmax.f32 %v1647_v47, 0.0  ;;  %v1642_v20 = vadd.f32 %v6296_v5, %v1641_v0  ;;  %v4616_v44 = vpop.permute.xlu1 %4615  ;;  %v4612_v47 = vunpack.i.l.bf16 %v4611_v1 }
 0x327   : > { %v4193_v61 = vpop.f32.mrf.mxu1  ;;  %v4618_v8 = vunpack.i.h.bf16 %v4616_v44 }
 0x328   : > { %3196 = vst [vmem:[%s6307_s14 + $0xa0] sm:$0xff] %v2038_v14  ;;  %v2041_v63 = vmul.f32 %v4593_v62, %v1753_v11  ;;  %v1752_v31 = vmax.f32 %v1642_v20, 0.0  ;;  %v1657_v6 = vadd.f32 %v4193_v61, %v6296_v5  ;;  %v6367_v20 = vpop.f32.mrf.mxu0 }
 0x329   : > { %v1651_v16 = vpop.f32.mrf.mxu1 }
 0x32a   : > { %3199 = vst [vmem:[%s6307_s14 + $0xd0] sm:$0xff] %v2041_v63  ;;  %v2040_v57 = vmul.f32 %v4592_v21, %v1752_v31  ;;  %v1755_v24 = vmax.f32 %v1657_v6, 0.0  ;;  %v1652_v9 = vadd.f32 %v6296_v5, %v1651_v16  ;;  %v4621_v31 = vpop.permute.xlu0 %4620  ;;  %v4617_v16 = vunpack.i.l.bf16 %v4616_v44  ;;  %v6373_v48 = vpop.f32.mrf.mxu0 }
 0x32b   : > { %v4196_v40 = vpop.f32.mrf.mxu1 }
 0x32c   : > { %3198 = vst [vmem:[%s6307_s14 + $0xc0] sm:$0xff] %v2040_v57  ;;  %v2043_v13 = vmul.f32 %v4598_v19, %v1755_v24  ;;  %v1754_v50 = vmax.f32 %v1652_v9, 0.0  ;;  %v1667_v49 = vadd.f32 %v4196_v40, %v6296_v5  ;;  %v4623_v40 = vunpack.i.h.bf16 %v4621_v31 }
 0x32d   : > { %v1661_v53 = vpop.f32.mrf.mxu1 }
 0x32e   : > { %3201 = vst [vmem:[%s6307_s14 + $0xf0] sm:$0xff] %v2043_v13  ;;  %v2042_v25 = vmul.f32 %v4597_v52, %v1754_v50  ;;  %v1757_v26 = vmax.f32 %v1667_v49, 0.0  ;;  %v1662_v27 = vadd.f32 %v6296_v5, %v1661_v53  ;;  %v4626_v49 = vpop.permute.xlu1 %4625 }
 0x32f   : > { %v4199_v29 = vpop.f32.mrf.mxu1 }
 0x330   : > { %3200 = vst [vmem:[%s6307_s14 + $0xe0] sm:$0xff] %v2042_v25  ;;  %v2045_v33 = vmul.f32 %v4603_v54, %v1757_v26  ;;  %v1756_v35 = vmax.f32 %v1662_v27, 0.0  ;;  %v1677_v36 = vadd.f32 %v4199_v29, %v6296_v5  ;;  %v4622_v54 = vunpack.i.l.bf16 %v4621_v31  ;;  %v6379_v29 = vpop.f32.mrf.mxu0 }
 0x331   : > { %v1671_v38 = vpop.f32.mrf.mxu1 }
 0x332   : > { %3203 = vst [vmem:[%s6307_s14 + $0x110] sm:$0xff] %v2045_v33  ;;  %v2044_v3 = vmul.f32 %v4602_v30, %v1756_v35  ;;  %v1759_v41 = vmax.f32 %v1677_v36, 0.0  ;;  %v1672_v42 = vadd.f32 %v6296_v5, %v1671_v38  ;;  %v4628_v30 = vunpack.i.h.bf16 %v4626_v49  ;;  %v4631_v38 = vpop.permute.xlu0 %4630 }
 0x333   : > { %v4202_v43 = vpop.f32.mrf.mxu1 }
 0x334   : > { %3202 = vst [vmem:[%s6307_s14 + $0x100] sm:$0xff] %v2044_v3  ;;  %v2047_v34 = vmul.f32 %v4608_v2, %v1759_v41  ;;  %v1758_v4 = vmax.f32 %v1672_v42, 0.0  ;;  %v1687_v12 = vadd.f32 %v4202_v43, %v6296_v5  ;;  %v4627_v3 = vunpack.i.l.bf16 %v4626_v49 }
 0x335   : > { %v1681_v17 = vpop.f32.mrf.mxu1 }
 0x336   : > { %3205 = vst [vmem:[%s6307_s14 + $0x130] sm:$0xff] %v2047_v34  ;;  %v2046_v23 = vmul.f32 %v4607_v60, %v1758_v4  ;;  %v1761_v55 = vmax.f32 %v1687_v12, 0.0  ;;  %v1682_v58 = vadd.f32 %v6296_v5, %v1681_v17  ;;  %v6385_v60 = vpop.f32.mrf.mxu0  ;;  %v4633_v34 = vunpack.i.h.bf16 %v4631_v38 }
 0x337   : > { %v4205_v59 = vpop.f32.mrf.mxu1 }
 0x338   : > { %3204 = vst [vmem:[%s6307_s14 + $0x120] sm:$0xff] %v2046_v23  ;;  %v2049_v0 = vmul.f32 %v4613_v22, %v1761_v55  ;;  %v1760_v62 = vmax.f32 %v1682_v58, 0.0  ;;  %v1697_v14 = vadd.f32 %v4205_v59, %v6296_v5  ;;  %v4636_v22 = vpop.permute.xlu1 %4635  ;;  %v4632_v55 = vunpack.i.l.bf16 %v4631_v38 }
 0x339   : > { %v1691_v11 = vpop.f32.mrf.mxu1 }
 0x33a   : > { %3207 = vst [vmem:[%s6307_s14 + $0x150] sm:$0xff] %v2049_v0  ;;  %v2048_v61 = vmul.f32 %v4612_v47, %v1760_v62  ;;  %v1763_v21 = vmax.f32 %v1697_v14, 0.0  ;;  %v1692_v63 = vadd.f32 %v6296_v5, %v1691_v11  ;;  %v6391_v0 = vpop.f32.mrf.mxu0  ;;  %v4638_v62 = vunpack.i.h.bf16 %v4636_v22 }
 0x33b   : > { %v4208_v6 = vpop.f32.mrf.mxu1 }
 0x33c   : > { %3206 = vst [vmem:[%s6307_s14 + $0x140] sm:$0xff] %v2048_v61  ;;  %v2051_v19 = vmul.f32 %v4618_v8, %v1763_v21  ;;  %v1762_v57 = vmax.f32 %v1692_v63, 0.0  ;;  %v1707_v24 = vadd.f32 %v4208_v6, %v6296_v5  ;;  %v4637_v21 = vunpack.i.l.bf16 %v4636_v22 }
 0x33d   : > { %v1701_v9 = vpop.f32.mrf.mxu1 }
 0x33e   : > { %3209 = vst [vmem:[%s6307_s14 + $0x170] sm:$0xff] %v2051_v19  ;;  %v2050_v52 = vmul.f32 %v4617_v16, %v1762_v57  ;;  %v1765_v13 = vmax.f32 %v1707_v24, 0.0  ;;  %v1702_v50 = vadd.f32 %v6296_v5, %v1701_v9  ;;  %v6400_v16 = vld [vmem:[%s6589_s6 + $0x1] ss:$0 sm:$0xff]  ;;  %v6402_v57 = vpop.f32.mrf.mxu0 }
 0x33f   : > { %v4211_v53 = vpop.f32.mrf.mxu1 }
 0x340   : > { %3208 = vst [vmem:[%s6307_s14 + $0x160] sm:$0xff] %v2050_v52  ;;  %v2053_v25 = vmul.f32 %v4623_v40, %v1765_v13  ;;  %v1764_v26 = vmax.f32 %v1702_v50, 0.0  ;;  %v1717_v27 = vadd.f32 %v4211_v53, %v6296_v5  ;;  %v6410_v50 = vpop.f32.mrf.mxu0 }
 0x341   : > { %v1711_v28 = vpop.f32.mrf.mxu1 }
 0x342   : > { %3211 = vst [vmem:[%s6307_s14 + $0x190] sm:$0xff] %v2053_v25  ;;  %v2052_v33 = vmul.f32 %v4622_v54, %v1764_v26  ;;  %v1767_v35 = vmax.f32 %v1717_v27, 0.0  ;;  %v1712_v36 = vadd.f32 %v6296_v5, %v1711_v28 }
 0x343   : > { %v4214_v2 = vpop.f32.mrf.mxu1 }
 0x344   : > { %3210 = vst [vmem:[%s6307_s14 + $0x180] sm:$0xff] %v2052_v33  ;;  %v2055_v41 = vmul.f32 %v4628_v30, %v1767_v35  ;;  %v1766_v42 = vmax.f32 %v1712_v36, 0.0  ;;  %v1727_v1 = vadd.f32 %v4214_v2, %v6296_v5  ;;  %v6416_v30 = vpop.f32.mrf.mxu0 }
 0x345   : > { %v1721_v43 = vpop.f32.mrf.mxu1 }
 0x346   : > { %3213 = vst [vmem:[%s6307_s14 + $0x1b0] sm:$0xff] %v2055_v41  ;;  %v2054_v4 = vmul.f32 %v4627_v3, %v1766_v42  ;;  %v1769_v12 = vmax.f32 %v1727_v1, 0.0  ;;  %v1722_v17 = vadd.f32 %v6296_v5, %v1721_v43 }
 0x347   : > { %v4217_v23 = vpop.f32.mrf.mxu1 }
 0x348   : > { %3212 = vst [vmem:[%s6307_s14 + $0x1a0] sm:$0xff] %v2054_v4  ;;  %v2057_v58 = vmul.f32 %v4633_v34, %v1769_v12  ;;  %v1768_v44 = vmax.f32 %v1722_v17, 0.0  ;;  %v1737_v59 = vadd.f32 %v4217_v23, %v6296_v5 }
 0x349   : > { %v1731_v47 = vpop.f32.mrf.mxu1 }
 0x34a   : > { %3215 = vst [vmem:[%s6307_s14 + $0x1d0] sm:$0xff] %v2057_v58  ;;  %v2056_v14 = vmul.f32 %v4632_v55, %v1768_v44  ;;  %v1771_v11 = vmax.f32 %v1737_v59, 0.0  ;;  %v1732_v8 = vadd.f32 %v6296_v5, %v1731_v47 }
 0x34b   : > { %v4332_v61 = vpop.f32.mrf.mxu1 }
 0x34c   : > { %3214 = vst [vmem:[%s6307_s14 + $0x1c0] sm:$0xff] %v2056_v14  ;;  %v2059_v63 = vmul.f32 %v4638_v62, %v1771_v11  ;;  %v1770_v31 = vmax.f32 %v1732_v8, 0.0  ;;  %v2391_v6 = vadd.f32 %v4332_v61, %v6301_v46 }
 0x34d   : > { %v2385_v19 = vpop.f32.mrf.mxu1 }
 0x34e   : > { %3217 = vst [vmem:[%s6307_s14 + $0x1f0] sm:$0xff] %v2059_v63  ;;  %v2058_v24 = vmul.f32 %v4637_v21, %v1770_v31  ;;  %v2386_v9 = vadd.f32 %v2385_v19, %v6305_v51  ;;  %v2553_v5 = vadd.f32 %v6400_v16, %v2391_v6 }
 0x34f   : > { %v4335_v40 = vpop.f32.mrf.mxu1 }
 0x350   : > { %3216 = vst [vmem:[%s6307_s14 + $0x1e0] sm:$0xff] %v2058_v24  ;;  %v2552_v52 = vadd.f32 %v6400_v16, %v2386_v9  ;;  %v2401_v46 = vadd.f32 %v4335_v40, %v6313_v32  ;;  %v2585_v54 = vmax.f32 %v2553_v5, 0.0 }
 0x351   : > { %v2395_v13 = vpop.f32.mrf.mxu1 }
 0x352   : > { %v2584_v49 = vmax.f32 %v2552_v52, 0.0  ;;  %v2396_v53 = vadd.f32 %v2395_v13, %v6319_v56  ;;  %v2555_v25 = vadd.f32 %v6400_v16, %v2401_v46 }
 0x353   : > { %v4338_v26 = vpop.f32.mrf.mxu1 }
 0x354   : > { %v2554_v51 = vadd.f32 %v6400_v16, %v2396_v53  ;;  %v2411_v27 = vadd.f32 %v4338_v26, %v6325_v37  ;;  %4410 = vmatprep.mubr.f32.mxu0 %v2584_v49  ;;  %v2587_v35 = vmax.f32 %v2555_v25, 0.0  ;;  %v6422_v37 = vpop.f32.mrf.mxu0 }
 0x355   : > { %v2405_v28 = vpop.f32.mrf.mxu1  ;;  %4411 = vmatmul.mubr.f32.vlgmr.msra.gmra.mxu0 %v2585_v54 }
 0x356   : > { %v2586_v32 = vmax.f32 %v2554_v51, 0.0  ;;  %v2406_v33 = vadd.f32 %v2405_v28, %v6331_v15  ;;  %v2557_v36 = vadd.f32 %v6400_v16, %v2411_v27 }
 0x357   : > { %v4341_v56 = vpop.f32.mrf.mxu1 }
 0x358   : > { %v2556_v38 = vadd.f32 %v6400_v16, %v2406_v33  ;;  %v2421_v2 = vadd.f32 %v4341_v56, %v6337_v7  ;;  %4413 = vmatprep.mubr.f32.mxu0 %v2586_v32  ;;  %v2589_v1 = vmax.f32 %v2557_v36, 0.0  ;;  %v4282_v7 = vpop.f32.mrf.mxu0 }
 0x359   : > { %v2415_v3 = vpop.f32.mrf.mxu1  ;;  %4414 = vmatmul.mubr.f32.gmra.mxu0 %v2587_v35 }
 0x35a   : > { %v2588_v41 = vmax.f32 %v2556_v38, 0.0  ;;  %v2416_v42 = vadd.f32 %v2415_v3, %v6343_v45  ;;  %v2559_v43 = vadd.f32 %v6400_v16, %v2421_v2  ;;  %v2260_v47 = vpop.f32.mrf.mxu0 }
 0x35b   : > { %v4344_v15 = vpop.f32.mrf.mxu1 }
 0x35c   : > { %v2558_v34 = vadd.f32 %v6400_v16, %v2416_v42  ;;  %v2431_v4 = vadd.f32 %v4344_v15, %v6349_v10  ;;  %4416 = vmatprep.mubr.f32.mxu0 %v2588_v41  ;;  %v2591_v23 = vmax.f32 %v2559_v43, 0.0  ;;  %v4285_v63 = vpop.f32.mrf.mxu0 }
 0x35d   : > { %v2425_v12 = vpop.f32.mrf.mxu1  ;;  %4417 = vmatmul.mubr.f32.gmra.mxu0 %v2589_v1 }
 0x35e   : > { %v2590_v17 = vmax.f32 %v2558_v34, 0.0  ;;  %v2426_v22 = vadd.f32 %v2425_v12, %v6355_v39  ;;  %v2561_v55 = vadd.f32 %v6400_v16, %v2431_v4  ;;  %v2270_v40 = vpop.f32.mrf.mxu0 }
 0x35f   : > { %v4347_v58 = vpop.f32.mrf.mxu1 }
 0x360   : > { %v2560_v45 = vadd.f32 %v6400_v16, %v2426_v22  ;;  %v2441_v44 = vadd.f32 %v4347_v58, %v6361_v18  ;;  %4419 = vmatprep.mubr.f32.mxu0 %v2590_v17  ;;  %v2593_v14 = vmax.f32 %v2561_v55, 0.0  ;;  %v4288_v25 = vpop.f32.mrf.mxu0 }
 0x361   : > { %v2435_v59 = vpop.f32.mrf.mxu1  ;;  %4420 = vmatmul.mubr.f32.gmra.mxu0 %v2591_v23 }
 0x362   : > { %v2592_v10 = vmax.f32 %v2560_v45, 0.0  ;;  %v2436_v62 = vadd.f32 %v2435_v59, %v6367_v20  ;;  %v2563_v11 = vadd.f32 %v6400_v16, %v2441_v44  ;;  %v2280_v35 = vpop.f32.mrf.mxu0 }
 0x363   : > { %v4350_v8 = vpop.f32.mrf.mxu1 }
 0x364   : > { %v2562_v39 = vadd.f32 %v6400_v16, %v2436_v62  ;;  %v2451_v61 = vadd.f32 %v4350_v8, %v6373_v48  ;;  %4422 = vmatprep.mubr.f32.mxu0 %v2592_v10  ;;  %v2595_v6 = vmax.f32 %v2563_v11, 0.0  ;;  %v4291_v42 = vpop.f32.mrf.mxu0 }
 0x365   : > { %v2445_v21 = vpop.f32.mrf.mxu1  ;;  %4423 = vmatmul.mubr.f32.gmra.mxu0 %v2593_v14 }
 0x366   : > { %v2594_v18 = vmax.f32 %v2562_v39, 0.0  ;;  %v2446_v31 = vadd.f32 %v2445_v21, %v6379_v29  ;;  %v2565_v19 = vadd.f32 %v6400_v16, %v2451_v61  ;;  %v2290_v17 = vpop.f32.mrf.mxu0 }
 0x367   : > { %v4353_v24 = vpop.f32.mrf.mxu1 }
 0x368   : > { %v2564_v20 = vadd.f32 %v6400_v16, %v2446_v31  ;;  %v2461_v9 = vadd.f32 %v4353_v24, %v6385_v60  ;;  %4425 = vmatprep.mubr.f32.mxu0 %v2594_v18  ;;  %v2597_v46 = vmax.f32 %v2565_v19, 0.0 }
 0x369   : > { %v2455_v5 = vpop.f32.mrf.mxu1  ;;  %4426 = vmatmul.mubr.f32.gmra.mxu0 %v2595_v6 }
 0x36a   : > { %v2596_v48 = vmax.f32 %v2564_v20, 0.0  ;;  %v2456_v52 = vadd.f32 %v2455_v5, %v6391_v0  ;;  %v2567_v13 = vadd.f32 %v6400_v16, %v2461_v9 }
 0x36b   : > { %v4356_v49 = vpop.f32.mrf.mxu1 }
 0x36c   : > { %v2566_v29 = vadd.f32 %v6400_v16, %v2456_v52  ;;  %v2471_v53 = vadd.f32 %v4356_v49, %v6402_v57  ;;  %4428 = vmatprep.mubr.f32.mxu0 %v2596_v48  ;;  %v2599_v51 = vmax.f32 %v2567_v13, 0.0 }
 0x36d   : > { %v2465_v54 = vpop.f32.mrf.mxu1  ;;  %4429 = vmatmul.mubr.f32.gmra.mxu0 %v2597_v46 }
 0x36e   : > { %v2598_v60 = vmax.f32 %v2566_v29, 0.0  ;;  %v2466_v26 = vadd.f32 %v2465_v54, %v6410_v50  ;;  %v2569_v27 = vadd.f32 %v6400_v16, %v2471_v53 }
 0x36f   : > { %v4359_v28 = vpop.f32.mrf.mxu1 }
 0x370   : > { %v2568_v0 = vadd.f32 %v6400_v16, %v2466_v26  ;;  %v2481_v32 = vadd.f32 %v4359_v28, %v6416_v30  ;;  %4431 = vmatprep.mubr.f32.mxu0 %v2598_v60  ;;  %v2601_v56 = vmax.f32 %v2569_v27, 0.0 }
 0x371   : > { %v2475_v33 = vpop.f32.mrf.mxu1  ;;  %4432 = vmatmul.mubr.f32.gmra.mxu0 %v2599_v51 }
 0x372   : > { %v2600_v57 = vmax.f32 %v2568_v0, 0.0  ;;  %v2476_v36 = vadd.f32 %v2475_v33, %v6422_v37  ;;  %v2571_v38 = vadd.f32 %v6400_v16, %v2481_v32  ;;  %v6466_v33 = vld [vmem:[%s6591_s8 + $0x1] ss:$0 sm:$0xff] }
 0x373   : > { %v4362_v2 = vpop.f32.mrf.mxu1 }
 0x374   : > { %v2570_v50 = vadd.f32 %v6400_v16, %v2476_v36  ;;  %v2491_v3 = vadd.f32 %v4362_v2, %v4282_v7  ;;  %4434 = vmatprep.mubr.f32.mxu0 %v2600_v57  ;;  %v2603_v43 = vmax.f32 %v2571_v38, 0.0 }
 0x375   : > { %v2485_v41 = vpop.f32.mrf.mxu1  ;;  %4435 = vmatmul.mubr.f32.gmra.mxu0 %v2601_v56 }
 0x376   : > { %v2602_v1 = vmax.f32 %v2570_v50, 0.0  ;;  %v2486_v30 = vadd.f32 %v2485_v41, %v2260_v47  ;;  %v2573_v15 = vadd.f32 %v6400_v16, %v2491_v3  ;;  %v4294_v47 = vpop.f32.mrf.mxu0  ;;  %v4646_v50 = vpop.permute.xlu1 %4645 }
 0x377   : > { %v4365_v34 = vpop.f32.mrf.mxu1 }
 0x378   : > { %v2572_v4 = vadd.f32 %v6400_v16, %v2486_v30  ;;  %v2501_v37 = vadd.f32 %v4365_v34, %v4285_v63  ;;  %4437 = vmatprep.mubr.f32.mxu0 %v2602_v1  ;;  %v2605_v7 = vmax.f32 %v2573_v15, 0.0  ;;  %v2300_v63 = vpop.f32.mrf.mxu0  ;;  %v4648_v15 = vunpack.i.h.bf16 %v4646_v50 }
 0x379   : > { %v2495_v12 = vpop.f32.mrf.mxu1  ;;  %4438 = vmatmul.mubr.f32.gmra.mxu0 %v2603_v43 }
 0x37a   : > { %v2604_v22 = vmax.f32 %v2572_v4, 0.0  ;;  %v2496_v23 = vadd.f32 %v2495_v12, %v2270_v40  ;;  %v2575_v55 = vadd.f32 %v6400_v16, %v2501_v37  ;;  %v4297_v5 = vpop.f32.mrf.mxu0 }
 0x37b   : > { %v4368_v58 = vpop.f32.mrf.mxu1 }
 0x37c   : > { %v2574_v45 = vadd.f32 %v6400_v16, %v2496_v23  ;;  %v2511_v44 = vadd.f32 %v4368_v58, %v4288_v25  ;;  %4440 = vmatprep.mubr.f32.mxu0 %v2604_v22  ;;  %v2607_v14 = vmax.f32 %v2575_v55, 0.0  ;;  %v2310_v54 = vpop.f32.mrf.mxu0  ;;  %v4647_v22 = vunpack.i.l.bf16 %v4646_v50 }
 0x37d   : > { %v2505_v59 = vpop.f32.mrf.mxu1  ;;  %4441 = vmatmul.mubr.f32.gmra.mxu0 %v2605_v7 }
 0x37e   : > { %v2606_v10 = vmax.f32 %v2574_v45, 0.0  ;;  %v2506_v62 = vadd.f32 %v2505_v59, %v2280_v35  ;;  %v2577_v11 = vadd.f32 %v6400_v16, %v2511_v44  ;;  %v4641_v35 = vpop.permute.xlu0 %4640 }
 0x37f   : > { %v4371_v8 = vpop.f32.mrf.mxu1  ;;  %v4643_v38 = vunpack.i.h.bf16 %v4641_v35  ;;  %v4642_v41 = vunpack.i.l.bf16 %v4641_v35 }
 0x380   : > { %v2576_v39 = vadd.f32 %v6400_v16, %v2506_v62  ;;  %v2521_v61 = vadd.f32 %v4371_v8, %v4291_v42  ;;  %4443 = vmatprep.mubr.f32.mxu0 %v2606_v10  ;;  %v2609_v6 = vmax.f32 %v2577_v11, 0.0  ;;  %v4656_v10 = vpop.permute.xlu1 %4655 }
 0x381   : > { %v2515_v21 = vpop.f32.mrf.mxu1  ;;  %4444 = vmatmul.mubr.f32.gmra.mxu0 %v2607_v14 }
 0x382   : > { %v2608_v18 = vmax.f32 %v2576_v39, 0.0  ;;  %v2516_v31 = vadd.f32 %v2515_v21, %v2290_v17  ;;  %v2579_v19 = vadd.f32 %v6400_v16, %v2521_v61  ;;  %v4651_v12 = vpop.permute.xlu0 %4650  ;;  %v4658_v21 = vunpack.i.h.bf16 %v4656_v10 }
 0x383   : > { %v4374_v24 = vpop.f32.mrf.mxu1  ;;  %v4653_v45 = vunpack.i.h.bf16 %v4651_v12  ;;  %v4652_v14 = vunpack.i.l.bf16 %v4651_v12 }
 0x384   : > { %v2578_v20 = vadd.f32 %v6400_v16, %v2516_v31  ;;  %v2531_v9 = vadd.f32 %v4374_v24, %v4294_v47  ;;  %4446 = vmatprep.mubr.f32.mxu0 %v2608_v18  ;;  %v2611_v46 = vmax.f32 %v2579_v19, 0.0  ;;  %v4657_v24 = vunpack.i.l.bf16 %v4656_v10 }
 0x385   : > { %v2525_v40 = vpop.f32.mrf.mxu1  ;;  %4447 = vmatmul.mubr.f32.gmra.mxu0 %v2609_v6 }
 0x386   : > { %v2610_v48 = vmax.f32 %v2578_v20, 0.0  ;;  %v2526_v52 = vadd.f32 %v2525_v40, %v2300_v63  ;;  %v2581_v13 = vadd.f32 %v6400_v16, %v2531_v9  ;;  %v4661_v6 = vpop.permute.xlu0 %4660 }
 0x387   : > { %v4377_v49 = vpop.f32.mrf.mxu1 }
 0x388   : > { %v2580_v29 = vadd.f32 %v6400_v16, %v2526_v52  ;;  %v2541_v53 = vadd.f32 %v4377_v49, %v4297_v5  ;;  %4449 = vmatprep.mubr.f32.mxu0 %v2610_v48  ;;  %v2613_v51 = vmax.f32 %v2581_v13, 0.0  ;;  %v4663_v48 = vunpack.i.h.bf16 %v4661_v6  ;;  %v4666_v49 = vpop.permute.xlu1 %4665 }
 0x389   : > { %v2535_v25 = vpop.f32.mrf.mxu1  ;;  %4450 = vmatmul.mubr.f32.gmra.mxu0 %v2611_v46 }
 0x38a   : > { %v2612_v60 = vmax.f32 %v2580_v29, 0.0  ;;  %v2536_v26 = vadd.f32 %v2535_v25, %v2310_v54  ;;  %v2583_v27 = vadd.f32 %v6400_v16, %v2541_v53  ;;  %v4662_v53 = vunpack.i.l.bf16 %v4661_v6 }
 0x38c   : > { %v2582_v28 = vadd.f32 %v6400_v16, %v2536_v26  ;;  %4452 = vmatprep.mubr.f32.mxu0 %v2612_v60  ;;  %v2615_v32 = vmax.f32 %v2583_v27, 0.0 }
 0x38d   : > { %4453 = vmatmul.mubr.f32.gmra.mxu0 %v2613_v51  ;;  %v4668_v51 = vunpack.i.h.bf16 %v4666_v49 }
 0x38e   : > { %v2614_v0 = vmax.f32 %v2582_v28, 0.0 }
 0x390   : > { %4455 = vmatprep.mubr.f32.mxu0 %v2614_v0 }
 0x391   : > { %4456 = vmatmul.mubr.f32.gmra.mxu0 %v2615_v32  ;;  %v4671_v32 = vpop.permute.xlu0 %4670 }
 0x415   : > { %v4412_v57 = vpop.f32.mrf.mxu0 }
 0x416   : > { %v2713_v36 = vadd.f32 %v4412_v57, %v6466_v33  ;;  %v4667_v57 = vunpack.i.l.bf16 %v4666_v49 }
 0x417   : > { %v2707_v56 = vpop.f32.mrf.mxu0 }
 0x418   : > { %v2867_v2 = vmax.f32 %v2713_v36, 0.0  ;;  %v2708_v16 = vadd.f32 %v6466_v33, %v2707_v56 }
 0x419   : > { %v4415_v3 = vpop.f32.mrf.mxu0 }
 0x41a   : > { %v3155_v42 = vmul.f32 %v4643_v38, %v2867_v2  ;;  %v2866_v1 = vmax.f32 %v2708_v16, 0.0  ;;  %v2723_v30 = vadd.f32 %v4415_v3, %v6466_v33  ;;  %v4673_v16 = vunpack.i.h.bf16 %v4671_v32 }
 0x41b   : > { %v2717_v43 = vpop.f32.mrf.mxu0 }
 0x41c   : > { %3219 = vst [vmem:[%s6307_s14 + $0x18] sm:$0xff] %v3155_v42  ;;  %v3154_v34 = vmul.f32 %v4642_v41, %v2866_v1  ;;  %v2869_v4 = vmax.f32 %v2723_v30, 0.0  ;;  %v2718_v37 = vadd.f32 %v6466_v33, %v2717_v43  ;;  %v4676_v42 = vpop.permute.xlu1 %4675  ;;  %v4672_v30 = vunpack.i.l.bf16 %v4671_v32 }
 0x41d   : > { %v4418_v17 = vpop.f32.mrf.mxu0 }
 0x41e   : > { %3218 = vst [vmem:[%s6307_s14 + $0x8] sm:$0xff] %v3154_v34  ;;  %v3157_v23 = vmul.f32 %v4648_v15, %v2869_v4  ;;  %v2868_v7 = vmax.f32 %v2718_v37, 0.0  ;;  %v2733_v55 = vadd.f32 %v4418_v17, %v6466_v33  ;;  %v4678_v37 = vunpack.i.h.bf16 %v4676_v42 }
 0x41f   : > { %v2727_v58 = vpop.f32.mrf.mxu0 }
 0x420   : > { %3221 = vst [vmem:[%s6307_s14 + $0x38] sm:$0xff] %v3157_v23  ;;  %v3156_v44 = vmul.f32 %v4647_v22, %v2868_v7  ;;  %v2871_v59 = vmax.f32 %v2733_v55, 0.0  ;;  %v2728_v47 = vadd.f32 %v6466_v33, %v2727_v58  ;;  %v4681_v23 = vpop.permute.xlu0 %4680  ;;  %v4677_v55 = vunpack.i.l.bf16 %v4676_v42 }
 0x421   : > { %v4421_v62 = vpop.f32.mrf.mxu0 }
 0x422   : > { %3220 = vst [vmem:[%s6307_s14 + $0x28] sm:$0xff] %v3156_v44  ;;  %v3159_v11 = vmul.f32 %v4653_v45, %v2871_v59  ;;  %v2870_v8 = vmax.f32 %v2728_v47, 0.0  ;;  %v2743_v39 = vadd.f32 %v4421_v62, %v6466_v33  ;;  %v4683_v47 = vunpack.i.h.bf16 %v4681_v23 }
 0x423   : > { %v2737_v61 = vpop.f32.mrf.mxu0 }
 0x424   : > { %3223 = vst [vmem:[%s6307_s14 + $0x58] sm:$0xff] %v3159_v11  ;;  %v3158_v63 = vmul.f32 %v4652_v14, %v2870_v8  ;;  %v2873_v18 = vmax.f32 %v2743_v39, 0.0  ;;  %v2738_v31 = vadd.f32 %v6466_v33, %v2737_v61  ;;  %v4686_v11 = vpop.permute.xlu1 %4685  ;;  %v4682_v39 = vunpack.i.l.bf16 %v4681_v23 }
 0x425   : > { %v4424_v19 = vpop.f32.mrf.mxu0 }
 0x426   : > { %3222 = vst [vmem:[%s6307_s14 + $0x48] sm:$0xff] %v3158_v63  ;;  %v3161_v20 = vmul.f32 %v4658_v21, %v2873_v18  ;;  %v2872_v9 = vmax.f32 %v2738_v31, 0.0  ;;  %v2753_v5 = vadd.f32 %v4424_v19, %v6466_v33  ;;  %v4688_v31 = vunpack.i.h.bf16 %v4686_v11 }
 0x427   : > { %v2747_v40 = vpop.f32.mrf.mxu0 }
 0x428   : > { %3225 = vst [vmem:[%s6307_s14 + $0x78] sm:$0xff] %v3161_v20  ;;  %v3160_v52 = vmul.f32 %v4657_v24, %v2872_v9  ;;  %v2875_v46 = vmax.f32 %v2753_v5, 0.0  ;;  %v2748_v13 = vadd.f32 %v6466_v33, %v2747_v40  ;;  %v4691_v20 = vpop.permute.xlu0 %4690  ;;  %v4687_v5 = vunpack.i.l.bf16 %v4686_v11 }
 0x429   : > { %v4427_v29 = vpop.f32.mrf.mxu0 }
 0x42a   : > { %3224 = vst [vmem:[%s6307_s14 + $0x68] sm:$0xff] %v3160_v52  ;;  %v3163_v54 = vmul.f32 %v4663_v48, %v2875_v46  ;;  %v2874_v25 = vmax.f32 %v2748_v13, 0.0  ;;  %v2763_v60 = vadd.f32 %v4427_v29, %v6466_v33  ;;  %v4693_v13 = vunpack.i.h.bf16 %v4691_v20 }
 0x42b   : > { %v2757_v26 = vpop.f32.mrf.mxu0 }
 0x42c   : > { %3227 = vst [vmem:[%s6307_s14 + $0x98] sm:$0xff] %v3163_v54  ;;  %v3162_v27 = vmul.f32 %v4662_v53, %v2874_v25  ;;  %v2877_v28 = vmax.f32 %v2763_v60, 0.0  ;;  %v2758_v0 = vadd.f32 %v6466_v33, %v2757_v26  ;;  %v4696_v54 = vpop.permute.xlu1 %4695  ;;  %v4692_v60 = vunpack.i.l.bf16 %v4691_v20 }
 0x42d   : > { %v4430_v35 = vpop.f32.mrf.mxu0 }
 0x42e   : > { %3226 = vst [vmem:[%s6307_s14 + $0x88] sm:$0xff] %v3162_v27  ;;  %v3165_v36 = vmul.f32 %v4668_v51, %v2877_v28  ;;  %v2876_v56 = vmax.f32 %v2758_v0, 0.0  ;;  %v2773_v38 = vadd.f32 %v4430_v35, %v6466_v33  ;;  %v4698_v0 = vunpack.i.h.bf16 %v4696_v54 }
 0x42f   : > { %v2767_v2 = vpop.f32.mrf.mxu0 }
 0x430   : > { %3229 = vst [vmem:[%s6307_s14 + $0xb8] sm:$0xff] %v3165_v36  ;;  %v3164_v50 = vmul.f32 %v4667_v57, %v2876_v56  ;;  %v2879_v3 = vmax.f32 %v2773_v38, 0.0  ;;  %v2768_v41 = vadd.f32 %v6466_v33, %v2767_v2  ;;  %v4701_v36 = vpop.permute.xlu0 %4700  ;;  %v4697_v38 = vunpack.i.l.bf16 %v4696_v54 }
 0x431   : > { %v4433_v1 = vpop.f32.mrf.mxu0 }
 0x432   : > { %3228 = vst [vmem:[%s6307_s14 + $0xa8] sm:$0xff] %v3164_v50  ;;  %v3167_v43 = vmul.f32 %v4673_v16, %v2879_v3  ;;  %v2878_v15 = vmax.f32 %v2768_v41, 0.0  ;;  %v2783_v34 = vadd.f32 %v4433_v1, %v6466_v33  ;;  %v4703_v41 = vunpack.i.h.bf16 %v4701_v36 }
 0x433   : > { %v2777_v4 = vpop.f32.mrf.mxu0 }
 0x434   : > { %3231 = vst [vmem:[%s6307_s14 + $0xd8] sm:$0xff] %v3167_v43  ;;  %v3166_v12 = vmul.f32 %v4672_v30, %v2878_v15  ;;  %v2881_v17 = vmax.f32 %v2783_v34, 0.0  ;;  %v2778_v22 = vadd.f32 %v6466_v33, %v2777_v4  ;;  %v4706_v43 = vpop.permute.xlu1 %4705  ;;  %v4702_v34 = vunpack.i.l.bf16 %v4701_v36 }
 0x435   : > { %v4436_v7 = vpop.f32.mrf.mxu0 }
 0x436   : > { %3230 = vst [vmem:[%s6307_s14 + $0xc8] sm:$0xff] %v3166_v12  ;;  %v3169_v58 = vmul.f32 %v4678_v37, %v2881_v17  ;;  %v2880_v45 = vmax.f32 %v2778_v22, 0.0  ;;  %v2793_v44 = vadd.f32 %v4436_v7, %v6466_v33  ;;  %v4708_v22 = vunpack.i.h.bf16 %v4706_v43 }
 0x437   : > { %v2787_v59 = vpop.f32.mrf.mxu0 }
 0x438   : > { %3233 = vst [vmem:[%s6307_s14 + $0xf8] sm:$0xff] %v3169_v58  ;;  %v3168_v10 = vmul.f32 %v4677_v55, %v2880_v45  ;;  %v2883_v62 = vmax.f32 %v2793_v44, 0.0  ;;  %v2788_v14 = vadd.f32 %v6466_v33, %v2787_v59  ;;  %v4711_v58 = vpop.permute.xlu0 %4710  ;;  %v4707_v44 = vunpack.i.l.bf16 %v4706_v43 }
 0x439   : > { %v4439_v8 = vpop.f32.mrf.mxu0 }
 0x43a   : > { %3232 = vst [vmem:[%s6307_s14 + $0xe8] sm:$0xff] %v3168_v10  ;;  %v3171_v61 = vmul.f32 %v4683_v47, %v2883_v62  ;;  %v2882_v21 = vmax.f32 %v2788_v14, 0.0  ;;  %v2803_v63 = vadd.f32 %v4439_v8, %v6466_v33  ;;  %v4713_v14 = vunpack.i.h.bf16 %v4711_v58 }
 0x43b   : > { %v2797_v18 = vpop.f32.mrf.mxu0 }
 0x43c   : > { %3235 = vst [vmem:[%s6307_s14 + $0x118] sm:$0xff] %v3171_v61  ;;  %v3170_v6 = vmul.f32 %v4682_v39, %v2882_v21  ;;  %v2885_v19 = vmax.f32 %v2803_v63, 0.0  ;;  %v2798_v24 = vadd.f32 %v6466_v33, %v2797_v18  ;;  %v4716_v61 = vpop.permute.xlu1 %4715  ;;  %v4712_v63 = vunpack.i.l.bf16 %v4711_v58 }
 0x43d   : > { %v4442_v9 = vpop.f32.mrf.mxu0 }
 0x43e   : > { %3234 = vst [vmem:[%s6307_s14 + $0x108] sm:$0xff] %v3170_v6  ;;  %v3173_v40 = vmul.f32 %v4688_v31, %v2885_v19  ;;  %v2884_v48 = vmax.f32 %v2798_v24, 0.0  ;;  %v2813_v52 = vadd.f32 %v4442_v9, %v6466_v33  ;;  %v4718_v24 = vunpack.i.h.bf16 %v4716_v61 }
 0x43f   : > { %v2807_v46 = vpop.f32.mrf.mxu0 }
 0x440   : > { %3237 = vst [vmem:[%s6307_s14 + $0x138] sm:$0xff] %v3173_v40  ;;  %v3172_v49 = vmul.f32 %v4687_v5, %v2884_v48  ;;  %v2887_v29 = vmax.f32 %v2813_v52, 0.0  ;;  %v2808_v53 = vadd.f32 %v6466_v33, %v2807_v46  ;;  %v4717_v40 = vunpack.i.l.bf16 %v4716_v61 }
 0x441   : > { %v4445_v25 = vpop.f32.mrf.mxu0 }
 0x442   : > { %3236 = vst [vmem:[%s6307_s14 + $0x128] sm:$0xff] %v3172_v49  ;;  %v3175_v26 = vmul.f32 %v4693_v13, %v2887_v29  ;;  %v2886_v51 = vmax.f32 %v2808_v53, 0.0  ;;  %v2823_v27 = vadd.f32 %v4445_v25, %v6466_v33 }
 0x443   : > { %v2817_v28 = vpop.f32.mrf.mxu0 }
 0x444   : > { %3239 = vst [vmem:[%s6307_s14 + $0x158] sm:$0xff] %v3175_v26  ;;  %v3174_v32 = vmul.f32 %v4692_v60, %v2886_v51  ;;  %v2889_v35 = vmax.f32 %v2823_v27, 0.0  ;;  %v2818_v57 = vadd.f32 %v6466_v33, %v2817_v28 }
 0x445   : > { %v4448_v56 = vpop.f32.mrf.mxu0 }
 0x446   : > { %3238 = vst [vmem:[%s6307_s14 + $0x148] sm:$0xff] %v3174_v32  ;;  %v3177_v2 = vmul.f32 %v4698_v0, %v2889_v35  ;;  %v2888_v16 = vmax.f32 %v2818_v57, 0.0  ;;  %v2833_v50 = vadd.f32 %v4448_v56, %v6466_v33 }
 0x447   : > { %v2827_v3 = vpop.f32.mrf.mxu0 }
 0x448   : > { %3241 = vst [vmem:[%s6307_s14 + $0x178] sm:$0xff] %v3177_v2  ;;  %v3176_v42 = vmul.f32 %v4697_v38, %v2888_v16  ;;  %v2891_v1 = vmax.f32 %v2833_v50, 0.0  ;;  %v2828_v30 = vadd.f32 %v6466_v33, %v2827_v3 }
 0x449   : > { %v4451_v15 = vpop.f32.mrf.mxu0 }
 0x44a   : > { %3240 = vst [vmem:[%s6307_s14 + $0x168] sm:$0xff] %v3176_v42  ;;  %v3179_v4 = vmul.f32 %v4703_v41, %v2891_v1  ;;  %v2890_v37 = vmax.f32 %v2828_v30, 0.0  ;;  %v2843_v12 = vadd.f32 %v4451_v15, %v6466_v33 }
 0x44b   : > { %v2837_v17 = vpop.f32.mrf.mxu0 }
 0x44c   : > { %3243 = vst [vmem:[%s6307_s14 + $0x198] sm:$0xff] %v3179_v4  ;;  %v3178_v23 = vmul.f32 %v4702_v34, %v2890_v37  ;;  %v2893_v7 = vmax.f32 %v2843_v12, 0.0  ;;  %v2838_v55 = vadd.f32 %v6466_v33, %v2837_v17 }
 0x44d   : > { %v4454_v45 = vpop.f32.mrf.mxu0 }
 0x44e   : > { %3242 = vst [vmem:[%s6307_s14 + $0x188] sm:$0xff] %v3178_v23  ;;  %v3181_v59 = vmul.f32 %v4708_v22, %v2893_v7  ;;  %v2892_v47 = vmax.f32 %v2838_v55, 0.0  ;;  %v2853_v10 = vadd.f32 %v4454_v45, %v6466_v33 }
 0x44f   : > { %v2847_v62 = vpop.f32.mrf.mxu0 }
 0x450   : > { %3245 = vst [vmem:[%s6307_s14 + $0x1b8] sm:$0xff] %v3181_v59  ;;  %v3180_v11 = vmul.f32 %v4707_v44, %v2892_v47  ;;  %v2895_v8 = vmax.f32 %v2853_v10, 0.0  ;;  %v2848_v39 = vadd.f32 %v6466_v33, %v2847_v62 }
 0x451   : > { %v4457_v21 = vpop.f32.mrf.mxu0 }
 0x452   : > { %3244 = vst [vmem:[%s6307_s14 + $0x1a8] sm:$0xff] %v3180_v11  ;;  %v3183_v18 = vmul.f32 %v4713_v14, %v2895_v8  ;;  %v2894_v31 = vmax.f32 %v2848_v39, 0.0  ;;  %v2863_v6 = vadd.f32 %v4457_v21, %v6466_v33 }
 0x453   : > { %v2857_v19 = vpop.f32.mrf.mxu0 }
 0x454   : > { %3247 = vst [vmem:[%s6307_s14 + $0x1d8] sm:$0xff] %v3183_v18  ;;  %v3182_v20 = vmul.f32 %v4712_v63, %v2894_v31  ;;  %v2897_v9 = vmax.f32 %v2863_v6, 0.0  ;;  %v2858_v5 = vadd.f32 %v6466_v33, %v2857_v19 }
 0x456   : > { %3246 = vst [vmem:[%s6307_s14 + $0x1c8] sm:$0xff] %v3182_v20  ;;  %v3185_v48 = vmul.f32 %v4718_v24, %v2897_v9  ;;  %v2896_v52 = vmax.f32 %v2858_v5, 0.0 }
 0x458   : > { %3249 = vst [vmem:[%s6307_s14 + $0x1f8] sm:$0xff] %v3185_v48  ;;  %v3184_v46 = vmul.f32 %v4717_v40, %v2896_v52 }
 0x45a   : > { %3248 = vst [vmem:[%s6307_s14 + $0x1e8] sm:$0xff] %v3184_v46 }
 0x45b   : > { %4784 = shalt.err (!%p4781_p3)
}
 0x45c   : > { %s4785_s26 = scalar_lea.hbm %s6535_s28, 8192  ;;  %s4789_s25 = scalar_lea.hbm %s6592_s9, 16384 }
 0x45d   : > { %p4786_p2 = scmp.ne.s32.totalorder %s6535_s28, %s4785_s26  ;;  %p4790_p7 = scmp.lt.s32.totalorder %s6535_s28, %s6592_s9 }
 0x45e   : > { %p4791_p6 = scmp.lt.s32.totalorder %s4789_s25, %s4785_s26 }
 0x45f   : > { %p4787_p4 = pnand %p4786_p2, %p4939_p5 }
 0x460   : > { %p4792_p9 = por %p4791_p6, %p4790_p7 }
 0x461   : > { %p4788_p13 = pneg %p4787_p4 }
 0x463   : > { %p4793_p10 = pnand %p4792_p9, %p4788_p13 }
 0x465   : > { %4796 = shalt.err (!%p4793_p10)
}
 0x466   : > { %s4849_s29 = smov 256   ;;  %s4850_s16 = smov 16  }
 0x467   : > { %4498 = dma.vmem_to_hbm [thread:$0]  (%p4939_p5), %s6537_s23, 8192, %s6535_s28, %s6543_s13, %s4849_s29, %s4849_s29, %s4850_s16  }
 0x468 PF: > { %p4515_p12 = scmp.ge.s32.totalorder %s4839_s12, 2  ;;  %s3280_s21 = sand.u32 1, %s4827_s30  }
 0x469   : > { %p6760_p8 = scmp.ne.s32.totalorder %s6641_s20, 0  ;;  %s3281_s17 = scalar_lea.sflag [#allocation4], %s3280_s21 }
 0x46b   : > { %p4508_p11 = pnand %p4515_p12, %p6760_p8 }
 0x46d   : > { %p4509_p0 = pneg %p4508_p11 }
 0x46f   : > { %4822 = dma.done.wait (%p4509_p0), %s3281_s17, 8192  }
 0x470   : > { %4824 = vsyncadd (%p4509_p0), %s3281_s17, 4294959104  ;;  %p21_p1 = scmp.ge.s32.totalorder %s4926_s15, 4   ;;  %s6761_s30 = smov %s4831_s10 }
 0x471   : > { %s6762_s10 = smov %s4835_s11  ;;  %s6763_s11 = smov %s4937_s18 }
 0x472   : > { %s6764_s12 = smov %s4926_s15  ;;  %23 = sbr.rel (!%p21_p1) target bundleno = 5 (0x5), region = 111 }
 0x477   :  { %3286 = vsyncpa [#allocation3], 1 }
 0x478   :  { %3288 = vsyncpa [#allocation3 + $0x1], 1 }
 0x479   :  { %3289 = vsyncpa [#allocation6], 1 }
 0x47a   :  { %3290 = vsyncpa [#allocation4], 1 }
 0x47b   :  { %3292 = vsyncpa [#allocation4 + $0x1], 1 }

</bundles_post_ra>
